<compile_context>
chip_gen: v6e
topology: v6e:2x2x1
jax: 0.10.0
libtpu: 0.0.40
codegen_flags: <defaults>
</compile_context>

<pallas_src>
import functools

import jax
import jax.numpy as jnp
from jax import lax
from jax.experimental import pallas as pl
from jax.experimental.pallas import tpu as pltpu

_PAD = 8  # spare scratch rows before/after the data so the no-roll fallback's +/-1 reads stay in-bounds


def _relu6(x):
    return jnp.clip(x, 0.0, 6.0)


def _choose_th(H, target):
    """Largest even divisor of H that is <= target (falls back to H => single tile)."""
    if H <= target:
        return H
    for th in range(min(target, H), 1, -1):
        if th % 2 == 0 and H % th == 0:
            return th
    return H


@functools.lru_cache(maxsize=None)
def _roll_ok(F, C):
    """True iff pltpu.roll lowers for an (F, C) f32 sublane roll AND matches jnp.roll semantics."""
    def k(x_ref, o_ref):
        o_ref[...] = (pltpu.roll(x_ref[...], shift=1, axis=0)
                      + 2.0 * pltpu.roll(x_ref[...], shift=F - 1, axis=0))

    try:
        x = jnp.arange(F * C, dtype=jnp.float32).reshape(F, C)
        y = jax.block_until_ready(
            pl.pallas_call(k, out_shape=jax.ShapeDtypeStruct((F, C), jnp.float32))(x))
        expect = jnp.roll(x, 1, axis=0) + 2.0 * jnp.roll(x, F - 1, axis=0)
        return bool(jnp.array_equal(y, expect))
    except Exception:
        return False


def _make_resblock_kernel(TH, W, C, n_tiles, use_bf16, use_roll):
    F1 = (TH + 2) * W     # layer-2 input rows (tile + 1-row halo each side), flat layout
    F2 = TH * W           # tile rows, flat layout
    mm_dtype = jnp.bfloat16 if use_bf16 else jnp.float32
    last = n_tiles - 1

    def kernel(x_ref, top_ref, bot_ref,
               dw1_ref, pw1_ref, b1_ref,
               dw2_ref, pw2_ref, b2_ref,
               o_ref, padA, padB):
        i = pl.program_id(1)

        x = x_ref[0].reshape(F2, C)                       # layout-free when W % 8 == 0

        # ---- assemble layer-1 input: [2-row halo | TH-row tile | 2-row halo] (flat, aligned) ----
        padA[pl.ds(_PAD + 2 * W, F2), :] = x

        @pl.when(i == 0)
        def _():
            padA[pl.ds(_PAD, 2 * W), :] = jnp.zeros((2 * W, C), jnp.float32)

        @pl.when(i > 0)
        def _():
            padA[pl.ds(_PAD, 2 * W), :] = top_ref[0].reshape(2 * W, C)

        @pl.when(i == last)
        def _():
            padA[pl.ds(_PAD + (TH + 2) * W, 2 * W), :] = jnp.zeros((2 * W, C), jnp.float32)

        @pl.when(i < last)
        def _():
            padA[pl.ds(_PAD + (TH + 2) * W, 2 * W), :] = bot_ref[0].reshape(2 * W, C)

        # Border-column index (built once per step, shared by both layers): the W +/-1 shift drags
        # in a wrapped / neighbouring-row element exactly at w == 0 (left tap) / w == W-1 (right
        # tap); true SAME padding wants 0 there.
        wcol = lax.broadcasted_iota(jnp.int32, (TH + 2, W, C), 1).reshape(F1, C)
        wcol2 = wcol[:F2]
        ml1, mr1 = wcol != 0, wcol != (W - 1)
        ml2, mr2 = wcol2 != 0, wcol2 != (W - 1)

        def dw3x3(src_ref, F, dw_ref, ml, mr):
            # 3 aligned row-band reads; W +/-1 taps via XLU sublane rolls of the flat band
            # (fallback: +/-1-row offset reads of the same scratch).
            cacc = lacc = racc = None
            for dy in range(3):
                base = _PAD + dy * W
                band = src_ref[pl.ds(base, F), :]
                if use_roll:
                    left = pltpu.roll(band, shift=1, axis=0)
                    right = pltpu.roll(band, shift=F - 1, axis=0)
                else:
                    left = src_ref[pl.ds(base - 1, F), :]
                    right = src_ref[pl.ds(base + 1, F), :]
                c = band * dw_ref[dy, 1, :]
                l = left * dw_ref[dy, 0, :]
                r = right * dw_ref[dy, 2, :]
                cacc = c if cacc is None else cacc + c
                lacc = l if lacc is None else lacc + l
                racc = r if racc is None else racc + r
            # mask once per layer (select, not multiply, so uninitialised-scratch junk can't leak)
            return cacc + jnp.where(ml, lacc, 0.0) + jnp.where(mr, racc, 0.0)

        def pw_bn_relu6(acc, pw_ref, b_ref):
            # depthwise bias + pointwise bias + BN scale/bias are pre-folded into pw / b
            y = jnp.dot(acc.astype(mm_dtype), pw_ref[...],
                        preferred_element_type=jnp.float32)
            return _relu6(y + b_ref[0, :])

        # ---- layer 1: tile rows plus a 1-row halo for layer 2 ----
        y1 = pw_bn_relu6(dw3x3(padA, F1, dw1_ref, ml1, mr1), pw1_ref, b1_ref)
        padB[pl.ds(_PAD, F1), :] = y1

        # at the true image border layer 2 must see SAME-padding zeros, not conv1(zero rows)
        @pl.when(i == 0)
        def _():
            padB[pl.ds(_PAD, W), :] = jnp.zeros((W, C), jnp.float32)

        @pl.when(i == last)
        def _():
            padB[pl.ds(_PAD + (TH + 1) * W, W), :] = jnp.zeros((W, C), jnp.float32)

        # ---- layer 2 + residual ----
        y2 = pw_bn_relu6(dw3x3(padB, F2, dw2_ref, ml2, mr2), pw2_ref, b2_ref)
        o_ref[0] = _relu6(x + y2).reshape(TH, W, C)

    return kernel


def resblock_pallas_nhwc(x_nhwc, kernel_params, *, th_target=8):
    """x_nhwc: (N, H, W, C) float32. kernel_params: (dw1, pw1, b1, dw2, pw2, b2) (see init)."""
    N, H, W, C = x_nhwc.shape
    TH = _choose_th(H, th_target)
    n_tiles = H // TH
    use_bf16 = C >= 128
    use_roll = _roll_ok((TH + 2) * W, C) and _roll_ok(TH * W, C)

    half = max(TH // 2, 1)                 # halo block size is 2 rows
    max_blk2 = max(H // 2 - 1, 0)          # last valid 2-row block index along H

    def full_spec(a):
        nd = a.ndim
        return pl.BlockSpec(a.shape, lambda n, i, _nd=nd: (0,) * _nd)

    main_spec = pl.BlockSpec((1, TH, W, C), lambda n, i: (n, i, 0, 0))
    # 2-row halo blocks above/below the tile; clamped at the image border (zeroed in-kernel there).
    top_spec = pl.BlockSpec((1, 2, W, C),
                            lambda n, i: (n, jnp.maximum(i * half - 1, 0), 0, 0))
    bot_spec = pl.BlockSpec((1, 2, W, C),
                            lambda n, i: (n, jnp.minimum((i + 1) * half, max_blk2), 0, 0))

    # VMEM budget: double-buffered in/out tile + halos + (double-buffered) weights + scratch.
    # No extra 2x fudge factor; cap at ~70% of this chip's VMEM so the compiler keeps headroom.
    tile_bytes = TH * W * C * 4
    halo_bytes = 2 * W * C * 4
    scratch_bytes = ((TH + 4) * W + (TH + 2) * W + 4 * _PAD) * C * 4
    param_bytes = sum(int(a.size) * int(a.dtype.itemsize) for a in kernel_params)
    need = 4 * tile_bytes + 4 * halo_bytes + 2 * param_bytes + scratch_bytes + (4 << 20)
    try:
        cap = int(pltpu.get_tpu_info().vmem_capacity_bytes)
    except Exception:
        cap = 64 << 20
    budget = (cap * 7) // 10
    vmem_limit = int(min(budget, max(32 << 20, need)))

    kernel = _make_resblock_kernel(TH, W, C, n_tiles, use_bf16, use_roll)
    return pl.pallas_call(
        kernel,
        out_shape=jax.ShapeDtypeStruct((N, H, W, C), jnp.float32),
        grid_spec=pltpu.PrefetchScalarGridSpec(
            num_scalar_prefetch=0,
            grid=(N, n_tiles),
            in_specs=[main_spec, top_spec, bot_spec]
                     + [full_spec(a) for a in kernel_params],
            out_specs=pl.BlockSpec((1, TH, W, C), lambda n, i: (n, i, 0, 0)),
            scratch_shapes=[
                pltpu.VMEM((_PAD + (TH + 4) * W + _PAD, C), jnp.float32),
                pltpu.VMEM((_PAD + (TH + 2) * W + _PAD, C), jnp.float32),
            ],
        ),
        compiler_params=pltpu.CompilerParams(
            dimension_semantics=("parallel", "parallel"),   # batch + H tiles independent
            vmem_limit_bytes=vmem_limit,
        ),
    )(x_nhwc, x_nhwc, x_nhwc, *kernel_params)


def resblock_pallas(x_nchw, kernel_params, *, th_target=8):
    """PyTorch-layout entry point: (N, C, H, W) in / out."""
    x = jnp.transpose(x_nchw, (0, 2, 3, 1)).astype(jnp.float32)   # -> NHWC (lane-dense channels)
    out = resblock_pallas_nhwc(x, kernel_params, th_target=th_target)
    return jnp.transpose(out, (0, 3, 1, 2))                        # back to NCHW


# ---------------------------------------------------------------------------
# Deterministic parameter construction (PyTorch-layout raw params + folded kernel params)
# ---------------------------------------------------------------------------
def init_resblock_params(key, C):
    ks = jax.random.split(key, 8)
    eps = 1e-5

    def sep_raw(k0, k1, k2, k3):
        dw_t = jax.random.normal(k0, (C, 1, 3, 3), jnp.float32) * 0.2   # torch depthwise OIHW
        db = jax.random.normal(k1, (C,), jnp.float32) * 0.1
        pw_t = jax.random.normal(k2, (C, C, 1, 1), jnp.float32) * 0.2   # torch pointwise OIHW
        pb = jax.random.normal(k3, (C,), jnp.float32) * 0.1
        return dw_t, db, pw_t, pb

    def bn_raw(i):
        gamma = 1.0 + 0.02 * jnp.arange(C, dtype=jnp.float32) + 0.1 * i
        beta = 0.02 * jnp.arange(C, dtype=jnp.float32) - 0.03 * i
        mean = 0.01 * jnp.arange(C, dtype=jnp.float32)
        var = 1.0 + 0.05 * jnp.arange(C, dtype=jnp.float32)
        return gamma, beta, mean, var

    raw = {
        "sep1": sep_raw(ks[0], ks[1], ks[2], ks[3]),
        "bn1": bn_raw(0),
        "sep2": sep_raw(ks[4], ks[5], ks[6], ks[7]),
        "bn2": bn_raw(1),
    }

    def to_kernel(sep, bn):
        dw_t, db, pw_t, pb = sep
        gamma, beta, mean, var = bn
        dw = jnp.transpose(dw_t[:, 0, :, :], (1, 2, 0))          # (3, 3, C)
        pw = jnp.transpose(pw_t[:, :, 0, 0], (1, 0))             # (Cin, Cout)
        s = gamma / jnp.sqrt(var + eps)                          # BN scale
        bn_b = beta - mean * s                                   # BN bias
        # Fold depthwise bias + pointwise bias + BN into a single pointwise weight & bias.
        pw_f = pw * s[None, :]
        b_f = (db @ pw + pb) * s + bn_b
        if C >= 128:   # bf16 pointwise weights: MXU-native on v6e/v7x, halves weight VMEM
            pw_f = pw_f.astype(jnp.bfloat16)
        return (dw, pw_f, b_f.reshape(1, C))

    kernel_params = to_kernel(raw["sep1"], raw["bn1"]) + to_kernel(raw["sep2"], raw["bn2"])
    return raw, kernel_params, eps


# ---------------------------------------------------------------------------
# Pure-JAX reference (mirrors the PyTorch module, eval-mode BN)
# ---------------------------------------------------------------------------
def resblock_ref(x, raw, eps):
    dn = ("NCHW", "OIHW", "NCHW")
    C = x.shape[1]

    def sep(xin, p):
        dw_t, db, pw_t, pb = p
        y = lax.conv_general_dilated(xin, dw_t, (1, 1), "SAME",
                                     feature_group_count=C, dimension_numbers=dn,
                                     precision=lax.Precision.HIGHEST)
        y = y + db[None, :, None, None]
        y = lax.conv_general_dilated(y, pw_t, (1, 1), "SAME", dimension_numbers=dn,
                                     precision=lax.Precision.HIGHEST)
        y = y + pb[None, :, None, None]
        return y

    def bn(xin, p):
        gamma, beta, mean, var = p
        inv = gamma / jnp.sqrt(var + eps)
        return (xin - mean[None, :, None, None]) * inv[None, :, None, None] \
            + beta[None, :, None, None]

    y = _relu6(bn(sep(x, raw["sep1"]), raw["bn1"]))
    y = _relu6(bn(sep(y, raw["sep2"]), raw["bn2"]))
    return _relu6(x + y)


if __name__ == "__main__":
    # ResBlock(64) from tinypart1 at a small spatial size.  With th_target=8 the H axis is split
    # into 2 tiles, so the halo-exchange and boundary-zero paths of the kernel are exercised.
    N, C, H, W = 2, 64, 16, 16
    key = jax.random.PRNGKey(0)
    kx, kp = jax.random.split(key)
    x = jax.random.normal(kx, (N, C, H, W), jnp.float32)

    raw, kernel_params, eps = init_resblock_params(kp, C)

    out = jax.block_until_ready(resblock_pallas(x, kernel_params))
    ref = jax.block_until_ready(resblock_ref(x, raw, eps))

    assert out.shape == (N, C, H, W)
    max_err = float(jnp.max(jnp.abs(out - ref)))
    assert jnp.allclose(out, ref, atol=2e-3, rtol=2e-3), f"max abs err = {max_err}"

    print("KERNEL_OK")
</pallas_src>

<mosaic_0001>
module attributes {stable_mosaic.version = 11 : i64} {
  func.func @k(%arg0: memref<160x64xf32, #tpu.memory_space<vmem>>, %arg1: memref<160x64xf32, #tpu.memory_space<vmem>>) attributes {dimension_semantics = [], scalar_prefetch = 0 : i64, scratch_operands = 0 : i64, tpu.core_type = #tpu.core_type<tc>} {
    %c0 = arith.constant 0 : index
    %c0_0 = arith.constant 0 : index
    %0 = vector.load %arg0[%c0, %c0_0] : memref<160x64xf32, #tpu.memory_space<vmem>>, vector<160x64xf32>
    %c1_i32 = arith.constant 1 : i32
    %1 = tpu.dynamic_rotate %0 by %c1_i32 dim 0 : vector<160x64xf32>, i32 -> vector<160x64xf32>
    %c0_1 = arith.constant 0 : index
    %c0_2 = arith.constant 0 : index
    %2 = vector.load %arg0[%c0_1, %c0_2] : memref<160x64xf32, #tpu.memory_space<vmem>>, vector<160x64xf32>
    %c159_i32 = arith.constant 159 : i32
    %3 = tpu.dynamic_rotate %2 by %c159_i32 dim 0 : vector<160x64xf32>, i32 -> vector<160x64xf32>
    %cst = arith.constant 2.000000e+00 : f32
    %4 = vector.broadcast %cst : f32 to vector<160x64xf32>
    %5 = arith.mulf %4, %3 : vector<160x64xf32>
    %6 = arith.addf %1, %5 : vector<160x64xf32>
    %c0_3 = arith.constant 0 : index
    %c0_4 = arith.constant 0 : index
    %7 = vector.load %arg1[%c0_3, %c0_4] : memref<160x64xf32, #tpu.memory_space<vmem>>, vector<160x64xf32>
    tpu.vector_store %arg1[%c0_3, %c0_4], %6 {strides = array<i32>} : memref<160x64xf32, #tpu.memory_space<vmem>>, vector<160x64xf32>,
    return
  }
}

module attributes {stable_mosaic.version = 11 : i64} {
  func.func @kernel(%arg0: i32, %arg1: i32, %arg2: memref<1x8x16x64xf32, #tpu.memory_space<vmem>>, %arg3: memref<1x2x16x64xf32, #tpu.memory_space<vmem>>, %arg4: memref<1x2x16x64xf32, #tpu.memory_space<vmem>>, %arg5: memref<3x3x64xf32, #tpu.memory_space<vmem>>, %arg6: memref<64x64xf32, #tpu.memory_space<vmem>>, %arg7: memref<1x64xf32, #tpu.memory_space<vmem>>, %arg8: memref<3x3x64xf32, #tpu.memory_space<vmem>>, %arg9: memref<64x64xf32, #tpu.memory_space<vmem>>, %arg10: memref<1x64xf32, #tpu.memory_space<vmem>>, %arg11: memref<1x8x16x64xf32, #tpu.memory_space<vmem>>, %arg12: memref<208x64xf32, #tpu.memory_space<vmem>>, %arg13: memref<176x64xf32, #tpu.memory_space<vmem>>) attributes {dimension_semantics = [#tpu.dimension_semantics<parallel>, #tpu.dimension_semantics<parallel>], iteration_bounds = array<i64: 2, 2>, scalar_prefetch = 0 : i64, scratch_operands = 2 : i64, tpu.core_type = #tpu.core_type<tc>, window_params = [{transform_indices = @transform_0, window_bounds = array<i64: 1, 8, 16, 64>}, {transform_indices = @transform_1, window_bounds = array<i64: 1, 2, 16, 64>}, {transform_indices = @transform_2, window_bounds = array<i64: 1, 2, 16, 64>}, {pipeline_mode = #tpu.pipeline_mode<synchronous>, transform_indices = @transform_3, window_bounds = array<i64: 3, 3, 64>}, {pipeline_mode = #tpu.pipeline_mode<synchronous>, transform_indices = @transform_4, window_bounds = array<i64: 64, 64>}, {pipeline_mode = #tpu.pipeline_mode<synchronous>, transform_indices = @transform_5, window_bounds = array<i64: 1, 64>}, {pipeline_mode = #tpu.pipeline_mode<synchronous>, transform_indices = @transform_6, window_bounds = array<i64: 3, 3, 64>}, {pipeline_mode = #tpu.pipeline_mode<synchronous>, transform_indices = @transform_7, window_bounds = array<i64: 64, 64>}, {pipeline_mode = #tpu.pipeline_mode<synchronous>, transform_indices = @transform_8, window_bounds = array<i64: 1, 64>}, {transform_indices = @transform_9, window_bounds = array<i64: 1, 8, 16, 64>}]} {
    %c0 = arith.constant 0 : index
    %c0_0 = arith.constant 0 : index
    %c0_1 = arith.constant 0 : index
    %c0_2 = arith.constant 0 : index
    %0 = vector.load %arg2[%c0, %c0_0, %c0_1, %c0_2] : memref<1x8x16x64xf32, #tpu.memory_space<vmem>>, vector<1x8x16x64xf32>
    %1 = vector.shape_cast %0 : vector<1x8x16x64xf32> to vector<8x16x64xf32>
    %2 = vector.shape_cast %1 : vector<8x16x64xf32> to vector<128x64xf32>
    %c40 = arith.constant 40 : index
    %c0_3 = arith.constant 0 : index
    %3 = vector.load %arg12[%c40, %c0_3] : memref<208x64xf32, #tpu.memory_space<vmem>>, vector<128x64xf32>
    tpu.vector_store %arg12[%c40, %c0_3], %2 {strides = array<i32>} : memref<208x64xf32, #tpu.memory_space<vmem>>, vector<128x64xf32>,
    %c0_i32 = arith.constant 0 : i32
    %4 = arith.cmpi eq, %arg1, %c0_i32 : i32
    %5 = arith.extui %4 : i1 to i32
    %c0_i32_4 = arith.constant 0 : i32
    %6 = arith.cmpi ne, %5, %c0_i32_4 : i32
    scf.if %6 {
      %cst_122 = arith.constant 0.000000e+00 : f32
      %197 = vector.broadcast %cst_122 : f32 to vector<32x64xf32>
      %c8_123 = arith.constant 8 : index
      %c0_124 = arith.constant 0 : index
      %198 = vector.load %arg12[%c8_123, %c0_124] : memref<208x64xf32, #tpu.memory_space<vmem>>, vector<32x64xf32>
      tpu.vector_store %arg12[%c8_123, %c0_124], %197 {strides = array<i32>} : memref<208x64xf32, #tpu.memory_space<vmem>>, vector<32x64xf32>,
    } else {
    }
    %c0_i32_5 = arith.constant 0 : i32
    %7 = arith.cmpi sgt, %arg1, %c0_i32_5 : i32
    %8 = arith.extui %7 : i1 to i32
    %c0_i32_6 = arith.constant 0 : i32
    %9 = arith.cmpi ne, %8, %c0_i32_6 : i32
    scf.if %9 {
      %c0_122 = arith.constant 0 : index
      %c0_123 = arith.constant 0 : index
      %c0_124 = arith.constant 0 : index
      %c0_125 = arith.constant 0 : index
      %197 = vector.load %arg3[%c0_122, %c0_123, %c0_124, %c0_125] : memref<1x2x16x64xf32, #tpu.memory_space<vmem>>, vector<1x2x16x64xf32>
      %198 = vector.shape_cast %197 : vector<1x2x16x64xf32> to vector<2x16x64xf32>
      %199 = vector.shape_cast %198 : vector<2x16x64xf32> to vector<32x64xf32>
      %c8_126 = arith.constant 8 : index
      %c0_127 = arith.constant 0 : index
      %200 = vector.load %arg12[%c8_126, %c0_127] : memref<208x64xf32, #tpu.memory_space<vmem>>, vector<32x64xf32>
      tpu.vector_store %arg12[%c8_126, %c0_127], %199 {strides = array<i32>} : memref<208x64xf32, #tpu.memory_space<vmem>>, vector<32x64xf32>,
    } else {
    }
    %c1_i32 = arith.constant 1 : i32
    %10 = arith.cmpi eq, %arg1, %c1_i32 : i32
    %11 = arith.extui %10 : i1 to i32
    %c0_i32_7 = arith.constant 0 : i32
    %12 = arith.cmpi ne, %11, %c0_i32_7 : i32
    scf.if %12 {
      %cst_122 = arith.constant 0.000000e+00 : f32
      %197 = vector.broadcast %cst_122 : f32 to vector<32x64xf32>
      %c168 = arith.constant 168 : index
      %c0_123 = arith.constant 0 : index
      %198 = vector.load %arg12[%c168, %c0_123] : memref<208x64xf32, #tpu.memory_space<vmem>>, vector<32x64xf32>
      tpu.vector_store %arg12[%c168, %c0_123], %197 {strides = array<i32>} : memref<208x64xf32, #tpu.memory_space<vmem>>, vector<32x64xf32>,
    } else {
    }
    %c1_i32_8 = arith.constant 1 : i32
    %13 = arith.cmpi slt, %arg1, %c1_i32_8 : i32
    %14 = arith.extui %13 : i1 to i32
    %c0_i32_9 = arith.constant 0 : i32
    %15 = arith.cmpi ne, %14, %c0_i32_9 : i32
    scf.if %15 {
      %c0_122 = arith.constant 0 : index
      %c0_123 = arith.constant 0 : index
      %c0_124 = arith.constant 0 : index
      %c0_125 = arith.constant 0 : index
      %197 = vector.load %arg4[%c0_122, %c0_123, %c0_124, %c0_125] : memref<1x2x16x64xf32, #tpu.memory_space<vmem>>, vector<1x2x16x64xf32>
      %198 = vector.shape_cast %197 : vector<1x2x16x64xf32> to vector<2x16x64xf32>
      %199 = vector.shape_cast %198 : vector<2x16x64xf32> to vector<32x64xf32>
      %c168 = arith.constant 168 : index
      %c0_126 = arith.constant 0 : index
      %200 = vector.load %arg12[%c168, %c0_126] : memref<208x64xf32, #tpu.memory_space<vmem>>, vector<32x64xf32>
      tpu.vector_store %arg12[%c168, %c0_126], %199 {strides = array<i32>} : memref<208x64xf32, #tpu.memory_space<vmem>>, vector<32x64xf32>,
    } else {
    }
    %16 = tpu.iota {dimensions = array<i32: 1>} : vector<10x16x64xi32>
    %17 = vector.shape_cast %16 : vector<10x16x64xi32> to vector<160x64xi32>
    %18 = vector.extract_strided_slice %17 {offsets = [0, 0], sizes = [128, 64], strides = [1, 1]} : vector<160x64xi32> to vector<128x64xi32>
    %c0_i32_10 = arith.constant 0 : i32
    %19 = vector.broadcast %c0_i32_10 : i32 to vector<160x64xi32>
    %20 = arith.cmpi ne, %17, %19 : vector<160x64xi32>
    %c15_i32 = arith.constant 15 : i32
    %21 = vector.broadcast %c15_i32 : i32 to vector<160x64xi32>
    %22 = arith.cmpi ne, %17, %21 : vector<160x64xi32>
    %c0_i32_11 = arith.constant 0 : i32
    %23 = vector.broadcast %c0_i32_11 : i32 to vector<128x64xi32>
    %24 = arith.cmpi ne, %18, %23 : vector<128x64xi32>
    %c15_i32_12 = arith.constant 15 : i32
    %25 = vector.broadcast %c15_i32_12 : i32 to vector<128x64xi32>
    %26 = arith.cmpi ne, %18, %25 : vector<128x64xi32>
    %c8 = arith.constant 8 : index
    %c0_13 = arith.constant 0 : index
    %27 = vector.load %arg12[%c8, %c0_13] : memref<208x64xf32, #tpu.memory_space<vmem>>, vector<160x64xf32>
    %c7 = arith.constant 7 : index
    %c0_14 = arith.constant 0 : index
    %28 = vector.load %arg12[%c7, %c0_14] : memref<208x64xf32, #tpu.memory_space<vmem>>, vector<160x64xf32>
    %c9 = arith.constant 9 : index
    %c0_15 = arith.constant 0 : index
    %29 = vector.load %arg12[%c9, %c0_15] : memref<208x64xf32, #tpu.memory_space<vmem>>, vector<160x64xf32>
    %c0_16 = arith.constant 0 : index
    %c1 = arith.constant 1 : index
    %c0_17 = arith.constant 0 : index
    %30 = vector.load %arg5[%c0_16, %c1, %c0_17] : memref<3x3x64xf32, #tpu.memory_space<vmem>>, vector<1x1x64xf32>
    %31 = vector.shape_cast %30 : vector<1x1x64xf32> to vector<64xf32>
    %32 = vector.shape_cast %31 : vector<64xf32> to vector<1x64xf32>
    %33 = vector.broadcast %32 : vector<1x64xf32> to vector<160x64xf32>
    %34 = arith.mulf %27, %33 : vector<160x64xf32>
    %c0_18 = arith.constant 0 : index
    %c0_19 = arith.constant 0 : index
    %c0_20 = arith.constant 0 : index
    %35 = vector.load %arg5[%c0_18, %c0_19, %c0_20] : memref<3x3x64xf32, #tpu.memory_space<vmem>>, vector<1x1x64xf32>
    %36 = vector.shape_cast %35 : vector<1x1x64xf32> to vector<64xf32>
    %37 = vector.shape_cast %36 : vector<64xf32> to vector<1x64xf32>
    %38 = vector.broadcast %37 : vector<1x64xf32> to vector<160x64xf32>
    %39 = arith.mulf %28, %38 : vector<160x64xf32>
    %c0_21 = arith.constant 0 : index
    %c2 = arith.constant 2 : index
    %c0_22 = arith.constant 0 : index
    %40 = vector.load %arg5[%c0_21, %c2, %c0_22] : memref<3x3x64xf32, #tpu.memory_space<vmem>>, vector<1x1x64xf32>
    %41 = vector.shape_cast %40 : vector<1x1x64xf32> to vector<64xf32>
    %42 = vector.shape_cast %41 : vector<64xf32> to vector<1x64xf32>
    %43 = vector.broadcast %42 : vector<1x64xf32> to vector<160x64xf32>
    %44 = arith.mulf %29, %43 : vector<160x64xf32>
    %c24 = arith.constant 24 : index
    %c0_23 = arith.constant 0 : index
    %45 = vector.load %arg12[%c24, %c0_23] : memref<208x64xf32, #tpu.memory_space<vmem>>, vector<160x64xf32>
    %c23 = arith.constant 23 : index
    %c0_24 = arith.constant 0 : index
    %46 = vector.load %arg12[%c23, %c0_24] : memref<208x64xf32, #tpu.memory_space<vmem>>, vector<160x64xf32>
    %c25 = arith.constant 25 : index
    %c0_25 = arith.constant 0 : index
    %47 = vector.load %arg12[%c25, %c0_25] : memref<208x64xf32, #tpu.memory_space<vmem>>, vector<160x64xf32>
    %c1_26 = arith.constant 1 : index
    %c1_27 = arith.constant 1 : index
    %c0_28 = arith.constant 0 : index
    %48 = vector.load %arg5[%c1_26, %c1_27, %c0_28] : memref<3x3x64xf32, #tpu.memory_space<vmem>>, vector<1x1x64xf32>
    %49 = vector.shape_cast %48 : vector<1x1x64xf32> to vector<64xf32>
    %50 = vector.shape_cast %49 : vector<64xf32> to vector<1x64xf32>
    %51 = vector.broadcast %50 : vector<1x64xf32> to vector<160x64xf32>
    %52 = arith.mulf %45, %51 : vector<160x64xf32>
    %c1_29 = arith.constant 1 : index
    %c0_30 = arith.constant 0 : index
    %c0_31 = arith.constant 0 : index
    %53 = vector.load %arg5[%c1_29, %c0_30, %c0_31] : memref<3x3x64xf32, #tpu.memory_space<vmem>>, vector<1x1x64xf32>
    %54 = vector.shape_cast %53 : vector<1x1x64xf32> to vector<64xf32>
    %55 = vector.shape_cast %54 : vector<64xf32> to vector<1x64xf32>
    %56 = vector.broadcast %55 : vector<1x64xf32> to vector<160x64xf32>
    %57 = arith.mulf %46, %56 : vector<160x64xf32>
    %c1_32 = arith.constant 1 : index
    %c2_33 = arith.constant 2 : index
    %c0_34 = arith.constant 0 : index
    %58 = vector.load %arg5[%c1_32, %c2_33, %c0_34] : memref<3x3x64xf32, #tpu.memory_space<vmem>>, vector<1x1x64xf32>
    %59 = vector.shape_cast %58 : vector<1x1x64xf32> to vector<64xf32>
    %60 = vector.shape_cast %59 : vector<64xf32> to vector<1x64xf32>
    %61 = vector.broadcast %60 : vector<1x64xf32> to vector<160x64xf32>
    %62 = arith.mulf %47, %61 : vector<160x64xf32>
    %63 = arith.addf %34, %52 : vector<160x64xf32>
    %64 = arith.addf %39, %57 : vector<160x64xf32>
    %65 = arith.addf %44, %62 : vector<160x64xf32>
    %c40_35 = arith.constant 40 : index
    %c0_36 = arith.constant 0 : index
    %66 = vector.load %arg12[%c40_35, %c0_36] : memref<208x64xf32, #tpu.memory_space<vmem>>, vector<160x64xf32>
    %c39 = arith.constant 39 : index
    %c0_37 = arith.constant 0 : index
    %67 = vector.load %arg12[%c39, %c0_37] : memref<208x64xf32, #tpu.memory_space<vmem>>, vector<160x64xf32>
    %c41 = arith.constant 41 : index
    %c0_38 = arith.constant 0 : index
    %68 = vector.load %arg12[%c41, %c0_38] : memref<208x64xf32, #tpu.memory_space<vmem>>, vector<160x64xf32>
    %c2_39 = arith.constant 2 : index
    %c1_40 = arith.constant 1 : index
    %c0_41 = arith.constant 0 : index
    %69 = vector.load %arg5[%c2_39, %c1_40, %c0_41] : memref<3x3x64xf32, #tpu.memory_space<vmem>>, vector<1x1x64xf32>
    %70 = vector.shape_cast %69 : vector<1x1x64xf32> to vector<64xf32>
    %71 = vector.shape_cast %70 : vector<64xf32> to vector<1x64xf32>
    %72 = vector.broadcast %71 : vector<1x64xf32> to vector<160x64xf32>
    %73 = arith.mulf %66, %72 : vector<160x64xf32>
    %c2_42 = arith.constant 2 : index
    %c0_43 = arith.constant 0 : index
    %c0_44 = arith.constant 0 : index
    %74 = vector.load %arg5[%c2_42, %c0_43, %c0_44] : memref<3x3x64xf32, #tpu.memory_space<vmem>>, vector<1x1x64xf32>
    %75 = vector.shape_cast %74 : vector<1x1x64xf32> to vector<64xf32>
    %76 = vector.shape_cast %75 : vector<64xf32> to vector<1x64xf32>
    %77 = vector.broadcast %76 : vector<1x64xf32> to vector<160x64xf32>
    %78 = arith.mulf %67, %77 : vector<160x64xf32>
    %c2_45 = arith.constant 2 : index
    %c2_46 = arith.constant 2 : index
    %c0_47 = arith.constant 0 : index
    %79 = vector.load %arg5[%c2_45, %c2_46, %c0_47] : memref<3x3x64xf32, #tpu.memory_space<vmem>>, vector<1x1x64xf32>
    %80 = vector.shape_cast %79 : vector<1x1x64xf32> to vector<64xf32>
    %81 = vector.shape_cast %80 : vector<64xf32> to vector<1x64xf32>
    %82 = vector.broadcast %81 : vector<1x64xf32> to vector<160x64xf32>
    %83 = arith.mulf %68, %82 : vector<160x64xf32>
    %84 = arith.addf %63, %73 : vector<160x64xf32>
    %85 = arith.addf %64, %78 : vector<160x64xf32>
    %86 = arith.addf %65, %83 : vector<160x64xf32>
    %cst = arith.constant 0.000000e+00 : f32
    %87 = vector.broadcast %cst : f32 to vector<160x64xf32>
    %88 = arith.select %20, %85, %87 : vector<160x64xi1>, vector<160x64xf32>
    %89 = arith.addf %84, %88 : vector<160x64xf32>
    %cst_48 = arith.constant 0.000000e+00 : f32
    %90 = vector.broadcast %cst_48 : f32 to vector<160x64xf32>
    %91 = arith.select %22, %86, %90 : vector<160x64xi1>, vector<160x64xf32>
    %92 = arith.addf %89, %91 : vector<160x64xf32>
    %c0_49 = arith.constant 0 : index
    %c0_50 = arith.constant 0 : index
    %93 = vector.load %arg6[%c0_49, %c0_50] : memref<64x64xf32, #tpu.memory_space<vmem>>, vector<64x64xf32>
    %cst_51 = arith.constant dense<0.000000e+00> : vector<160x64xf32>
    %94 = tpu.matmul %92, %93, %cst_51 {dimension_numbers = #tpu.dot_dimension_numbers<[1], [0], [0], [1], [0, 0, 1, 1], [], []>} : vector<160x64xf32>, vector<64x64xf32>, vector<160x64xf32> -> vector<160x64xf32>
    %c0_52 = arith.constant 0 : index
    %c0_53 = arith.constant 0 : index
    %95 = vector.load %arg7[%c0_52, %c0_53] : memref<1x64xf32, #tpu.memory_space<vmem>>, vector<1x64xf32>
    %96 = vector.shape_cast %95 : vector<1x64xf32> to vector<64xf32>
    %97 = vector.shape_cast %96 : vector<64xf32> to vector<1x64xf32>
    %98 = vector.broadcast %97 : vector<1x64xf32> to vector<160x64xf32>
    %99 = arith.addf %94, %98 : vector<160x64xf32>
    %cst_54 = arith.constant 0.000000e+00 : f32
    %cst_55 = arith.constant 6.000000e+00 : f32
    %100 = vector.broadcast %cst_54 : f32 to vector<160x64xf32>
    %101 = arith.maximumf %100, %99 : vector<160x64xf32>
    %102 = vector.broadcast %cst_55 : f32 to vector<160x64xf32>
    %103 = arith.minimumf %102, %101 : vector<160x64xf32>
    %c8_56 = arith.constant 8 : index
    %c0_57 = arith.constant 0 : index
    %104 = vector.load %arg13[%c8_56, %c0_57] : memref<176x64xf32, #tpu.memory_space<vmem>>, vector<160x64xf32>
    tpu.vector_store %arg13[%c8_56, %c0_57], %103 {strides = array<i32>} : memref<176x64xf32, #tpu.memory_space<vmem>>, vector<160x64xf32>,
    %c0_i32_58 = arith.constant 0 : i32
    %105 = arith.cmpi eq, %arg1, %c0_i32_58 : i32
    %106 = arith.extui %105 : i1 to i32
    %c0_i32_59 = arith.constant 0 : i32
    %107 = arith.cmpi ne, %106, %c0_i32_59 : i32
    scf.if %107 {
      %cst_122 = arith.constant 0.000000e+00 : f32
      %197 = vector.broadcast %cst_122 : f32 to vector<16x64xf32>
      %c8_123 = arith.constant 8 : index
      %c0_124 = arith.constant 0 : index
      %198 = vector.load %arg13[%c8_123, %c0_124] : memref<176x64xf32, #tpu.memory_space<vmem>>, vector<16x64xf32>
      tpu.vector_store %arg13[%c8_123, %c0_124], %197 {strides = array<i32>} : memref<176x64xf32, #tpu.memory_space<vmem>>, vector<16x64xf32>,
    } else {
    }
    %c1_i32_60 = arith.constant 1 : i32
    %108 = arith.cmpi eq, %arg1, %c1_i32_60 : i32
    %109 = arith.extui %108 : i1 to i32
    %c0_i32_61 = arith.constant 0 : i32
    %110 = arith.cmpi ne, %109, %c0_i32_61 : i32
    scf.if %110 {
      %cst_122 = arith.constant 0.000000e+00 : f32
      %197 = vector.broadcast %cst_122 : f32 to vector<16x64xf32>
      %c152 = arith.constant 152 : index
      %c0_123 = arith.constant 0 : index
      %198 = vector.load %arg13[%c152, %c0_123] : memref<176x64xf32, #tpu.memory_space<vmem>>, vector<16x64xf32>
      tpu.vector_store %arg13[%c152, %c0_123], %197 {strides = array<i32>} : memref<176x64xf32, #tpu.memory_space<vmem>>, vector<16x64xf32>,
    } else {
    }
    %c8_62 = arith.constant 8 : index
    %c0_63 = arith.constant 0 : index
    %111 = vector.load %arg13[%c8_62, %c0_63] : memref<176x64xf32, #tpu.memory_space<vmem>>, vector<128x64xf32>
    %c7_64 = arith.constant 7 : index
    %c0_65 = arith.constant 0 : index
    %112 = vector.load %arg13[%c7_64, %c0_65] : memref<176x64xf32, #tpu.memory_space<vmem>>, vector<128x64xf32>
    %c9_66 = arith.constant 9 : index
    %c0_67 = arith.constant 0 : index
    %113 = vector.load %arg13[%c9_66, %c0_67] : memref<176x64xf32, #tpu.memory_space<vmem>>, vector<128x64xf32>
    %c0_68 = arith.constant 0 : index
    %c1_69 = arith.constant 1 : index
    %c0_70 = arith.constant 0 : index
    %114 = vector.load %arg8[%c0_68, %c1_69, %c0_70] : memref<3x3x64xf32, #tpu.memory_space<vmem>>, vector<1x1x64xf32>
    %115 = vector.shape_cast %114 : vector<1x1x64xf32> to vector<64xf32>
    %116 = vector.shape_cast %115 : vector<64xf32> to vector<1x64xf32>
    %117 = vector.broadcast %116 : vector<1x64xf32> to vector<128x64xf32>
    %118 = arith.mulf %111, %117 : vector<128x64xf32>
    %c0_71 = arith.constant 0 : index
    %c0_72 = arith.constant 0 : index
    %c0_73 = arith.constant 0 : index
    %119 = vector.load %arg8[%c0_71, %c0_72, %c0_73] : memref<3x3x64xf32, #tpu.memory_space<vmem>>, vector<1x1x64xf32>
    %120 = vector.shape_cast %119 : vector<1x1x64xf32> to vector<64xf32>
    %121 = vector.shape_cast %120 : vector<64xf32> to vector<1x64xf32>
    %122 = vector.broadcast %121 : vector<1x64xf32> to vector<128x64xf32>
    %123 = arith.mulf %112, %122 : vector<128x64xf32>
    %c0_74 = arith.constant 0 : index
    %c2_75 = arith.constant 2 : index
    %c0_76 = arith.constant 0 : index
    %124 = vector.load %arg8[%c0_74, %c2_75, %c0_76] : memref<3x3x64xf32, #tpu.memory_space<vmem>>, vector<1x1x64xf32>
    %125 = vector.shape_cast %124 : vector<1x1x64xf32> to vector<64xf32>
    %126 = vector.shape_cast %125 : vector<64xf32> to vector<1x64xf32>
    %127 = vector.broadcast %126 : vector<1x64xf32> to vector<128x64xf32>
    %128 = arith.mulf %113, %127 : vector<128x64xf32>
    %c24_77 = arith.constant 24 : index
    %c0_78 = arith.constant 0 : index
    %129 = vector.load %arg13[%c24_77, %c0_78] : memref<176x64xf32, #tpu.memory_space<vmem>>, vector<128x64xf32>
    %c23_79 = arith.constant 23 : index
    %c0_80 = arith.constant 0 : index
    %130 = vector.load %arg13[%c23_79, %c0_80] : memref<176x64xf32, #tpu.memory_space<vmem>>, vector<128x64xf32>
    %c25_81 = arith.constant 25 : index
    %c0_82 = arith.constant 0 : index
    %131 = vector.load %arg13[%c25_81, %c0_82] : memref<176x64xf32, #tpu.memory_space<vmem>>, vector<128x64xf32>
    %c1_83 = arith.constant 1 : index
    %c1_84 = arith.constant 1 : index
    %c0_85 = arith.constant 0 : index
    %132 = vector.load %arg8[%c1_83, %c1_84, %c0_85] : memref<3x3x64xf32, #tpu.memory_space<vmem>>, vector<1x1x64xf32>
    %133 = vector.shape_cast %132 : vector<1x1x64xf32> to vector<64xf32>
    %134 = vector.shape_cast %133 : vector<64xf32> to vector<1x64xf32>
    %135 = vector.broadcast %134 : vector<1x64xf32> to vector<128x64xf32>
    %136 = arith.mulf %129, %135 : vector<128x64xf32>
    %c1_86 = arith.constant 1 : index
    %c0_87 = arith.constant 0 : index
    %c0_88 = arith.constant 0 : index
    %137 = vector.load %arg8[%c1_86, %c0_87, %c0_88] : memref<3x3x64xf32, #tpu.memory_space<vmem>>, vector<1x1x64xf32>
    %138 = vector.shape_cast %137 : vector<1x1x64xf32> to vector<64xf32>
    %139 = vector.shape_cast %138 : vector<64xf32> to vector<1x64xf32>
    %140 = vector.broadcast %139 : vector<1x64xf32> to vector<128x64xf32>
    %141 = arith.mulf %130, %140 : vector<128x64xf32>
    %c1_89 = arith.constant 1 : index
    %c2_90 = arith.constant 2 : index
    %c0_91 = arith.constant 0 : index
    %142 = vector.load %arg8[%c1_89, %c2_90, %c0_91] : memref<3x3x64xf32, #tpu.memory_space<vmem>>, vector<1x1x64xf32>
    %143 = vector.shape_cast %142 : vector<1x1x64xf32> to vector<64xf32>
    %144 = vector.shape_cast %143 : vector<64xf32> to vector<1x64xf32>
    %145 = vector.broadcast %144 : vector<1x64xf32> to vector<128x64xf32>
    %146 = arith.mulf %131, %145 : vector<128x64xf32>
    %147 = arith.addf %118, %136 : vector<128x64xf32>
    %148 = arith.addf %123, %141 : vector<128x64xf32>
    %149 = arith.addf %128, %146 : vector<128x64xf32>
    %c40_92 = arith.constant 40 : index
    %c0_93 = arith.constant 0 : index
    %150 = vector.load %arg13[%c40_92, %c0_93] : memref<176x64xf32, #tpu.memory_space<vmem>>, vector<128x64xf32>
    %c39_94 = arith.constant 39 : index
    %c0_95 = arith.constant 0 : index
    %151 = vector.load %arg13[%c39_94, %c0_95] : memref<176x64xf32, #tpu.memory_space<vmem>>, vector<128x64xf32>
    %c41_96 = arith.constant 41 : index
    %c0_97 = arith.constant 0 : index
    %152 = vector.load %arg13[%c41_96, %c0_97] : memref<176x64xf32, #tpu.memory_space<vmem>>, vector<128x64xf32>
    %c2_98 = arith.constant 2 : index
    %c1_99 = arith.constant 1 : index
    %c0_100 = arith.constant 0 : index
    %153 = vector.load %arg8[%c2_98, %c1_99, %c0_100] : memref<3x3x64xf32, #tpu.memory_space<vmem>>, vector<1x1x64xf32>
    %154 = vector.shape_cast %153 : vector<1x1x64xf32> to vector<64xf32>
    %155 = vector.shape_cast %154 : vector<64xf32> to vector<1x64xf32>
    %156 = vector.broadcast %155 : vector<1x64xf32> to vector<128x64xf32>
    %157 = arith.mulf %150, %156 : vector<128x64xf32>
    %c2_101 = arith.constant 2 : index
    %c0_102 = arith.constant 0 : index
    %c0_103 = arith.constant 0 : index
    %158 = vector.load %arg8[%c2_101, %c0_102, %c0_103] : memref<3x3x64xf32, #tpu.memory_space<vmem>>, vector<1x1x64xf32>
    %159 = vector.shape_cast %158 : vector<1x1x64xf32> to vector<64xf32>
    %160 = vector.shape_cast %159 : vector<64xf32> to vector<1x64xf32>
    %161 = vector.broadcast %160 : vector<1x64xf32> to vector<128x64xf32>
    %162 = arith.mulf %151, %161 : vector<128x64xf32>
    %c2_104 = arith.constant 2 : index
    %c2_105 = arith.constant 2 : index
    %c0_106 = arith.constant 0 : index
    %163 = vector.load %arg8[%c2_104, %c2_105, %c0_106] : memref<3x3x64xf32, #tpu.memory_space<vmem>>, vector<1x1x64xf32>
    %164 = vector.shape_cast %163 : vector<1x1x64xf32> to vector<64xf32>
    %165 = vector.shape_cast %164 : vector<64xf32> to vector<1x64xf32>
    %166 = vector.broadcast %165 : vector<1x64xf32> to vector<128x64xf32>
    %167 = arith.mulf %152, %166 : vector<128x64xf32>
    %168 = arith.addf %147, %157 : vector<128x64xf32>
    %169 = arith.addf %148, %162 : vector<128x64xf32>
    %170 = arith.addf %149, %167 : vector<128x64xf32>
    %cst_107 = arith.constant 0.000000e+00 : f32
    %171 = vector.broadcast %cst_107 : f32 to vector<128x64xf32>
    %172 = arith.select %24, %169, %171 : vector<128x64xi1>, vector<128x64xf32>
    %173 = arith.addf %168, %172 : vector<128x64xf32>
    %cst_108 = arith.constant 0.000000e+00 : f32
    %174 = vector.broadcast %cst_108 : f32 to vector<128x64xf32>
    %175 = arith.select %26, %170, %174 : vector<128x64xi1>, vector<128x64xf32>
    %176 = arith.addf %173, %175 : vector<128x64xf32>
    %c0_109 = arith.constant 0 : index
    %c0_110 = arith.constant 0 : index
    %177 = vector.load %arg9[%c0_109, %c0_110] : memref<64x64xf32, #tpu.memory_space<vmem>>, vector<64x64xf32>
    %cst_111 = arith.constant dense<0.000000e+00> : vector<128x64xf32>
    %178 = tpu.matmul %176, %177, %cst_111 {dimension_numbers = #tpu.dot_dimension_numbers<[1], [0], [0], [1], [0, 0, 1, 1], [], []>} : vector<128x64xf32>, vector<64x64xf32>, vector<128x64xf32> -> vector<128x64xf32>
    %c0_112 = arith.constant 0 : index
    %c0_113 = arith.constant 0 : index
    %179 = vector.load %arg10[%c0_112, %c0_113] : memref<1x64xf32, #tpu.memory_space<vmem>>, vector<1x64xf32>
    %180 = vector.shape_cast %179 : vector<1x64xf32> to vector<64xf32>
    %181 = vector.shape_cast %180 : vector<64xf32> to vector<1x64xf32>
    %182 = vector.broadcast %181 : vector<1x64xf32> to vector<128x64xf32>
    %183 = arith.addf %178, %182 : vector<128x64xf32>
    %cst_114 = arith.constant 0.000000e+00 : f32
    %cst_115 = arith.constant 6.000000e+00 : f32
    %184 = vector.broadcast %cst_114 : f32 to vector<128x64xf32>
    %185 = arith.maximumf %184, %183 : vector<128x64xf32>
    %186 = vector.broadcast %cst_115 : f32 to vector<128x64xf32>
    %187 = arith.minimumf %186, %185 : vector<128x64xf32>
    %188 = arith.addf %2, %187 : vector<128x64xf32>
    %cst_116 = arith.constant 0.000000e+00 : f32
    %cst_117 = arith.constant 6.000000e+00 : f32
    %189 = vector.broadcast %cst_116 : f32 to vector<128x64xf32>
    %190 = arith.maximumf %189, %188 : vector<128x64xf32>
    %191 = vector.broadcast %cst_117 : f32 to vector<128x64xf32>
    %192 = arith.minimumf %191, %190 : vector<128x64xf32>
    %193 = vector.shape_cast %192 : vector<128x64xf32> to vector<8x16x64xf32>
    %c0_118 = arith.constant 0 : index
    %c0_119 = arith.constant 0 : index
    %c0_120 = arith.constant 0 : index
    %c0_121 = arith.constant 0 : index
    %194 = vector.load %arg11[%c0_118, %c0_119, %c0_120, %c0_121] : memref<1x8x16x64xf32, #tpu.memory_space<vmem>>, vector<1x8x16x64xf32>
    %195 = vector.shape_cast %194 : vector<1x8x16x64xf32> to vector<8x16x64xf32>
    %196 = vector.shape_cast %193 : vector<8x16x64xf32> to vector<1x8x16x64xf32>
    tpu.vector_store %arg11[%c0_118, %c0_119, %c0_120, %c0_121], %196 {strides = array<i32>} : memref<1x8x16x64xf32, #tpu.memory_space<vmem>>, vector<1x8x16x64xf32>,
    return
  }
  func.func @transform_0(%arg0: i32, %arg1: i32) -> (i32, i32, i32, i32) {
    %c0_i32 = arith.constant 0 : i32
    %c0_i32_0 = arith.constant 0 : i32
    %c0_i32_1 = arith.constant 0 : i32
    return %arg0, %arg1, %c0_i32, %c0_i32_0 : i32, i32, i32, i32
  }
  func.func @transform_1(%arg0: i32, %arg1: i32) -> (i32, i32, i32, i32) {
    %c4_i32 = arith.constant 4 : i32
    %0 = arith.muli %arg1, %c4_i32 : i32
    %c1_i32 = arith.constant 1 : i32
    %1 = arith.subi %0, %c1_i32 : i32
    %c0_i32 = arith.constant 0 : i32
    %2 = arith.maxsi %1, %c0_i32 : i32
    %c0_i32_0 = arith.constant 0 : i32
    %c0_i32_1 = arith.constant 0 : i32
    %c0_i32_2 = arith.constant 0 : i32
    return %arg0, %2, %c0_i32_0, %c0_i32_1 : i32, i32, i32, i32
  }
  func.func @transform_2(%arg0: i32, %arg1: i32) -> (i32, i32, i32, i32) {
    %c1_i32 = arith.constant 1 : i32
    %0 = arith.addi %arg1, %c1_i32 : i32
    %c4_i32 = arith.constant 4 : i32
    %1 = arith.muli %0, %c4_i32 : i32
    %c7_i32 = arith.constant 7 : i32
    %2 = arith.minsi %1, %c7_i32 : i32
    %c0_i32 = arith.constant 0 : i32
    %c0_i32_0 = arith.constant 0 : i32
    %c0_i32_1 = arith.constant 0 : i32
    return %arg0, %2, %c0_i32, %c0_i32_0 : i32, i32, i32, i32
  }
  func.func @transform_3(%arg0: i32, %arg1: i32) -> (i32, i32, i32) {
    %c0_i32 = arith.constant 0 : i32
    %c0_i32_0 = arith.constant 0 : i32
    %c0_i32_1 = arith.constant 0 : i32
    %c0_i32_2 = arith.constant 0 : i32
    return %c0_i32, %c0_i32_0, %c0_i32_1 : i32, i32, i32
  }
  func.func @transform_4(%arg0: i32, %arg1: i32) -> (i32, i32) {
    %c0_i32 = arith.constant 0 : i32
    %c0_i32_0 = arith.constant 0 : i32
    %c0_i32_1 = arith.constant 0 : i32
    return %c0_i32, %c0_i32_0 : i32, i32
  }
  func.func @transform_5(%arg0: i32, %arg1: i32) -> (i32, i32) {
    %c0_i32 = arith.constant 0 : i32
    %c0_i32_0 = arith.constant 0 : i32
    %c0_i32_1 = arith.constant 0 : i32
    return %c0_i32, %c0_i32_0 : i32, i32
  }
  func.func @transform_6(%arg0: i32, %arg1: i32) -> (i32, i32, i32) {
    %c0_i32 = arith.constant 0 : i32
    %c0_i32_0 = arith.constant 0 : i32
    %c0_i32_1 = arith.constant 0 : i32
    %c0_i32_2 = arith.constant 0 : i32
    return %c0_i32, %c0_i32_0, %c0_i32_1 : i32, i32, i32
  }
  func.func @transform_7(%arg0: i32, %arg1: i32) -> (i32, i32) {
    %c0_i32 = arith.constant 0 : i32
    %c0_i32_0 = arith.constant 0 : i32
    %c0_i32_1 = arith.constant 0 : i32
    return %c0_i32, %c0_i32_0 : i32, i32
  }
  func.func @transform_8(%arg0: i32, %arg1: i32) -> (i32, i32) {
    %c0_i32 = arith.constant 0 : i32
    %c0_i32_0 = arith.constant 0 : i32
    %c0_i32_1 = arith.constant 0 : i32
    return %c0_i32, %c0_i32_0 : i32, i32
  }
  func.func @transform_9(%arg0: i32, %arg1: i32) -> (i32, i32, i32, i32) {
    %c0_i32 = arith.constant 0 : i32
    %c0_i32_0 = arith.constant 0 : i32
    %c0_i32_1 = arith.constant 0 : i32
    return %arg0, %arg1, %c0_i32, %c0_i32_0 : i32, i32, i32, i32
  }
}

</mosaic_0001>

<bundles_post_ra>
// kernel: tpu_custom_call.1
= control target key start
LH: loop header
LB: loop body
LE: loop exit
PB: predicated region body
PF: predicated region fallthrough
CT: control target
= control target key end

     0   :  { %v48_v0 = vlaneseq  ;;  %vm152_vm0 = vcmask 523264   ;;  %s427_s0 = inlined_call_operand.vmem [shape: f32[160,64], index: 0, kind: input, shape index: {}]   ;;  %s428_s1 = inlined_call_operand.vmem [shape: f32[160,64], index: 1, kind: output, shape index: {}]  }
   0x1   :  { %v190_v1 = vld [vmem:[%s427_s0] sm:$0xff]  ;;  %v9_v2 = vld [vmem:[%s427_s0 + $0x8] sm:$0xff]  ;;  %v198_v3 = vld [vmem:[%s427_s0 + $0x98] sm:$0xff] }
   0x2   :  { %v28_v4 = vrot.slane %v190_v1, 7  ;;  %v47_v5 = vrot.slane %v198_v3, 7  ;;  %v202_v6 = vshrl.u32 %v48_v0, 7  ;;  %v71_v7 = vrot.slane %v190_v1, 1  ;;  %v10_v8 = vld [vmem:[%s427_s0 + $0x10] sm:$0xff]  ;;  %v11_v9 = vld [vmem:[%s427_s0 + $0x18] sm:$0xff] }
   0x3   :  { %v72_v10 = vrot.slane %v9_v2, 1  ;;  %v29_v11 = vrot.slane %v9_v2, 7  ;;  %v73_v12 = vrot.slane %v10_v8, 1  ;;  %v30_v13 = vrot.slane %v10_v8, 7  ;;  %v12_v15 = vld [vmem:[%s427_s0 + $0x20] sm:$0xff]  ;;  %v13_v21 = vld [vmem:[%s427_s0 + $0x28] sm:$0xff] }
   0x4   :  { %vm50_vm1 = vcmp.lt.s32.totalorder %v202_v6, 1  ;;  %vm91_vm2 = vcmp.lt.s32.totalorder %v202_v6, 7  ;;  %v74_v14 = vrot.slane %v11_v9, 1  ;;  %v31_v16 = vrot.slane %v11_v9, 7  ;;  %v14_v26 = vld [vmem:[%s427_s0 + $0x30] sm:$0xff]  ;;  %v15_v35 = vld [vmem:[%s427_s0 + $0x38] sm:$0xff] }
   0x5   :  { %v70_v17 = vsel %vm50_vm1, %v47_v5, %v28_v4  ;;  %v110_v18 = vsel %vm91_vm2, %v71_v7, %v72_v10  ;;  %v69_v19 = vsel %vm50_vm1, %v28_v4, %v29_v11  ;;  %v109_v20 = vsel %vm91_vm2, %v72_v10, %v73_v12  ;;  %v16_v40 = vld [vmem:[%s427_s0 + $0x40] sm:$0xff]  ;;  %v17_v49 = vld [vmem:[%s427_s0 + $0x48] sm:$0xff]  ;;  %v18_v54 = vld [vmem:[%s427_s0 + $0x50] sm:$0xff] }
   0x6   :  { %v112_v22 = vmul.f32 2.0, %v110_v18  ;;  %v113_v23 = vmul.f32 2.0, %v109_v20  ;;  %v68_v24 = vsel %vm50_vm1, %v29_v11, %v30_v13  ;;  %v108_v25 = vsel %vm91_vm2, %v73_v12, %v74_v14  ;;  %v19_v59 = vld [vmem:[%s427_s0 + $0x58] sm:$0xff]  ;;  %v21_v18 = vld [vmem:[%s427_s0 + $0x68] sm:$0xff] }
   0x7   :  { %v114_v27 = vmul.f32 2.0, %v108_v25  ;;  %v67_v28 = vsel %vm50_vm1, %v30_v13, %v31_v16  ;;  %v75_v29 = vrot.slane %v12_v15, 1  ;;  %v32_v30 = vrot.slane %v12_v15, 7  ;;  %v20_v13 = vld [vmem:[%s427_s0 + $0x60] sm:$0xff] }
   0x8   :  { %v132_v31 = vadd.f32 %v112_v22, %v70_v17  ;;  %v133_v32 = vadd.f32 %v113_v23, %v69_v19  ;;  %v76_v33 = vrot.slane %v13_v21, 1  ;;  %v33_v34 = vrot.slane %v13_v21, 7  ;;  %v22_v23 = vld [vmem:[%s427_s0 + $0x70] sm:$0xff] }
   0x9   :  { %v134_v36 = vadd.f32 %v114_v27, %v68_v24  ;;  %v107_v37 = vsel %vm91_vm2, %v74_v14, %v75_v29  ;;  %v66_v38 = vsel %vm50_vm1, %v31_v16, %v32_v30  ;;  %v77_v39 = vrot.slane %v14_v26, 1 }
   0xa   :  { %153 = vst.msk [vmem:[%s428_s1] sm:$0xff] %vm152_vm0, %v132_v31  ;;  %154 = vst.msk [vmem:[%s428_s1 + $0x8] sm:$0xff] %vm152_vm0, %v133_v32  ;;  %v115_v41 = vmul.f32 2.0, %v107_v37  ;;  %v106_v42 = vsel %vm91_vm2, %v75_v29, %v76_v33  ;;  %v65_v43 = vsel %vm50_vm1, %v32_v30, %v33_v34  ;;  %v34_v44 = vrot.slane %v14_v26, 7  ;;  %v23_v32 = vld [vmem:[%s427_s0 + $0x78] sm:$0xff]  ;;  %v24_v37 = vld [vmem:[%s427_s0 + $0x80] sm:$0xff] }
   0xb   :  { %155 = vst.msk [vmem:[%s428_s1 + $0x10] sm:$0xff] %vm152_vm0, %v134_v36  ;;  %v116_v45 = vmul.f32 2.0, %v106_v42  ;;  %v105_v46 = vsel %vm91_vm2, %v76_v33, %v77_v39  ;;  %v78_v47 = vrot.slane %v15_v35, 1  ;;  %v35_v48 = vrot.slane %v15_v35, 7 }
   0xc   :  { %v135_v50 = vadd.f32 %v115_v41, %v67_v28  ;;  %v117_v51 = vmul.f32 2.0, %v105_v46  ;;  %v64_v52 = vsel %vm50_vm1, %v33_v34, %v34_v44  ;;  %v79_v53 = vrot.slane %v16_v40, 1  ;;  %v25_v46 = vld [vmem:[%s427_s0 + $0x88] sm:$0xff] }
   0xd   :  { %v136_v55 = vadd.f32 %v116_v45, %v66_v38  ;;  %v104_v56 = vsel %vm91_vm2, %v77_v39, %v78_v47  ;;  %v63_v57 = vsel %vm50_vm1, %v34_v44, %v35_v48  ;;  %v36_v58 = vrot.slane %v16_v40, 7 }
   0xe   :  { %156 = vst.msk [vmem:[%s428_s1 + $0x18] sm:$0xff] %vm152_vm0, %v135_v50  ;;  %v137_v60 = vadd.f32 %v117_v51, %v65_v43  ;;  %v118_v61 = vmul.f32 2.0, %v104_v56  ;;  %v103_v62 = vsel %vm91_vm2, %v78_v47, %v79_v53  ;;  %v80_v63 = vrot.slane %v17_v49, 1  ;;  %v26_v51 = vld [vmem:[%s427_s0 + $0x90] sm:$0xff] }
   0xf   :  { %157 = vst.msk [vmem:[%s428_s1 + $0x20] sm:$0xff] %vm152_vm0, %v136_v55  ;;  %v119_v0 = vmul.f32 2.0, %v103_v62  ;;  %v62_v2 = vsel %vm50_vm1, %v35_v48, %v36_v58  ;;  %v37_v4 = vrot.slane %v17_v49, 7  ;;  %v81_v8 = vrot.slane %v18_v54, 1 }
  0x10   :  { %158 = vst.msk [vmem:[%s428_s1 + $0x28] sm:$0xff] %vm152_vm0, %v137_v60  ;;  %v138_v9 = vadd.f32 %v118_v61, %v64_v52  ;;  %v102_v10 = vsel %vm91_vm2, %v79_v53, %v80_v63  ;;  %v38_v11 = vrot.slane %v18_v54, 7  ;;  %v82_v12 = vrot.slane %v19_v59, 1 }
  0x11   :  { %v139_v14 = vadd.f32 %v119_v0, %v63_v57  ;;  %v120_v15 = vmul.f32 2.0, %v102_v10  ;;  %v61_v16 = vsel %vm50_vm1, %v36_v58, %v37_v4  ;;  %v101_v17 = vsel %vm91_vm2, %v80_v63, %v81_v8 }
  0x12   :  { %159 = vst.msk [vmem:[%s428_s1 + $0x30] sm:$0xff] %vm152_vm0, %v138_v9  ;;  %v121_v19 = vmul.f32 2.0, %v101_v17  ;;  %v60_v20 = vsel %vm50_vm1, %v37_v4, %v38_v11  ;;  %v100_v21 = vsel %vm91_vm2, %v81_v8, %v82_v12  ;;  %v39_v22 = vrot.slane %v19_v59, 7 }
  0x13   :  { %160 = vst.msk [vmem:[%s428_s1 + $0x38] sm:$0xff] %vm152_vm0, %v139_v14  ;;  %v140_v24 = vadd.f32 %v120_v15, %v62_v2  ;;  %v122_v25 = vmul.f32 2.0, %v100_v21  ;;  %v83_v26 = vrot.slane %v20_v13, 1  ;;  %v40_v27 = vrot.slane %v20_v13, 7 }
  0x14   :  { %v141_v28 = vadd.f32 %v121_v19, %v61_v16  ;;  %v59_v29 = vsel %vm50_vm1, %v38_v11, %v39_v22  ;;  %v84_v30 = vrot.slane %v21_v18, 1  ;;  %v41_v31 = vrot.slane %v21_v18, 7 }
  0x15   :  { %161 = vst.msk [vmem:[%s428_s1 + $0x40] sm:$0xff] %vm152_vm0, %v140_v24  ;;  %v142_v33 = vadd.f32 %v122_v25, %v60_v20  ;;  %v99_v34 = vsel %vm91_vm2, %v82_v12, %v83_v26  ;;  %v58_v35 = vsel %vm50_vm1, %v39_v22, %v40_v27  ;;  %v85_v36 = vrot.slane %v22_v23, 1 }
  0x16   :  { %162 = vst.msk [vmem:[%s428_s1 + $0x48] sm:$0xff] %vm152_vm0, %v141_v28  ;;  %v123_v38 = vmul.f32 2.0, %v99_v34  ;;  %v98_v39 = vsel %vm91_vm2, %v83_v26, %v84_v30  ;;  %v57_v40 = vsel %vm50_vm1, %v40_v27, %v41_v31  ;;  %v42_v41 = vrot.slane %v22_v23, 7 }
  0x17   :  { %163 = vst.msk [vmem:[%s428_s1 + $0x50] sm:$0xff] %vm152_vm0, %v142_v33  ;;  %v124_v42 = vmul.f32 2.0, %v98_v39  ;;  %v97_v43 = vsel %vm91_vm2, %v84_v30, %v85_v36  ;;  %v86_v44 = vrot.slane %v23_v32, 1  ;;  %v43_v45 = vrot.slane %v23_v32, 7 }
  0x18   :  { %v143_v47 = vadd.f32 %v123_v38, %v59_v29  ;;  %v125_v48 = vmul.f32 2.0, %v97_v43  ;;  %v56_v49 = vsel %vm50_vm1, %v41_v31, %v42_v41  ;;  %v87_v50 = vrot.slane %v24_v37, 1 }
  0x19   :  { %v144_v52 = vadd.f32 %v124_v42, %v58_v35  ;;  %v96_v53 = vsel %vm91_vm2, %v85_v36, %v86_v44  ;;  %v55_v54 = vsel %vm50_vm1, %v42_v41, %v43_v45  ;;  %v44_v55 = vrot.slane %v24_v37, 7 }
  0x1a   :  { %164 = vst.msk [vmem:[%s428_s1 + $0x58] sm:$0xff] %vm152_vm0, %v143_v47  ;;  %v145_v56 = vadd.f32 %v125_v48, %v57_v40  ;;  %v126_v57 = vmul.f32 2.0, %v96_v53  ;;  %v95_v58 = vsel %vm91_vm2, %v86_v44, %v87_v50  ;;  %v88_v59 = vrot.slane %v25_v46, 1 }
  0x1b   :  { %165 = vst.msk [vmem:[%s428_s1 + $0x60] sm:$0xff] %vm152_vm0, %v144_v52  ;;  %v127_v60 = vmul.f32 2.0, %v95_v58  ;;  %v54_v61 = vsel %vm50_vm1, %v43_v45, %v44_v55  ;;  %v45_v62 = vrot.slane %v25_v46, 7  ;;  %v89_v63 = vrot.slane %v26_v51, 1 }
  0x1c   :  { %166 = vst.msk [vmem:[%s428_s1 + $0x68] sm:$0xff] %vm152_vm0, %v145_v56  ;;  %v146_v0 = vadd.f32 %v126_v57, %v56_v49  ;;  %v94_v2 = vsel %vm91_vm2, %v87_v50, %v88_v59  ;;  %v46_v4 = vrot.slane %v26_v51, 7  ;;  %v90_v8 = vrot.slane %v198_v3, 1 }
  0x1d   :  { %v147_v9 = vadd.f32 %v127_v60, %v55_v54  ;;  %v128_v10 = vmul.f32 2.0, %v94_v2  ;;  %v53_v11 = vsel %vm50_vm1, %v44_v55, %v45_v62  ;;  %v93_v12 = vsel %vm91_vm2, %v88_v59, %v89_v63 }
  0x1e   :  { %167 = vst.msk [vmem:[%s428_s1 + $0x70] sm:$0xff] %vm152_vm0, %v146_v0  ;;  %v129_v13 = vmul.f32 2.0, %v93_v12  ;;  %v52_v14 = vsel %vm50_vm1, %v45_v62, %v46_v4  ;;  %v92_v15 = vsel %vm91_vm2, %v89_v63, %v90_v8  ;;  %v51_v18 = vsel %vm50_vm1, %v46_v4, %v47_v5 }
  0x1f   :  { %168 = vst.msk [vmem:[%s428_s1 + $0x78] sm:$0xff] %vm152_vm0, %v147_v9  ;;  %v148_v16 = vadd.f32 %v128_v10, %v54_v61  ;;  %v130_v17 = vmul.f32 2.0, %v92_v15  ;;  %v111_v19 = vsel %vm91_vm2, %v90_v8, %v71_v7 }
  0x20   :  { %v149_v20 = vadd.f32 %v129_v13, %v53_v11  ;;  %v131_v21 = vmul.f32 2.0, %v111_v19 }
  0x21   :  { %169 = vst.msk [vmem:[%s428_s1 + $0x80] sm:$0xff] %vm152_vm0, %v148_v16  ;;  %v150_v22 = vadd.f32 %v130_v17, %v52_v14 }
  0x22   :  { %170 = vst.msk [vmem:[%s428_s1 + $0x88] sm:$0xff] %vm152_vm0, %v149_v20  ;;  %v151_v3 = vadd.f32 %v131_v21, %v51_v18 }
  0x23   :  { %171 = vst.msk [vmem:[%s428_s1 + $0x90] sm:$0xff] %vm152_vm0, %v150_v22 }
  0x24   :  { %172 = vst.msk [vmem:[%s428_s1 + $0x98] sm:$0xff] %vm152_vm0, %v151_v3 }

// kernel: tpu_custom_call.1
= control target key start
LH: loop header
LB: loop body
LE: loop exit
PB: predicated region body
PF: predicated region fallthrough
CT: control target
= control target key end

     0   :  { %s4776_s0 = inlined_call_operand.hbm [shape: f32[2,16,16,64], index: 0, kind: input, shape index: {}]   ;;  %s4777_s1 = inlined_call_operand.hbm [shape: f32[2,16,16,64], index: 1, kind: input, shape index: {}]   ;;  %s4778_s2 = inlined_call_operand.hbm [shape: f32[2,16,16,64], index: 2, kind: input, shape index: {}]   ;;  %s4779_s3 = inlined_call_operand.hbm [shape: f32[3,3,64], index: 3, kind: input, shape index: {}]   ;;  %s4780_s4 = inlined_call_operand.hbm [shape: f32[64,64], index: 4, kind: input, shape index: {}]   ;;  %s4781_s5 = inlined_call_operand.vmem [shape: f32[1,64], index: 5, kind: input, shape index: {}]   ;;  %s4782_s6 = inlined_call_operand.hbm [shape: f32[3,3,64], index: 6, kind: input, shape index: {}]   ;;  %s4783_s7 = inlined_call_operand.hbm [shape: f32[64,64], index: 7, kind: input, shape index: {}]   ;;  %s4784_s8 = inlined_call_operand.vmem [shape: f32[1,64], index: 8, kind: input, shape index: {}]   ;;  %s4785_s9 = inlined_call_operand.hbm [shape: f32[2,16,16,64], index: 9, kind: output, shape index: {}]  }
   0x1   :  { %4815 = sst [smem:[#allocation42_spill]] %s4776_s0 }
   0x2   :  { %4816 = sst [smem:[#allocation43_spill]] %s4777_s1 }
   0x3   :  { %4817 = sst [smem:[#allocation44_spill]] %s4778_s2 }
   0x4   :  { %4818 = sst [smem:[#allocation45_spill]] %s4779_s3 }
   0x5   :  { %4819 = sst [smem:[#allocation46_spill]] %s4780_s4 }
   0x6   :  { %4820 = sst [smem:[#allocation47_spill]] %s4781_s5 }
   0x7   :  { %4821 = sst [smem:[#allocation48_spill]] %s4782_s6 }
   0x8   :  { %4822 = sst [smem:[#allocation49_spill]] %s4783_s7 }
   0x9   :  { %4823 = sst [smem:[#allocation50_spill]] %s4784_s8 }
   0xa   :  { %4824 = sst [smem:[#allocation51_spill]] %s4785_s9 }
   0xb   :  { %14 = vsyncpa [#allocation5], 0 }
   0xc   :  { %16 = vsyncpa [#allocation5 + $0x1], 0 }
   0xd   :  { %17 = vsyncpa [#allocation8], 0 }
   0xe   :  { %19 = vsyncpa [#allocation8 + $0x1], 0 }
   0xf   :  { %20 = vsyncpa [#allocation11], 0 }
  0x10   :  { %21 = vsyncpa [#allocation14], 0 }
  0x11   :  { %22 = vsyncpa [#allocation6], 0 }
  0x12   :  { %24 = vsyncpa [#allocation6 + $0x1], 0  ;;  %s3212_s30 = smov 0   ;;  %s3214_s10 = smov 0  }
  0x13   :  { %s3216_s11 = smov 0   ;;  %s3218_s12 = smov 0  }
  0x14   :  { %s3220_s13 = smov 0   ;;  %s3222_s14 = smov 0  }
  0x15   :  { %s3224_s15 = smov 0   ;;  %s3226_s16 = smov 0  }
  0x16   :  { %s3228_s17 = smov 0   ;;  %s3230_s18 = smov 0  }
  0x17   :  { %s3232_s19 = smov 0   ;;  %s3234_s20 = smov 0  }
  0x18   :  { %s3236_s21 = smov 0   ;;  %s3238_s22 = smov 0  }
  0x19 LB: > { %4825 = sst [smem:[#allocation23_spill]] %s3090_s30  ;;  %s3283_s23 = sadd.s32 4294967295, %s3142_s22   ;;  %s3142_s22 = sphi %s3238_s22, %s30_s22   ;;  %s3138_s21 = sphi %s3236_s21, %s4922_s21   ;;  %s3134_s20 = sphi %s3234_s20, %s4912_s20   ;;  %s3130_s19 = sphi %s3232_s19, %s4911_s19   ;;  %s3126_s18 = sphi %s3230_s18, %s4921_s18   ;;  %s3122_s17 = sphi %s3228_s17, %s4920_s17   ;;  %s3118_s16 = sphi %s3226_s16, %s4919_s16   ;;  %s3114_s15 = sphi %s3224_s15, %s4918_s15   ;;  %s3110_s14 = sphi %s3222_s14, %s4917_s14   ;;  %s3106_s13 = sphi %s3220_s13, %s4916_s13   ;;  %s3102_s12 = sphi %s3218_s12, %s4908_s12   ;;  %s3098_s11 = sphi %s3216_s11, %s4915_s11   ;;  %s3094_s10 = sphi %s3214_s10, %s4907_s10   ;;  %s3090_s30 = sphi %s3212_s30, %s4906_s30  }
  0x1a   : > { %4826 = sst [smem:[#allocation24_spill]] %s3094_s10  ;;  %p2357_p0 = scmp.ge.s32.totalorder %s3142_s22, 1 }
  0x1b   : > { %4827 = sst [smem:[#allocation25_spill]] %s3098_s11  ;;  %p4802_p1 = scmp.eq.s32.totalorder %s3283_s23, 0 }
  0x1c   : > { %4828 = sst [smem:[#allocation26_spill]] %s3106_s13  ;;  %p301_p2 = scmp.lt.s32.totalorder %s3142_s22, 5 }
  0x1d   : > { %4829 = sst [smem:[#allocation27_spill]] %s3126_s18  ;;  %s3144_s25 = smov [#allocation10]  }
  0x1e   : > { %4830 = sst [smem:[#allocation28_spill]] %s3130_s19  ;;  %p3288_p3 = pnand %p2357_p0, %p301_p2 }
  0x1f   : > { %4831 = sst [smem:[#allocation29_spill]] %s3134_s20  ;;  %s313_s26 = sshll.u32 %s3144_s25, 4  ;;  %s314_s26 = int_to_ptr.vmem [resolvable:$true] %s313_s26 }
  0x20   : > { %4832 = sst [smem:[#allocation30_spill]] %s3138_s21  ;;  %p2631_p4 = pneg %p3288_p3 }
  0x21   : > { %s4833_s24 = scalar_select %p3288_p3, 1, 0 }
  0x22   : > { %p3296_p5 = pnand %p2631_p4, %p4802_p1  ;;  %s3145_s28 = smov [#allocation13]  }
  0x23   : > { %4834 = sst [smem:[#allocation31_spill]] %s4833_s24  ;;  %s342_s29 = sshll.u32 %s3145_s28, 4  ;;  %s343_s29 = int_to_ptr.vmem [resolvable:$true] %s342_s29 }
  0x24   : > { %p2796_p6 = pneg %p3296_p5  ;;  %s2805_s9 = scalar_lea.vmem %s314_s26, 192 }
  0x25   : > { %p2806_p7 = scmp.ne.s32.totalorder %s314_s26, %s2805_s9  ;;  %p2813_p10 = scmp.lt.s32.totalorder %s314_s26, %s314_s26 }
  0x26   : > { %p2814_p11 = scmp.lt.s32.totalorder %s2805_s9, %s2805_s9 }
  0x27   : > { %p2808_p8 = pnand %p2806_p7, %p2796_p6 }
  0x28   : > { %p2815_p12 = por %p2814_p11, %p2813_p10 }
  0x29   : > { %p2809_p9 = pneg %p2808_p8 }
  0x2b   : > { %p2816_p13 = pnand %p2815_p12, %p2809_p9 }
  0x2d   : > { %2819 = shalt.err (!%p2816_p13)
}
  0x2e   : > { %s3146_s25 = smov 64   ;;  %s3147_s19 = smov 4  }
  0x2f   : > { %s4836_s3 = sld [smem:[#allocation45_spill]]  ;;  %s2831_s5 = scalar_lea.vmem %s343_s29, 192 }
  0x30   : > { %p2832_p0 = scmp.ne.s32.totalorder %s343_s29, %s2831_s5  ;;  %p2839_p7 = scmp.lt.s32.totalorder %s343_s29, %s343_s29 }
  0x31   : > { %p2840_p8 = scmp.lt.s32.totalorder %s2831_s5, %s2831_s5 }
  0x32   : > { %p2834_p2 = pnand %p2832_p0, %p2796_p6 }
  0x33   : > { %p2841_p10 = por %p2840_p8, %p2839_p7 }
  0x34   : > { %p2835_p4 = pneg %p2834_p2 }
  0x35   : > { %2634 = dma.hbm_to_vmem [thread:$0]  (!%p3296_p5), %s4836_s3, 192, %s314_s26, [#allocation11], %s3146_s25, %s3146_s25, %s3147_s19  }
  0x36   : > { %p2842_p9 = pnand %p2841_p10, %p2835_p4 }
  0x38   : > { %2845 = shalt.err (!%p2842_p9)
}
  0x39   : > { %s4837_s6 = sld [smem:[#allocation48_spill]]  ;;  %s39_s8 = sadd.s32 1, %s3134_s20 }
  0x3a   : > { %s42_s5 = sadd.s32 1, %s3138_s21  ;;  %p40_p11 = scmp.ge.s32.totalorder %s39_s8, 2 }
  0x3b   : > { %p4803_p12 = scmp.eq.s32.totalorder %s3142_s22, 0  ;;  %s2351_s26 = sshll.u32 %s3134_s20, 2 }
  0x3c   : > { %s87_s28 = sadd.s32 1, %s3110_s14  ;;  %s4924_s8 = smov (%p40_p11, %s39_s8), 0 }
  0x3d   : > { %4838 = sst [smem:[#allocation32_spill]] %s4924_s8  ;;  %s4926_s5 = smov (!%p40_p11, %s42_s5), %s3138_s21 }
  0x3e   : > { %s47_s18 = ssub.s32 %s3134_s20, %s4924_s8  ;;  %s2352_s9 = sadd.s32 4294967295, %s2351_s26 }
  0x3f   : > { %2640 = dma.hbm_to_vmem [thread:$0]  (!%p3296_p5), %s4837_s6, 192, %s343_s29, [#allocation14], %s3146_s25, %s3146_s25, %s3147_s19  }
  0x40   : > { %p44_p13 = scmp.ge.s32.totalorder %s4926_s5, 2  ;;  %p76_p0 = scmp.gt.s32.totalorder %s2352_s9, 0 }
  0x41   : > { %s2353_s19 = sshll.u32 %s4924_s8, 2  ;;  %p94_p2 = scmp.ne.s32.totalorder %s3110_s14, %s3106_s13 }
  0x42   : > { %s4928_s5 = smov (%p44_p13, %s4926_s5), 0  ;;  %s4930_s9 = smov (!%p76_p0, %s2352_s9), 0 }
  0x43   : > { %4839 = sst [smem:[#allocation33_spill]] %s4928_s5  ;;  %s3335_s29 = ssub.s32 %s3138_s21, %s4928_s5 }
  0x44   : > { %4840 = sst [smem:[#allocation34_spill]] %s3335_s29  ;;  %s2354_s25 = sadd.s32 4294967295, %s2353_s19 }
  0x45   : > { %s3338_s3 = sor.u32 %s47_s18, %s3335_s29  ;;  %p80_p4 = scmp.gt.s32.totalorder %s2354_s25, 0 }
  0x46   : > { %p49_p7 = scmp.eq.s32.totalorder %s3338_s3, 0  ;;  %p3343_p8 = por %p94_p2, %p4803_p12 }
  0x47   : > { %s4932_s25 = smov (!%p80_p4, %s2354_s25), 0  ;;  %p100_p10 = scmp.ne.s32.totalorder %s3106_s13, %s3102_s12 }
  0x48   : > { %s3349_s5 = sadd.s32 4, %s2351_s26  ;;  %s83_s8 = ssub.s32 %s4930_s9, %s4932_s25 }
  0x49   : > { %4842 = sst [smem:[#allocation35_spill]] %s3349_s5  ;;  %s84_s18 = sor.u32 %s83_s8, %s3335_s29 }
  0x4a   : > { %p3355_p11 = por %p100_p10, %p4802_p1  ;;  %p85_p13 = scmp.eq.s32.totalorder %s84_s18, 0 }
  0x4b   : > { %s3359_s2 = sadd.s32 4, %s2353_s19  ;;  %p4801_p2 = scmp.lt.s32.totalorder %s3142_s22, 4 }
  0x4c   : > { %s4843_s24 = scalar_select %p3355_p11, 1, 0 }
  0x4d   : > { %s3363_s30 = scalar_select %p85_p13, %s3110_s14, %s87_s28  }
  0x4e   : > { %4844 = sst [smem:[#allocation36_spill]] %s4843_s24  ;;  %s3367_s12 = sshll.u32 %s3138_s21, 5 }
  0x4f   : > { %4845 = sst [smem:[#allocation37_spill]] %s3363_s30  ;;  %s396_s26 = sand.u32 1, %s3142_s22  }
  0x50   : > { %s398_s8 = sand.u32 1, %s3110_s14   ;;  %s2464_s13 = sshll.u32 %s4930_s9, 2 }
  0x51   : > { %s2368_s25 = sshll.u32 %s398_s8, 5  ;;  %s411_s29 = sadd.s32 %s2464_s13, %s3367_s12 }
  0x52   : > { %s2374_s10 = sshll.u32 %s411_s29, 7  ;;  %s400_s24 = scalar_lea.vmem [#allocation7], %s2368_s25 }
  0x53   : > { %s414_s18 = sshll.u32 %s400_s24, 4  ;;  %s4846_s1 = sld [smem:[#allocation43_spill]]  ;;  %s415_s18 = int_to_ptr.vmem [resolvable:$true] %s414_s18 }
  0x54   : > { %p3379_p4 = pnand %p4801_p2, %p3343_p8  ;;  %s3148_s21 = smov [#allocation12]  }
  0x55   : > { %s326_s30 = sshll.u32 %s3148_s21, 4  ;;  %s3385_s13 = scalar_lea.sflag [#allocation8], %s396_s26  ;;  %s3383_s30 = int_to_ptr.vmem [resolvable:$true] %s326_s30 }
  0x56   : > { %p2848_p10 = pneg %p3379_p4  ;;  %s2859_s24 = scalar_lea.vmem %s415_s18, 512 }
  0x57   : > { %p2860_p13 = scmp.ne.s32.totalorder %s415_s18, %s2859_s24 }
  0x59   : > { %s413_s19 = scalar_lea.hbm %s4846_s1, %s2374_s10  ;;  %p2862_p0 = pnand %p2860_p13, %p2848_p10 }
  0x5a   : > { %s3149_s10 = smov [#allocation7]  }
  0x5b   : > { %p2863_p9 = pneg %p2862_p0  ;;  %s2864_s6 = sshll.u32 %s3149_s10, 4  ;;  %s2865_s6 = int_to_ptr.vmem [resolvable:$false] %s2864_s6 }
  0x5c   : > { %s2866_s11 = scalar_lea.vmem %s2865_s6, 1024  ;;  %p2867_p8 = scmp.lt.s32.totalorder %s415_s18, %s2865_s6 }
  0x5d   : > { %p2868_p2 = scmp.lt.s32.totalorder %s2866_s11, %s2859_s24 }
  0x5f   : > { %p2869_p1 = por %p2868_p2, %p2867_p8 }
  0x61   : > { %p2870_p12 = pnand %p2869_p1, %p2863_p9 }
  0x63   : > { %2873 = shalt.err (!%p2870_p12)
}
  0x64   : > { %s4804_s21 = smov 128   ;;  %s4806_s5 = smov 8  }
  0x65   : > { %2650 = dma.hbm_to_vmem [thread:$0]  (!%p3379_p4), %s413_s19, 512, %s415_s18, %s3385_s13, %s4804_s21, %s4804_s21, %s4806_s5  }
  0x66   : > { %s2885_s9 = scalar_lea.vmem %s3383_s30, 1024  ;;  %p2893_p12 = scmp.lt.s32.totalorder %s3383_s30, %s3383_s30 }
  0x67   : > { %p2886_p0 = scmp.ne.s32.totalorder %s3383_s30, %s2885_s9  ;;  %p2894_p9 = scmp.lt.s32.totalorder %s2885_s9, %s2885_s9 }
  0x69   : > { %p2888_p2 = pnand %p2886_p0, %p2796_p6  ;;  %p2895_p10 = por %p2894_p9, %p2893_p12 }
  0x6b   : > { %p2889_p1 = pneg %p2888_p2 }
  0x6d   : > { %p2896_p13 = pnand %p2895_p10, %p2889_p1 }
  0x6f   : > { %2899 = shalt.err (!%p2896_p13)
}
  0x70   : > { %s4848_s4 = sld [smem:[#allocation46_spill]]  ;;  %s3152_s8 = smov [#allocation15]  }
  0x71   : > { %s355_s25 = sshll.u32 %s3152_s8, 4  ;;  %s356_s25 = int_to_ptr.vmem [resolvable:$true] %s355_s25 }
  0x72   : > { %s2911_s18 = scalar_lea.vmem %s356_s25, 1024  ;;  %p2919_p2 = scmp.lt.s32.totalorder %s356_s25, %s356_s25 }
  0x73   : > { %p2912_p4 = scmp.ne.s32.totalorder %s356_s25, %s2911_s18  ;;  %p2920_p1 = scmp.lt.s32.totalorder %s2911_s18, %s2911_s18 }
  0x75   : > { %p2914_p8 = pnand %p2912_p4, %p2796_p6  ;;  %p2921_p12 = por %p2920_p1, %p2919_p2 }
  0x76   : > { %2637 = dma.hbm_to_vmem [thread:$0]  (!%p3296_p5), %s4848_s4, 1024, %s3383_s30, [#allocation11], %s4804_s21, %s4804_s21, %s4806_s5  }
  0x77   : > { %p2915_p0 = pneg %p2914_p8 }
  0x79   : > { %p2922_p9 = pnand %p2921_p12, %p2915_p0 }
  0x7b   : > { %2925 = shalt.err (!%p2922_p9)
}
  0x7c   : > { %s4849_s7 = sld [smem:[#allocation49_spill]]  ;;  %s2350_s27 = sadd.s32 4294967294, %s3142_s22  }
  0x7d   : > { %s51_s28 = sadd.s32 1, %s3122_s17  ;;  %p58_p6 = scmp.ne.s32.totalorder %s3122_s17, %s3118_s16 }
  0x7e   : > { %s3427_s24 = scalar_select %p49_p7, %s3122_s17, %s51_s28  }
  0x7f   : > { %p64_p10 = scmp.ne.s32.totalorder %s3118_s16, %s3114_s15  ;;  %p288_p13 = scmp.eq.s32.totalorder %s3283_s23, 3 }
  0x80   : > { %p294_p4 = scmp.eq.s32.totalorder %s2350_s27, 3  ;;  %p4850_p8 = scmp.eq.s32.totalorder %s3142_s22, 0 }
  0x81   : > { %p4852_p2 = scmp.eq.s32.totalorder %s3283_s23, 0  ;;  %s372_s9 = sand.u32 1, %s3122_s17  }
  0x82   : > { %2643 = dma.hbm_to_vmem [thread:$0]  (!%p3296_p5), %s4849_s7, 1024, %s356_s25, [#allocation14], %s4804_s21, %s4804_s21, %s4806_s5  }
  0x83   : > { %p3436_p0 = por %p4850_p8, %p58_p6  ;;  %p3442_p1 = por %p4852_p2, %p64_p10 }
  0x84   : > { %p3446_p5 = por %p288_p13, %p58_p6  ;;  %p3450_p7 = por %p294_p4, %p64_p10 }
  0x85   : > { %s2463_s29 = sshll.u32 %s3134_s20, 4  ;;  %s2363_s26 = sshll.u32 %s372_s9, 7 }
  0x86   : > { %s4854_s3 = scalar_select %p3446_p5, 1, 0 }
  0x87   : > { %s4855_s11 = scalar_select %p3450_p7, 1, 0 }
  0x88   : > { %s383_s8 = sadd.s32 %s2463_s29, %s3367_s12  ;;  %s376_s18 = scalar_lea.vmem [#allocation4], %s2363_s26 }
  0x89   : > { %s2367_s25 = sshll.u32 %s383_s8, 7  ;;  %s386_s30 = sshll.u32 %s376_s18, 4  ;;  %s387_s30 = int_to_ptr.vmem [resolvable:$true] %s386_s30 }
  0x8a   : > { %s4856_s0 = sld [smem:[#allocation42_spill]]  ;;  %p4857_p12 = scmp.lt.s32.totalorder %s3142_s22, 4 }
  0x8b   : > { %s373_s5 = scalar_lea.sflag [#allocation5], %s372_s9  ;;  %s2939_s1 = scalar_lea.vmem %s387_s30, 2048 }
  0x8c   : > { %p3464_p9 = pnand %p4857_p12, %p3436_p0  ;;  %p2940_p10 = scmp.ne.s32.totalorder %s387_s30, %s2939_s1 }
  0x8d   : > { %s3153_s29 = smov [#allocation4]  }
  0x8e   : > { %p2928_p6 = pneg %p3464_p9  ;;  %s2944_s26 = sshll.u32 %s3153_s29, 4  ;;  %s2945_s26 = int_to_ptr.vmem [resolvable:$false] %s2944_s26 }
  0x8f   : > { %s2946_s8 = scalar_lea.vmem %s2945_s26, 4096  ;;  %p2947_p8 = scmp.lt.s32.totalorder %s387_s30, %s2945_s26 }
  0x90   : > { %s385_s28 = scalar_lea.hbm %s4856_s0, %s2367_s25  ;;  %p2942_p13 = pnand %p2940_p10, %p2928_p6 }
  0x91   : > { %p2948_p2 = scmp.lt.s32.totalorder %s2946_s8, %s2939_s1 }
  0x92   : > { %p2943_p4 = pneg %p2942_p13 }
  0x93   : > { %p2949_p7 = por %p2948_p2, %p2947_p8 }
  0x95   : > { %p2950_p5 = pnand %p2949_p7, %p2943_p4 }
  0x97   : > { %2953 = shalt.err (!%p2950_p5)
}
  0x98   : > { %s4859_s10 = smov 8   ;;  %s4860_s25 = smov 128  }
  0x99   : > { %s4861_s9 = sld [smem:[#allocation35_spill]]  ;;  %p4867_p5 = scmp.lt.s32.totalorder %s3359_s2, 7 }
  0x9a   : > { %s4862_s18 = sld [smem:[#allocation25_spill]]  ;;  %p4868_p6 = scmp.eq.s32.totalorder %s3142_s22, 0 }
  0x9b   : > { %s4863_s19 = sld [smem:[#allocation24_spill]]  ;;  %s4936_s2 = smov (!%p4867_p5, %s3359_s2), 7 }
  0x9c   : > { %s4864_s27 = sld [smem:[#allocation23_spill]]  ;;  %p4870_p4 = scmp.eq.s32.totalorder %s3283_s23, 0 }
  0x9d   : > { %s4865_s29 = sld [smem:[#allocation34_spill]] }
  0x9e   : > { %2647 = dma.hbm_to_vmem [thread:$0]  (!%p3464_p9), %s385_s28, 2048, %s387_s30, %s373_s5, %s4860_s25, %s4860_s25, %s4859_s10  }
  0x9f   : > { %p4866_p0 = scmp.lt.s32.totalorder %s4861_s9, 7  ;;  %p4873_p9 = scmp.lt.s32.totalorder %s3142_s22, 4 }
  0xa0   : > { %s123_s1 = sadd.s32 1, %s4862_s18  ;;  %s426_s30 = sand.u32 1, %s4862_s18  }
  0xa1   : > { %s4934_s9 = smov (!%p4866_p0, %s4861_s9), 7  ;;  %p130_p7 = scmp.ne.s32.totalorder %s4862_s18, %s4863_s19 }
  0xa2   : > { %s119_s21 = ssub.s32 %s4934_s9, %s4936_s2  ;;  %p136_p12 = scmp.ne.s32.totalorder %s4863_s19, %s4864_s27 }
  0xa3   : > { %s120_s26 = sor.u32 %s119_s21, %s4865_s29  ;;  %p3489_p10 = por %p130_p7, %p4868_p6 }
  0xa4   : > { %p121_p13 = scmp.eq.s32.totalorder %s120_s26, 0  ;;  %p3495_p8 = por %p136_p12, %p4870_p4 }
  0xa5   : > { %s2467_s28 = sshll.u32 %s4934_s9, 2  ;;  %s2375_s2 = sshll.u32 %s426_s30, 5 }
  0xa6   : > { %s4871_s5 = scalar_select %p3495_p8, 1, 0 }
  0xa7   : > { %s4938_s18 = smov (!%p121_p13, %s4862_s18), %s123_s1  ;;  %s439_s0 = sadd.s32 %s2467_s28, %s3367_s12 }
  0xa8   : > { %s2380_s19 = sshll.u32 %s439_s0, 7  ;;  %s4872_s21 = sld [smem:[#allocation44_spill]] }
  0xa9   : > { %s428_s7 = scalar_lea.vmem [#allocation9], %s2375_s2  ;;  %p3511_p2 = pnand %p4873_p9, %p3489_p10 }
  0xaa   : > { %s442_s20 = sshll.u32 %s428_s7, 4  ;;  %s3154_s0 = smov [#allocation9]   ;;  %s443_s20 = int_to_ptr.vmem [resolvable:$true] %s442_s20 }
  0xab   : > { %p2956_p0 = pneg %p3511_p2  ;;  %s2967_s9 = scalar_lea.vmem %s443_s20, 512 }
  0xac   : > { %p2968_p5 = scmp.ne.s32.totalorder %s443_s20, %s2967_s9  ;;  %s2972_s12 = sshll.u32 %s3154_s0, 4  ;;  %s2973_s12 = int_to_ptr.vmem [resolvable:$false] %s2972_s12 }
  0xad   : > { %s2974_s1 = scalar_lea.vmem %s2973_s12, 1024  ;;  %p2975_p6 = scmp.lt.s32.totalorder %s443_s20, %s2973_s12 }
  0xae   : > { %s441_s4 = scalar_lea.hbm %s4872_s21, %s2380_s19  ;;  %p2970_p7 = pnand %p2968_p5, %p2956_p0 }
  0xaf   : > { %p2976_p13 = scmp.lt.s32.totalorder %s2974_s1, %s2967_s9 }
  0xb0   : > { %p2971_p12 = pneg %p2970_p7 }
  0xb1   : > { %p2977_p4 = por %p2976_p13, %p2975_p6 }
  0xb3   : > { %p2978_p8 = pnand %p2977_p4, %p2971_p12 }
  0xb5   : > { %2981 = shalt.err (!%p2978_p8)
}
  0xb6   : > { %2653 = dma.hbm_to_vmem [thread:$0]  (!%p3511_p2), %s441_s4, 512, %s443_s20, %s3385_s13, %s4860_s25, %s4860_s25, %s4859_s10  }
  0xb7   : > { %454 = sbr.rel (%p3288_p3) target bundleno = 896 (0x380), region = 56 }
  0xbc   : > { %s3526_s8 = sand.u32 1, %s3118_s16  }
  0xbd   : > { %s2382_s30 = sshll.u32 %s3526_s8, 7  ;;  %s457_s28 = scalar_lea.sflag [#allocation5], %s3526_s8 }
  0xbe   : > { %s3532_s2 = scalar_lea.vmem [#allocation4], %s2382_s30 }
  0xbf   : > { %3065 = dma.done.wait (%p3442_p1), %s457_s28, 2048  }
  0xc0   : > { %3067 = vsyncadd (%p3442_p1), %s457_s28, 4294965248  ;;  %s4876_s4 = sld [smem:[#allocation26_spill]]  ;;  %s465_s13 = sand.u32 1, %s3283_s23  }
  0xc1   : > { %s466_s19 = scalar_lea.sflag [#allocation8], %s465_s13 }
  0xc6   : > { %s467_s10 = sand.u32 1, %s4876_s4  }
  0xc7   : > { %s2383_s25 = sshll.u32 %s467_s10, 5 }
  0xc8   : > { %s3540_s27 = scalar_lea.vmem [#allocation7], %s2383_s25 }
  0xc9   : > { %3069 = dma.done.wait (%p3355_p11), %s466_s19, 512  }
  0xca   : > { %3071 = vsyncadd (%p3355_p11), %s466_s19, 4294966784  ;;  %s4878_s29 = sld [smem:[#allocation24_spill]]  ;;  %p4879_p3 = scmp.ne.s32.totalorder %s4871_s5, 0 }
  0xd0   : > { %s476_s21 = sand.u32 1, %s4878_s29  }
  0xd1   : > { %s2384_s26 = sshll.u32 %s476_s21, 5 }
  0xd2   : > { %s3547_s6 = scalar_lea.vmem [#allocation9], %s2384_s26 }
  0xd3   : > { %3073 = dma.done.wait (%p4879_p3), %s466_s19, 512  }
  0xd4   : > { %3075 = vsyncadd (%p4879_p3), %s466_s19, 4294966784  ;;  %p4880_p1 = scmp.eq.s32.totalorder %s3283_s23, 0 }
  0xd6   : > { %3077 = dma.done.wait (%p4880_p1), [#allocation11], 1216   ;;  %p4881_p10 = pmov %p4880_p1 }
  0xd7   : > { %p4882_p8 = pmov %p4880_p1 }
  0xd8   : > { %3079 = vsyncadd (%p4881_p10), [#allocation11], 4294966080 }
  0xd9   : > { %3081 = dma.done.wait (%p4882_p8), [#allocation14], 1216   ;;  %p4883_p11 = pmov %p4880_p1 }
  0xda   : > { %vm567_vm0 = vcmask 523264   ;;  %v3562_v0 = vld [vmem:[%s3532_s2] sm:$0xff]  ;;  %v3565_v1 = vld [vmem:[%s3532_s2 + $0x8] sm:$0xff]  ;;  %v3568_v2 = vld [vmem:[%s3532_s2 + $0x10] sm:$0xff]  ;;  %s3643_s23 = scalar_lea.vmem [#allocation16], %s2382_s30  ;;  %s4888_s5 = sld [smem:[#allocation27_spill]] }
  0xdb   : > { %3083 = vsyncadd (%p4883_p11), [#allocation14], 4294966080  ;;  %568 = vst.msk [vmem:[#allocation2 + $0x28] sm:$0xff] %vm567_vm0, %v3562_v0  ;;  %v3577_v3 = vld [vmem:[%s3532_s2 + $0x18] sm:$0xff]  ;;  %v3580_v4 = vld [vmem:[%s3532_s2 + $0x20] sm:$0xff] }
  0xdc   : > { %569 = vst.msk [vmem:[#allocation2 + $0x30] sm:$0xff] %vm567_vm0, %v3565_v1  ;;  %570 = vst.msk [vmem:[#allocation2 + $0x38] sm:$0xff] %vm567_vm0, %v3568_v2  ;;  %v3583_v5 = vld [vmem:[%s3532_s2 + $0x28] sm:$0xff]  ;;  %v3592_v6 = vld [vmem:[%s3532_s2 + $0x30] sm:$0xff] }
  0xdd   : > { %571 = vst.msk [vmem:[#allocation2 + $0x40] sm:$0xff] %vm567_vm0, %v3577_v3  ;;  %572 = vst.msk [vmem:[#allocation2 + $0x48] sm:$0xff] %vm567_vm0, %v3580_v4  ;;  %v3595_v7 = vld [vmem:[%s3532_s2 + $0x38] sm:$0xff]  ;;  %v3598_v8 = vld [vmem:[%s3532_s2 + $0x40] sm:$0xff] }
  0xde   : > { %573 = vst.msk [vmem:[#allocation2 + $0x50] sm:$0xff] %vm567_vm0, %v3583_v5  ;;  %574 = vst.msk [vmem:[#allocation2 + $0x58] sm:$0xff] %vm567_vm0, %v3592_v6  ;;  %v3607_v9 = vld [vmem:[%s3532_s2 + $0x48] sm:$0xff]  ;;  %v3610_v10 = vld [vmem:[%s3532_s2 + $0x50] sm:$0xff] }
  0xdf   : > { %575 = vst.msk [vmem:[#allocation2 + $0x60] sm:$0xff] %vm567_vm0, %v3595_v7  ;;  %576 = vst.msk [vmem:[#allocation2 + $0x68] sm:$0xff] %vm567_vm0, %v3598_v8  ;;  %v3613_v11 = vld [vmem:[%s3532_s2 + $0x58] sm:$0xff]  ;;  %v3622_v12 = vld [vmem:[%s3532_s2 + $0x60] sm:$0xff] }
  0xe0   : > { %577 = vst.msk [vmem:[#allocation2 + $0x70] sm:$0xff] %vm567_vm0, %v3607_v9  ;;  %578 = vst.msk [vmem:[#allocation2 + $0x78] sm:$0xff] %vm567_vm0, %v3610_v10  ;;  %v3625_v13 = vld [vmem:[%s3532_s2 + $0x68] sm:$0xff]  ;;  %v3628_v14 = vld [vmem:[%s3532_s2 + $0x70] sm:$0xff]  ;;  %p2390_p9 = scmp.ne.s32.totalorder %s4888_s5, 0 }
  0xe1   : > { %579 = vst.msk [vmem:[#allocation2 + $0x80] sm:$0xff] %vm567_vm0, %v3613_v11  ;;  %4884 = vst [vmem:[#allocation38_spill] sm:$0xff] %v3622_v12  ;;  %v3637_v15 = vld [vmem:[%s3532_s2 + $0x78] sm:$0xff] }
  0xe2   : > { %4885 = vst [vmem:[#allocation39_spill] sm:$0xff] %v3625_v13  ;;  %4886 = vst [vmem:[#allocation40_spill] sm:$0xff] %v3628_v14  ;;  %587 = sbr.rel (%p2390_p9) target bundleno = 234 (0xea), region = 88 }
  0xe3   : > { %580 = vst.msk [vmem:[#allocation2 + $0x88] sm:$0xff] %vm567_vm0, %v3622_v12  ;;  %581 = vst.msk [vmem:[#allocation2 + $0x90] sm:$0xff] %vm567_vm0, %v3625_v13 }
  0xe4   : > { %582 = vst.msk [vmem:[#allocation2 + $0x98] sm:$0xff] %vm567_vm0, %v3628_v14  ;;  %4887 = vst [vmem:[#allocation41_spill] sm:$0xff] %v3637_v15 }
  0xe5   : > { %583 = vst.msk [vmem:[#allocation2 + $0xa0] sm:$0xff] %vm567_vm0, %v3637_v15 }
  0xe7   : > { %v3155_v16 = vmov 0.0  }
  0xe8   : > { %588 = vst.msk [vmem:[#allocation2 + $0x8] sm:$0xff] %vm567_vm0, %v3155_v16  ;;  %589 = vst.msk [vmem:[#allocation2 + $0x10] sm:$0xff] %vm567_vm0, %v3155_v16 }
  0xe9   : > { %590 = vst.msk [vmem:[#allocation2 + $0x18] sm:$0xff] %vm567_vm0, %v3155_v16  ;;  %591 = vst.msk [vmem:[#allocation2 + $0x20] sm:$0xff] %vm567_vm0, %v3155_v16 }
  0xea PF: > { %s4889_s9 = sld [smem:[#allocation27_spill]] }
  0xf0   : > { %p2391_p2 = scmp.le.s32.totalorder %s4889_s9, 0 }
  0xf2   : > { %595 = sbr.rel (%p2391_p2) target bundleno = 250 (0xfa), region = 92 }
  0xf7   : > { %v596_v17 = vld [vmem:[%s3540_s27] sm:$0xff]  ;;  %v597_v18 = vld [vmem:[%s3540_s27 + $0x8] sm:$0xff]  ;;  %v598_v19 = vld [vmem:[%s3540_s27 + $0x10] sm:$0xff] }
  0xf8   : > { %600 = vst.msk [vmem:[#allocation2 + $0x8] sm:$0xff] %vm567_vm0, %v596_v17  ;;  %601 = vst.msk [vmem:[#allocation2 + $0x10] sm:$0xff] %vm567_vm0, %v597_v18  ;;  %v599_v20 = vld [vmem:[%s3540_s27 + $0x18] sm:$0xff] }
  0xf9   : > { %602 = vst.msk [vmem:[#allocation2 + $0x18] sm:$0xff] %vm567_vm0, %v598_v19  ;;  %603 = vst.msk [vmem:[#allocation2 + $0x20] sm:$0xff] %vm567_vm0, %v599_v20 }
  0xfa PF: > { %s4890_s0 = sld [smem:[#allocation27_spill]] }
 0x100   : > { %p2392_p0 = scmp.ne.s32.totalorder %s4890_s0, 1 }
 0x102   : > { %607 = sbr.rel (%p2392_p0) target bundleno = 266 (0x10a), region = 96 }
 0x107   : > { %v3156_v21 = vmov 0.0  }
 0x108   : > { %608 = vst.msk [vmem:[#allocation2 + $0xa8] sm:$0xff] %vm567_vm0, %v3156_v21  ;;  %609 = vst.msk [vmem:[#allocation2 + $0xb0] sm:$0xff] %vm567_vm0, %v3156_v21 }
 0x109   : > { %610 = vst.msk [vmem:[#allocation2 + $0xb8] sm:$0xff] %vm567_vm0, %v3156_v21  ;;  %611 = vst.msk [vmem:[#allocation2 + $0xc0] sm:$0xff] %vm567_vm0, %v3156_v21 }
 0x10a PF: > { %s4891_s12 = sld [smem:[#allocation27_spill]] }
 0x110   : > { %p2393_p5 = scmp.ge.s32.totalorder %s4891_s12, 1 }
 0x112   : > { %615 = sbr.rel (%p2393_p5) target bundleno = 282 (0x11a), region = 100 }
 0x117   : > { %v616_v22 = vld [vmem:[%s3547_s6] sm:$0xff]  ;;  %v617_v23 = vld [vmem:[%s3547_s6 + $0x8] sm:$0xff]  ;;  %v618_v24 = vld [vmem:[%s3547_s6 + $0x10] sm:$0xff] }
 0x118   : > { %620 = vst.msk [vmem:[#allocation2 + $0xa8] sm:$0xff] %vm567_vm0, %v616_v22  ;;  %621 = vst.msk [vmem:[#allocation2 + $0xb0] sm:$0xff] %vm567_vm0, %v617_v23  ;;  %v619_v25 = vld [vmem:[%s3547_s6 + $0x18] sm:$0xff] }
 0x119   : > { %622 = vst.msk [vmem:[#allocation2 + $0xb8] sm:$0xff] %vm567_vm0, %v618_v24  ;;  %623 = vst.msk [vmem:[#allocation2 + $0xc0] sm:$0xff] %vm567_vm0, %v619_v25 }
 0x11a PF: > { %v1137_v26 = vld [vmem:[#allocation12 + $0x38] sm:$0xff]  ;;  %v1136_v27 = vld [vmem:[#allocation12 + $0x30] sm:$0xff]  ;;  %v624_v28 = vlaneseq  ;;  %v1135_v29 = vld [vmem:[#allocation12 + $0x28] sm:$0xff]  ;;  %s4892_s30 = sld [smem:[#allocation47_spill]] }
 0x11b   : > { %2521 = vmatprep.subr.mxu0 %v1137_v26  ;;  %v1134_v30 = vld [vmem:[#allocation12 + $0x20] sm:$0xff]  ;;  %v633_v33 = vld [vmem:[#allocation2 + $0x18] sm:$0xff]  ;;  %v1133_v36 = vld [vmem:[#allocation12 + $0x18] sm:$0xff] }
 0x11c   : > { %2522 = vmatpush3.msra.mxu0 %v1137_v26  ;;  %v3677_v31 = vshrl.u32 %v624_v28, 7  ;;  %v631_v32 = vld [vmem:[#allocation2 + $0x8] sm:$0xff]  ;;  %v653_v37 = vld [vmem:[#allocation2 + $0x17] sm:$0xff]  ;;  %v3680_v42 = vld [vmem:[#allocation10 + $0x1] ss:$0 sm:$0xff] }
 0x11d   : > { %2523 = vmatprep.subr.mxu0 %v1136_v27  ;;  %v635_v34 = vld [vmem:[#allocation2 + $0x28] sm:$0xff]  ;;  %v673_v40 = vld [vmem:[#allocation2 + $0x19] sm:$0xff]  ;;  %v696_v45 = vmul.f32 %v3680_v42, %v631_v32  ;;  %v3687_v46 = vmul.f32 %v3680_v42, %v633_v33  ;;  %v3694_v49 = vld [vmem:[#allocation10 + $0x2] ss:$0 sm:$0xff] }
 0x11e   : > { %v651_v35 = vld [vmem:[#allocation2 + $0x7] sm:$0xff]  ;;  %2524 = vmatpush3.msra.mxu0 %v1136_v27  ;;  %vm627_vm1 = vcmp.ne.s32.totalorder %v3677_v31, 0  ;;  %v3683_v43 = vadd.s32 8, %v3677_v31  ;;  %v1132_v44 = vld [vmem:[#allocation12 + $0x10] sm:$0xff]  ;;  %v3690_v47 = vmul.f32 %v3680_v42, %v635_v34  ;;  %v3696_v50 = vld [vmem:[#allocation10 + $0x5] ss:$0 sm:$0xff]  ;;  %v748_v58 = vmul.f32 %v3694_v49, %v673_v40 }
 0x11f   : > { %v655_v38 = vld [vmem:[#allocation2 + $0x27] sm:$0xff]  ;;  %2525 = vmatprep.subr.mxu0 %v1135_v29  ;;  %v3692_v48 = vld [vmem:[#allocation10] ss:$0 sm:$0xff]  ;;  %v3706_v55 = vld [vmem:[#allocation10 + $0x4] ss:$0 sm:$0xff]  ;;  %v778_v60 = vmul.f32 %v3696_v50, %v633_v33  ;;  %v780_v61 = vmul.f32 %v3696_v50, %v635_v34 }
 0x120   : > { %v671_v39 = vld [vmem:[#allocation2 + $0x9] sm:$0xff]  ;;  %2526 = vmatpush3.msra.mxu0 %v1135_v29  ;;  %v721_v51 = vmul.f32 %v3692_v48, %v651_v35  ;;  %v3700_v52 = vmul.f32 %v3692_v48, %v653_v37  ;;  %v3703_v53 = vmul.f32 %v3692_v48, %v655_v38  ;;  %v3708_v56 = vld [vmem:[#allocation10 + $0x6] ss:$0 sm:$0xff]  ;;  %v3718_v62 = vld [vmem:[#allocation10 + $0x8] ss:$0 sm:$0xff]  ;;  %v803_v18 = vmul.f32 %v3706_v55, %v653_v37 }
 0x121   : > { %v675_v41 = vld [vmem:[#allocation2 + $0x29] sm:$0xff]  ;;  %2527 = vmatprep.subr.mxu0 %v1134_v30  ;;  %v746_v54 = vmul.f32 %v3694_v49, %v671_v39  ;;  %v1131_v17 = vld [vmem:[#allocation12 + $0x8] sm:$0xff]  ;;  %v805_v19 = vmul.f32 %v3706_v55, %v655_v38  ;;  %v828_v20 = vmul.f32 %v3708_v56, %v673_v40  ;;  %v634_v22 = vld [vmem:[#allocation2 + $0x20] sm:$0xff]  ;;  %v848_v24 = vadd.f32 %v778_v60, %v696_v45 }
 0x122   : > { %v3710_v57 = vld [vmem:[#allocation10 + $0x9] ss:$0 sm:$0xff]  ;;  %2528 = vmatpush3.msra.mxu0 %v1134_v30  ;;  %v3714_v59 = vmul.f32 %v3694_v49, %v675_v41  ;;  %v3720_v63 = vld [vmem:[#allocation10 + $0xa] ss:$0 sm:$0xff]  ;;  %v632_v16 = vld [vmem:[#allocation2 + $0x10] sm:$0xff]  ;;  %v830_v21 = vmul.f32 %v3708_v56, %v675_v41  ;;  %v945_v26 = vmul.f32 %v3718_v62, %v655_v38  ;;  %v868_v32 = vadd.f32 %v803_v18, %v721_v51 }
 0x123   : > { %2529 = vmatprep.subr.mxu0 %v1133_v36  ;;  %v652_v23 = vld [vmem:[#allocation2 + $0xf] sm:$0xff]  ;;  %v920_v25 = vmul.f32 %v3710_v57, %v635_v34  ;;  %v970_v27 = vmul.f32 %v3720_v63, %v675_v41  ;;  %v654_v29 = vld [vmem:[#allocation2 + $0x1f] sm:$0xff]  ;;  %v888_v33 = vadd.f32 %v828_v20, %v746_v54  ;;  %vm630_vm2 = vcmp.ne.s32.totalorder %v3683_v43, 15 }
 0x124   : > { %2530 = vmatpush3.msra.mxu0 %v1133_v36  ;;  %v3729_v28 = vld [vmem:[#allocation2 + $0x30] sm:$0xff]  ;;  %v674_v37 = vld [vmem:[#allocation2 + $0x21] sm:$0xff]  ;;  %v697_v34 = vmul.f32 %v3680_v42, %v632_v16  ;;  %v722_v40 = vmul.f32 %v3692_v48, %v652_v23  ;;  %v779_v45 = vmul.f32 %v3696_v50, %v634_v22  ;;  %v1010_v51 = vadd.f32 %v945_v26, %v868_v32 }
 0x125   : > { %v672_v30 = vld [vmem:[#allocation2 + $0x11] sm:$0xff]  ;;  %2531 = vmatprep.subr.mxu0 %v1132_v44  ;;  %v990_v39 = vadd.f32 %v920_v25, %v848_v24  ;;  %v1030_v54 = vadd.f32 %v970_v27, %v888_v33  ;;  %v804_v60 = vmul.f32 %v3706_v55, %v654_v29  ;;  %v829_v18 = vmul.f32 %v3708_v56, %v674_v37 }
 0x126   : > { %v3732_v35 = vld [vmem:[#allocation2 + $0x2f] sm:$0xff]  ;;  %2532 = vmatpush3.msra.mxu0 %v1132_v44  ;;  %v747_v41 = vmul.f32 %v3694_v49, %v672_v30  ;;  %v849_v20 = vadd.f32 %v779_v45, %v697_v34  ;;  %v921_v44 = vmul.f32 %v3710_v57, %v3729_v28  ;;  %v3748_v24 = vld [vmem:[#allocation2 + $0x38] sm:$0xff]  ;;  %v1050_v26 = vsel %vm627_vm1, %v1010_v51, 0.0 }
 0x127   : > { %v3734_v36 = vld [vmem:[#allocation2 + $0x31] sm:$0xff]  ;;  %2533 = vmatprep.subr.mxu0 %v1131_v17  ;;  %v946_v16 = vmul.f32 %v3718_v62, %v3732_v35  ;;  %v869_v27 = vadd.f32 %v804_v60, %v722_v40  ;;  %v3754_v30 = vld [vmem:[#allocation2 + $0x39] sm:$0xff]  ;;  %v850_v32 = vadd.f32 %v780_v61, %v3687_v46  ;;  %v1070_v33 = vadd.f32 %v1050_v26, %v990_v39 }
 0x128   : > { %v1130_v38 = vld [vmem:[#allocation12] sm:$0xff]  ;;  %2534 = vmatpush3.msra.mxu0 %v1131_v17  ;;  %v971_v23 = vmul.f32 %v3720_v63, %v3734_v36  ;;  %v3750_v25 = vld [vmem:[#allocation2 + $0x37] sm:$0xff]  ;;  %v889_v17 = vadd.f32 %v829_v18, %v747_v41  ;;  %v991_v34 = vadd.f32 %v921_v44, %v849_v20  ;;  %v870_v45 = vadd.f32 %v805_v19, %v3700_v52  ;;  %v3764_v60 = vld [vmem:[#allocation2 + $0x40] sm:$0xff] }
 0x129   : > { %2535 = vmatprep.subr.mxu0 %v1130_v38  ;;  %v890_v14 = vadd.f32 %v830_v21, %v748_v58  ;;  %v1011_v15 = vadd.f32 %v946_v16, %v869_v27  ;;  %v922_v13 = vmul.f32 %v3710_v57, %v3748_v24  ;;  %v947_v51 = vmul.f32 %v3718_v62, %v3750_v25 }
 0x12a   : > { %2536 = vmatpush3.msra.mxu0 %v1130_v38  ;;  %v1031_v12 = vadd.f32 %v971_v23, %v889_v17  ;;  %v1110_v40 = vadd.f32 %v1070_v33, %v1030_v54  ;;  %v972_v41 = vmul.f32 %v3720_v63, %v3754_v30  ;;  %v699_v46 = vmul.f32 %v3680_v42, %v634_v22  ;;  %v3770_v38 = vld [vmem:[#allocation2 + $0x3f] sm:$0xff]  ;;  %v3788_v23 = vld [vmem:[#allocation2 + $0x48] sm:$0xff] }
 0x12b   : > { %v724_v61 = vmul.f32 %v3692_v48, %v654_v29  ;;  %v1071_v52 = vadd.f32 %v1011_v15, %v991_v34  ;;  %v992_v19 = vadd.f32 %v922_v13, %v850_v32  ;;  %v1012_v21 = vadd.f32 %v947_v51, %v870_v45  ;;  %v3773_v54 = vld [vmem:[#allocation2 + $0x41] sm:$0xff]  ;;  %v3795_v32 = vld [vmem:[#allocation2 + $0x49] sm:$0xff] }
 0x12c   : > { %v1091_v58 = vsel %vm630_vm2, %v1031_v12, 0.0  ;;  %2537 = vmatprep.mubr.msk.f32.mxu0 %vm567_vm0, %v1110_v40  ;;  %v1032_v39 = vadd.f32 %v972_v41, %v890_v14  ;;  %v749_v18 = vmul.f32 %v3694_v49, %v674_v37  ;;  %v781_v22 = vmul.f32 %v3696_v50, %v3729_v28  ;;  %v3793_v17 = vld [vmem:[#allocation2 + $0x47] sm:$0xff] }
 0x12d   : > { %v806_v15 = vmul.f32 %v3706_v55, %v3732_v35  ;;  %v1111_v29 = vadd.f32 %v1091_v58, %v1071_v52  ;;  %v1052_v12 = vsel %vm627_vm1, %v1012_v21, 0.0  ;;  %v831_v13 = vmul.f32 %v3708_v56, %v3734_v36 }
 0x12e   : > { %v923_v14 = vmul.f32 %v3710_v57, %v3764_v60  ;;  %v1072_v20 = vadd.f32 %v1052_v12, %v992_v19  ;;  %v851_v44 = vadd.f32 %v781_v22, %v699_v46  ;;  %v948_v37 = vmul.f32 %v3718_v62, %v3770_v38  ;;  %v3813_v22 = vld [vmem:[#allocation2 + $0x50] sm:$0xff] }
 0x12f   : > { %v871_v16 = vadd.f32 %v806_v15, %v724_v61  ;;  %2538 = vmatmul.mubr.msk.f32.vlgmr.msra.gmra.mxu0 %vm567_vm0, %v1111_v29  ;;  %v891_v26 = vadd.f32 %v831_v13, %v749_v18  ;;  %v973_v27 = vmul.f32 %v3720_v63, %v3773_v54  ;;  %v782_v33 = vmul.f32 %v3696_v50, %v3748_v24  ;;  %v3817_v15 = vld [vmem:[#allocation2 + $0x4f] sm:$0xff] }
 0x130   : > { %v807_v34 = vmul.f32 %v3706_v55, %v3750_v25  ;;  %v1112_v45 = vadd.f32 %v1072_v20, %v1032_v39  ;;  %v993_v51 = vadd.f32 %v923_v14, %v851_v44  ;;  %v832_v41 = vmul.f32 %v3708_v56, %v3754_v30  ;;  %v3819_v29 = vld [vmem:[#allocation2 + $0x51] sm:$0xff] }
 0x131   : > { %v1013_v40 = vadd.f32 %v948_v37, %v871_v16  ;;  %v1033_v46 = vadd.f32 %v973_v27, %v891_v26  ;;  %v852_v61 = vadd.f32 %v782_v33, %v3690_v47  ;;  %v924_v58 = vmul.f32 %v3710_v57, %v3788_v23 }
 0x132   : > { %v872_v52 = vadd.f32 %v807_v34, %v3703_v53  ;;  %2540 = vmatprep.mubr.msk.f32.mxu0 %vm567_vm0, %v1112_v45  ;;  %v892_v21 = vadd.f32 %v832_v41, %v3714_v59  ;;  %v949_v39 = vmul.f32 %v3718_v62, %v3793_v17  ;;  %v974_v18 = vmul.f32 %v3720_v63, %v3795_v32  ;;  %v3844_v41 = vld [vmem:[#allocation2 + $0x58] sm:$0xff] }
 0x133   : > { %v1073_v19 = vadd.f32 %v1013_v40, %v993_v51  ;;  %v1093_v47 = vsel %vm630_vm2, %v1033_v46, 0.0  ;;  %v994_v53 = vadd.f32 %v924_v58, %v852_v61  ;;  %v701_v12 = vmul.f32 %v3680_v42, %v3729_v28  ;;  %v3846_v46 = vld [vmem:[#allocation2 + $0x57] sm:$0xff] }
 0x134   : > { %v726_v59 = vmul.f32 %v3692_v48, %v3732_v35  ;;  %v1014_v14 = vadd.f32 %v949_v39, %v872_v52  ;;  %v1034_v20 = vadd.f32 %v974_v18, %v892_v21  ;;  %v751_v44 = vmul.f32 %v3694_v49, %v3734_v36  ;;  %v3848_v61 = vld [vmem:[#allocation2 + $0x59] sm:$0xff] }
 0x135   : > { %v1113_v13 = vadd.f32 %v1093_v47, %v1073_v19  ;;  %v783_v16 = vmul.f32 %v3696_v50, %v3764_v60  ;;  %v808_v37 = vmul.f32 %v3706_v55, %v3770_v38  ;;  %v833_v26 = vmul.f32 %v3708_v56, %v3773_v54 }
 0x136   : > { %v925_v28 = vmul.f32 %v3710_v57, %v3813_v22  ;;  %v1054_v35 = vsel %vm627_vm1, %v1014_v14, 0.0  ;;  %v950_v36 = vmul.f32 %v3718_v62, %v3817_v15  ;;  %v975_v27 = vmul.f32 %v3720_v63, %v3819_v29 }
 0x137   : > { %2541 = vmatmul.mubr.msk.f32.gmra.mxu0 %vm567_vm0, %v1113_v13  ;;  %v702_v33 = vmul.f32 %v3680_v42, %v3748_v24  ;;  %v1074_v34 = vadd.f32 %v1054_v35, %v994_v53  ;;  %v853_v45 = vadd.f32 %v783_v16, %v701_v12  ;;  %v873_v51 = vadd.f32 %v808_v37, %v726_v59 }
 0x138   : > { %v893_v40 = vadd.f32 %v833_v26, %v751_v44  ;;  %v727_v52 = vmul.f32 %v3692_v48, %v3750_v25  ;;  %v752_v58 = vmul.f32 %v3694_v49, %v3754_v30  ;;  %v784_v19 = vmul.f32 %v3696_v50, %v3788_v23  ;;  %v3869_v44 = vld [vmem:[#allocation2 + $0x60] sm:$0xff] }
 0x139   : > { %v809_v24 = vmul.f32 %v3706_v55, %v3793_v17  ;;  %v1114_v21 = vadd.f32 %v1074_v34, %v1034_v20  ;;  %v995_v39 = vadd.f32 %v925_v28, %v853_v45  ;;  %v1015_v18 = vadd.f32 %v950_v36, %v873_v51  ;;  %v3871_v26 = vld [vmem:[#allocation2 + $0x5f] sm:$0xff] }
 0x13a   : > { %v1035_v47 = vadd.f32 %v975_v27, %v893_v40  ;;  %v834_v53 = vmul.f32 %v3708_v56, %v3795_v32  ;;  %v854_v12 = vadd.f32 %v784_v19, %v702_v33  ;;  %v926_v25 = vmul.f32 %v3710_v57, %v3844_v41  ;;  %v3873_v28 = vld [vmem:[#allocation2 + $0x61] sm:$0xff] }
 0x13b   : > { %v874_v59 = vadd.f32 %v809_v24, %v727_v52  ;;  %2543 = vmatprep.mubr.msk.f32.mxu0 %vm567_vm0, %v1114_v21  ;;  %v1075_v30 = vadd.f32 %v1015_v18, %v995_v39  ;;  %v951_v14 = vmul.f32 %v3718_v62, %v3846_v46  ;;  %v976_v20 = vmul.f32 %v3720_v63, %v3848_v61  ;;  %v3896_v18 = vld [vmem:[#allocation2 + $0x68] sm:$0xff] }
 0x13c   : > { %v1095_v13 = vsel %vm630_vm2, %v1035_v47, 0.0  ;;  %v894_v16 = vadd.f32 %v834_v53, %v752_v58  ;;  %v996_v37 = vadd.f32 %v926_v25, %v854_v12  ;;  %v703_v35 = vmul.f32 %v3680_v42, %v3764_v60  ;;  %v3898_v47 = vld [vmem:[#allocation2 + $0x67] sm:$0xff] }
 0x13d   : > { %v728_v36 = vmul.f32 %v3692_v48, %v3770_v38  ;;  %v1115_v27 = vadd.f32 %v1095_v13, %v1075_v30  ;;  %v1016_v33 = vadd.f32 %v951_v14, %v874_v59  ;;  %v753_v34 = vmul.f32 %v3694_v49, %v3773_v54  ;;  %v3902_v59 = vld [vmem:[#allocation2 + $0x69] sm:$0xff] }
 0x13e   : > { %v785_v45 = vmul.f32 %v3696_v50, %v3813_v22  ;;  %v1036_v51 = vadd.f32 %v976_v20, %v894_v16  ;;  %v810_v40 = vmul.f32 %v3706_v55, %v3817_v15  ;;  %v835_v52 = vmul.f32 %v3708_v56, %v3819_v29 }
 0x13f   : > { %v927_v60 = vmul.f32 %v3710_v57, %v3869_v44  ;;  %2544 = vmatmul.mubr.msk.f32.gmra.mxu0 %vm567_vm0, %v1115_v27  ;;  %v1056_v38 = vsel %vm627_vm1, %v1016_v33, 0.0  ;;  %v952_v54 = vmul.f32 %v3718_v62, %v3871_v26  ;;  %v977_v19 = vmul.f32 %v3720_v63, %v3873_v28 }
 0x140   : > { %v855_v58 = vadd.f32 %v785_v45, %v703_v35  ;;  %v1076_v24 = vadd.f32 %v1056_v38, %v996_v37  ;;  %v875_v21 = vadd.f32 %v810_v40, %v728_v36  ;;  %v895_v39 = vadd.f32 %v835_v52, %v753_v34  ;;  %v3923_v45 = vld [vmem:[#allocation2 + $0x70] sm:$0xff] }
 0x141   : > { %v704_v53 = vmul.f32 %v3680_v42, %v3788_v23  ;;  %v729_v25 = vmul.f32 %v3692_v48, %v3793_v17  ;;  %v754_v30 = vmul.f32 %v3694_v49, %v3795_v32  ;;  %v786_v13 = vmul.f32 %v3696_v50, %v3844_v41  ;;  %v3925_v52 = vld [vmem:[#allocation2 + $0x6f] sm:$0xff] }
 0x142   : > { %v997_v12 = vadd.f32 %v927_v60, %v855_v58  ;;  %v1116_v14 = vadd.f32 %v1076_v24, %v1036_v51  ;;  %v1017_v20 = vadd.f32 %v952_v54, %v875_v21  ;;  %v1037_v16 = vadd.f32 %v977_v19, %v895_v39  ;;  %v3927_v60 = vld [vmem:[#allocation2 + $0x71] sm:$0xff] }
 0x143   : > { %v811_v37 = vmul.f32 %v3706_v55, %v3846_v46  ;;  %v836_v23 = vmul.f32 %v3708_v56, %v3848_v61  ;;  %v856_v35 = vadd.f32 %v786_v13, %v704_v53  ;;  %v928_v36 = vmul.f32 %v3710_v57, %v3896_v18 }
 0x144   : > { %v953_v17 = vmul.f32 %v3718_v62, %v3898_v47  ;;  %2546 = vmatprep.mubr.msk.f32.mxu0 %vm567_vm0, %v1116_v14  ;;  %v1077_v32 = vadd.f32 %v1017_v20, %v997_v12  ;;  %v1097_v27 = vsel %vm630_vm2, %v1037_v16, 0.0  ;;  %v978_v34 = vmul.f32 %v3720_v63, %v3902_v59  ;;  %v3950_v16 = vld [vmem:[#allocation2 + $0x78] sm:$0xff] }
 0x145   : > { %v876_v33 = vadd.f32 %v811_v37, %v729_v25  ;;  %v896_v51 = vadd.f32 %v836_v23, %v754_v30  ;;  %v998_v40 = vadd.f32 %v928_v36, %v856_v35  ;;  %v705_v38 = vmul.f32 %v3680_v42, %v3813_v22  ;;  %v3952_v37 = vld [vmem:[#allocation2 + $0x77] sm:$0xff] }
 0x146   : > { %v730_v58 = vmul.f32 %v3692_v48, %v3817_v15  ;;  %v1117_v54 = vadd.f32 %v1097_v27, %v1077_v32  ;;  %v755_v24 = vmul.f32 %v3694_v49, %v3819_v29  ;;  %v787_v21 = vmul.f32 %v3696_v50, %v3869_v44  ;;  %v3956_v36 = vld [vmem:[#allocation2 + $0x79] sm:$0xff] }
 0x147   : > { %v1018_v19 = vadd.f32 %v953_v17, %v876_v33  ;;  %v1038_v39 = vadd.f32 %v978_v34, %v896_v51  ;;  %v812_v53 = vmul.f32 %v3706_v55, %v3871_v26  ;;  %v837_v12 = vmul.f32 %v3708_v56, %v3873_v28 }
 0x148   : > { %v929_v22 = vmul.f32 %v3710_v57, %v3923_v45  ;;  %2547 = vmatmul.mubr.msk.f32.gmra.mxu0 %vm567_vm0, %v1117_v54  ;;  %v857_v25 = vadd.f32 %v787_v21, %v705_v38  ;;  %v954_v29 = vmul.f32 %v3718_v62, %v3925_v52  ;;  %v979_v30 = vmul.f32 %v3720_v63, %v3927_v60  ;;  %v3977_v21 = vld [vmem:[#allocation2 + $0x80] sm:$0xff] }
 0x149   : > { %v1058_v15 = vsel %vm627_vm1, %v1018_v19, 0.0  ;;  %v877_v14 = vadd.f32 %v812_v53, %v730_v58  ;;  %v897_v20 = vadd.f32 %v837_v12, %v755_v24  ;;  %v706_v23 = vmul.f32 %v3680_v42, %v3844_v41  ;;  %v3979_v12 = vld [vmem:[#allocation2 + $0x7f] sm:$0xff] }
 0x14a   : > { %v1078_v13 = vadd.f32 %v1058_v15, %v998_v40  ;;  %v999_v35 = vadd.f32 %v929_v22, %v857_v25  ;;  %v731_v17 = vmul.f32 %v3692_v48, %v3846_v46  ;;  %v756_v32 = vmul.f32 %v3694_v49, %v3848_v61  ;;  %v3981_v22 = vld [vmem:[#allocation2 + $0x81] sm:$0xff] }
 0x14b   : > { %v788_v27 = vmul.f32 %v3696_v50, %v3896_v18  ;;  %v1019_v34 = vadd.f32 %v954_v29, %v877_v14  ;;  %v1039_v51 = vadd.f32 %v979_v30, %v897_v20  ;;  %v813_v40 = vmul.f32 %v3706_v55, %v3898_v47 }
 0x14c   : > { %v1118_v33 = vadd.f32 %v1078_v13, %v1038_v39  ;;  %v838_v41 = vmul.f32 %v3708_v56, %v3902_v59  ;;  %v930_v58 = vmul.f32 %v3710_v57, %v3950_v16  ;;  %v955_v46 = vmul.f32 %v3718_v62, %v3952_v37 }
 0x14d   : > { %v858_v38 = vadd.f32 %v788_v27, %v706_v23  ;;  %v1079_v61 = vadd.f32 %v1019_v34, %v999_v35  ;;  %v1099_v54 = vsel %vm630_vm2, %v1039_v51, 0.0  ;;  %v878_v19 = vadd.f32 %v813_v40, %v731_v17  ;;  %v4004_v51 = vld [vmem:[#allocation2 + $0x88] sm:$0xff] }
 0x14e   : > { %2549 = vmatprep.mubr.msk.f32.mxu0 %vm567_vm0, %v1118_v33  ;;  %v980_v24 = vmul.f32 %v3720_v63, %v3956_v36  ;;  %v898_v39 = vadd.f32 %v838_v41, %v756_v32  ;;  %v707_v15 = vmul.f32 %v3680_v42, %v3869_v44  ;;  %v732_v25 = vmul.f32 %v3692_v48, %v3871_v26  ;;  %v4006_v40 = vld [vmem:[#allocation2 + $0x87] sm:$0xff] }
 0x14f   : > { %v1000_v53 = vadd.f32 %v930_v58, %v858_v38  ;;  %v1119_v29 = vadd.f32 %v1099_v54, %v1079_v61  ;;  %v1020_v30 = vadd.f32 %v955_v46, %v878_v19  ;;  %v757_v13 = vmul.f32 %v3694_v49, %v3873_v28  ;;  %v4010_v58 = vld [vmem:[#allocation2 + $0x89] sm:$0xff] }
 0x150   : > { %v789_v14 = vmul.f32 %v3696_v50, %v3923_v45  ;;  %v1040_v20 = vadd.f32 %v980_v24, %v898_v39  ;;  %v814_v23 = vmul.f32 %v3706_v55, %v3925_v52  ;;  %v839_v35 = vmul.f32 %v3708_v56, %v3927_v60 }
 0x151   : > { %v931_v44 = vmul.f32 %v3710_v57, %v3977_v21  ;;  %2550 = vmatmul.mubr.msk.f32.gmra.mxu0 %vm567_vm0, %v1119_v29  ;;  %v1060_v26 = vsel %vm627_vm1, %v1020_v30, 0.0  ;;  %v956_v28 = vmul.f32 %v3718_v62, %v3979_v12  ;;  %v981_v32 = vmul.f32 %v3720_v63, %v3981_v22 }
 0x152   : > { %v859_v17 = vadd.f32 %v789_v14, %v707_v15  ;;  %v1080_v27 = vadd.f32 %v1060_v26, %v1000_v53  ;;  %v879_v33 = vadd.f32 %v814_v23, %v732_v25  ;;  %v899_v34 = vadd.f32 %v839_v35, %v757_v13  ;;  %v4031_v14 = vld [vmem:[#allocation2 + $0x90] sm:$0xff] }
 0x153   : > { %v708_v41 = vmul.f32 %v3680_v42, %v3896_v18  ;;  %v733_v46 = vmul.f32 %v3692_v48, %v3898_v47  ;;  %v758_v61 = vmul.f32 %v3694_v49, %v3902_v59  ;;  %v790_v54 = vmul.f32 %v3696_v50, %v3950_v16  ;;  %v4033_v35 = vld [vmem:[#allocation2 + $0x8f] sm:$0xff] }
 0x154   : > { %v1001_v38 = vadd.f32 %v931_v44, %v859_v17  ;;  %v1120_v19 = vadd.f32 %v1080_v27, %v1040_v20  ;;  %v1021_v24 = vadd.f32 %v956_v28, %v879_v33  ;;  %v1041_v39 = vadd.f32 %v981_v32, %v899_v34  ;;  %v4035_v44 = vld [vmem:[#allocation2 + $0x91] sm:$0xff] }
 0x155   : > { %v815_v53 = vmul.f32 %v3706_v55, %v3952_v37  ;;  %v840_v18 = vmul.f32 %v3708_v56, %v3956_v36  ;;  %v860_v15 = vadd.f32 %v790_v54, %v708_v41  ;;  %v932_v25 = vmul.f32 %v3710_v57, %v4004_v51 }
 0x156   : > { %v957_v47 = vmul.f32 %v3718_v62, %v4006_v40  ;;  %2552 = vmatprep.mubr.msk.f32.mxu0 %vm567_vm0, %v1120_v19  ;;  %v1081_v59 = vadd.f32 %v1021_v24, %v1001_v38  ;;  %v1101_v29 = vsel %vm630_vm2, %v1041_v39, 0.0  ;;  %v982_v13 = vmul.f32 %v3720_v63, %v4010_v58  ;;  %v4058_v39 = vld [vmem:[#allocation2 + $0x98] sm:$0xff] }
 0x157   : > { %v880_v30 = vadd.f32 %v815_v53, %v733_v46  ;;  %v900_v20 = vadd.f32 %v840_v18, %v758_v61  ;;  %v1002_v23 = vadd.f32 %v932_v25, %v860_v15  ;;  %v709_v26 = vmul.f32 %v3680_v42, %v3923_v45  ;;  %v4060_v53 = vld [vmem:[#allocation2 + $0x97] sm:$0xff] }
 0x158   : > { %v734_v17 = vmul.f32 %v3692_v48, %v3925_v52  ;;  %v1121_v28 = vadd.f32 %v1101_v29, %v1081_v59  ;;  %v759_v27 = vmul.f32 %v3694_v49, %v3927_v60  ;;  %v791_v33 = vmul.f32 %v3696_v50, %v3977_v21  ;;  %v4064_v25 = vld [vmem:[#allocation2 + $0x99] sm:$0xff] }
 0x159   : > { %v1022_v32 = vadd.f32 %v957_v47, %v880_v30  ;;  %v1042_v34 = vadd.f32 %v982_v13, %v900_v20  ;;  %v816_v41 = vmul.f32 %v3706_v55, %v3979_v12  ;;  %v841_v38 = vmul.f32 %v3708_v56, %v3981_v22 }
 0x15a   : > { %v933_v45 = vmul.f32 %v3710_v57, %v4031_v14  ;;  %2553 = vmatmul.mubr.msk.f32.gmra.mxu0 %vm567_vm0, %v1121_v28  ;;  %v861_v46 = vadd.f32 %v791_v33, %v709_v26  ;;  %v958_v60 = vmul.f32 %v3718_v62, %v4033_v35  ;;  %v983_v61 = vmul.f32 %v3720_v63, %v4035_v44  ;;  %v4085_v33 = vld [vmem:[#allocation2 + $0xa0] sm:$0xff] }
 0x15b   : > { %v1062_v52 = vsel %vm627_vm1, %v1022_v32, 0.0  ;;  %v881_v19 = vadd.f32 %v816_v41, %v734_v17  ;;  %v901_v24 = vadd.f32 %v841_v38, %v759_v27  ;;  %v710_v18 = vmul.f32 %v3680_v42, %v3950_v16  ;;  %v4087_v38 = vld [vmem:[#allocation2 + $0x9f] sm:$0xff] }
 0x15c   : > { %v1082_v54 = vadd.f32 %v1062_v52, %v1002_v23  ;;  %v1003_v15 = vadd.f32 %v933_v45, %v861_v46  ;;  %v735_v47 = vmul.f32 %v3692_v48, %v3952_v37  ;;  %v760_v59 = vmul.f32 %v3694_v49, %v3956_v36  ;;  %v4089_v45 = vld [vmem:[#allocation2 + $0xa1] sm:$0xff] }
 0x15d   : > { %v792_v29 = vmul.f32 %v3696_v50, %v4004_v51  ;;  %v1023_v13 = vadd.f32 %v958_v60, %v881_v19  ;;  %v1043_v20 = vadd.f32 %v983_v61, %v901_v24  ;;  %v817_v23 = vmul.f32 %v3706_v55, %v4006_v40 }
 0x15e   : > { %v1122_v30 = vadd.f32 %v1082_v54, %v1042_v34  ;;  %v842_v16 = vmul.f32 %v3708_v56, %v4010_v58  ;;  %v934_v17 = vmul.f32 %v3710_v57, %v4058_v39  ;;  %v959_v37 = vmul.f32 %v3718_v62, %v4060_v53 }
 0x15f   : > { %v862_v26 = vadd.f32 %v792_v29, %v710_v18  ;;  %v1083_v36 = vadd.f32 %v1023_v13, %v1003_v15  ;;  %v1103_v28 = vsel %vm630_vm2, %v1043_v20, 0.0  ;;  %v882_v32 = vadd.f32 %v817_v23, %v735_v47  ;;  %v766_v23 = vld [vmem:[#allocation2 + $0xa8] sm:$0xff] }
 0x160   : > { %2555 = vmatprep.mubr.msk.f32.mxu0 %vm567_vm0, %v1122_v30  ;;  %v984_v27 = vmul.f32 %v3720_v63, %v4064_v25  ;;  %v902_v34 = vadd.f32 %v842_v16, %v760_v59  ;;  %v711_v52 = vmul.f32 %v3680_v42, %v3977_v21  ;;  %v736_v46 = vmul.f32 %v3692_v48, %v3979_v12  ;;  %v768_v16 = vld [vmem:[#allocation2 + $0xa7] sm:$0xff] }
 0x161   : > { %v1004_v41 = vadd.f32 %v934_v17, %v862_v26  ;;  %v1123_v60 = vadd.f32 %v1103_v28, %v1083_v36  ;;  %v1024_v61 = vadd.f32 %v959_v37, %v882_v32  ;;  %v761_v54 = vmul.f32 %v3694_v49, %v3981_v22  ;;  %v770_v36 = vld [vmem:[#allocation2 + $0xa9] sm:$0xff] }
 0x162   : > { %v793_v19 = vmul.f32 %v3696_v50, %v4031_v14  ;;  %v1044_v24 = vadd.f32 %v984_v27, %v902_v34  ;;  %v818_v18 = vmul.f32 %v3706_v55, %v4033_v35  ;;  %v843_v15 = vmul.f32 %v3708_v56, %v4035_v44 }
 0x163   : > { %v935_v21 = vmul.f32 %v3710_v57, %v4085_v33  ;;  %2556 = vmatmul.mubr.msk.f32.gmra.mxu0 %vm567_vm0, %v1123_v60  ;;  %v1064_v12 = vsel %vm627_vm1, %v1024_v61, 0.0  ;;  %v960_v22 = vmul.f32 %v3718_v62, %v4087_v38  ;;  %v985_v59 = vmul.f32 %v3720_v63, %v4089_v45 }
 0x164   : > { %v863_v47 = vadd.f32 %v793_v19, %v711_v52  ;;  %v1084_v29 = vadd.f32 %v1064_v12, %v1004_v41  ;;  %v883_v30 = vadd.f32 %v818_v18, %v736_v46  ;;  %v903_v13 = vadd.f32 %v843_v15, %v761_v54  ;;  %v767_v19 = vld [vmem:[#allocation2 + $0xb0] sm:$0xff] }
 0x165   : > { %v712_v20 = vmul.f32 %v3680_v42, %v4004_v51  ;;  %v737_v17 = vmul.f32 %v3692_v48, %v4006_v40  ;;  %v762_v37 = vmul.f32 %v3694_v49, %v4010_v58  ;;  %v794_v28 = vmul.f32 %v3696_v50, %v4058_v39  ;;  %v769_v12 = vld [vmem:[#allocation2 + $0xaf] sm:$0xff] }
 0x166   : > { %v1005_v26 = vadd.f32 %v935_v21, %v863_v47  ;;  %v1124_v32 = vadd.f32 %v1084_v29, %v1044_v24  ;;  %v1025_v27 = vadd.f32 %v960_v22, %v883_v30  ;;  %v1045_v34 = vadd.f32 %v985_v59, %v903_v13  ;;  %v771_v47 = vld [vmem:[#allocation2 + $0xb1] sm:$0xff] }
 0x167   : > { %v819_v41 = vmul.f32 %v3706_v55, %v4060_v53  ;;  %v844_v51 = vmul.f32 %v3708_v56, %v4064_v25  ;;  %v864_v52 = vadd.f32 %v794_v28, %v712_v20  ;;  %v936_v46 = vmul.f32 %v3710_v57, %v766_v23 }
 0x168   : > { %v961_v40 = vmul.f32 %v3718_v62, %v768_v16  ;;  %2558 = vmatprep.mubr.msk.f32.mxu0 %vm567_vm0, %v1124_v32  ;;  %v1085_v58 = vadd.f32 %v1025_v27, %v1005_v26  ;;  %v1105_v60 = vsel %vm630_vm2, %v1045_v34, 0.0  ;;  %v986_v54 = vmul.f32 %v3720_v63, %v770_v36 }
 0x169   : > { %v884_v61 = vadd.f32 %v819_v41, %v737_v17  ;;  %v904_v24 = vadd.f32 %v844_v51, %v762_v37  ;;  %v1006_v18 = vadd.f32 %v936_v46, %v864_v52  ;;  %v713_v15 = vmul.f32 %v3680_v42, %v4031_v14  ;;  %v908_v41 = vld [vmem:[#allocation2 + $0xb8] sm:$0xff] }
 0x16a   : > { %v738_v21 = vmul.f32 %v3692_v48, %v4033_v35  ;;  %v1125_v22 = vadd.f32 %v1105_v60, %v1085_v58  ;;  %v763_v29 = vmul.f32 %v3694_v49, %v4035_v44  ;;  %v795_v30 = vmul.f32 %v3696_v50, %v4085_v33  ;;  %v910_v51 = vld [vmem:[#allocation2 + $0xb7] sm:$0xff] }
 0x16b   : > { %v1026_v59 = vadd.f32 %v961_v40, %v884_v61  ;;  %v1046_v13 = vadd.f32 %v986_v54, %v904_v24  ;;  %v820_v20 = vmul.f32 %v3706_v55, %v4087_v38  ;;  %v845_v14 = vmul.f32 %v3708_v56, %v4089_v45  ;;  %v912_v60 = vld [vmem:[#allocation2 + $0xb9] sm:$0xff] }
 0x16c   : > { %v937_v26 = vmul.f32 %v3710_v57, %v767_v19  ;;  %2559 = vmatmul.mubr.msk.f32.gmra.mxu0 %vm567_vm0, %v1125_v22  ;;  %v865_v17 = vadd.f32 %v795_v30, %v713_v15  ;;  %v962_v44 = vmul.f32 %v3718_v62, %v769_v12  ;;  %v987_v37 = vmul.f32 %v3720_v63, %v771_v47 }
 0x16d   : > { %v1066_v35 = vsel %vm627_vm1, %v1026_v59, 0.0  ;;  %v885_v32 = vadd.f32 %v820_v20, %v738_v21  ;;  %v905_v27 = vadd.f32 %v845_v14, %v763_v29  ;;  %v714_v34 = vmul.f32 %v3680_v42, %v4058_v39  ;;  %v909_v29 = vld [vmem:[#allocation2 + $0xc0] sm:$0xff] }
 0x16e   : > { %v1086_v28 = vadd.f32 %v1066_v35, %v1006_v18  ;;  %v1007_v52 = vadd.f32 %v937_v26, %v865_v17  ;;  %v739_v46 = vmul.f32 %v3692_v48, %v4060_v53  ;;  %v764_v40 = vmul.f32 %v3694_v49, %v4064_v25  ;;  %v911_v20 = vld [vmem:[#allocation2 + $0xbf] sm:$0xff] }
 0x16f   : > { %v796_v58 = vmul.f32 %v3696_v50, %v766_v23  ;;  %v1027_v54 = vadd.f32 %v962_v44, %v885_v32  ;;  %v1047_v24 = vadd.f32 %v987_v37, %v905_v27  ;;  %v821_v18 = vmul.f32 %v3706_v55, %v768_v16  ;;  %v913_v14 = vld [vmem:[#allocation2 + $0xc1] sm:$0xff] }
 0x170   : > { %v1126_v61 = vadd.f32 %v1086_v28, %v1046_v13  ;;  %v846_v15 = vmul.f32 %v3708_v56, %v770_v36  ;;  %v938_v21 = vmul.f32 %v3710_v57, %v908_v41  ;;  %v963_v22 = vmul.f32 %v3718_v62, %v910_v51 }
 0x171   : > { %v866_v39 = vadd.f32 %v796_v58, %v714_v34  ;;  %v1087_v53 = vadd.f32 %v1027_v54, %v1007_v52  ;;  %v1107_v25 = vsel %vm630_vm2, %v1047_v24, 0.0  ;;  %v886_v23 = vadd.f32 %v821_v18, %v739_v46 }
 0x172   : > { %2561 = vmatprep.mubr.msk.f32.mxu0 %vm567_vm0, %v1126_v61  ;;  %v988_v59 = vmul.f32 %v3720_v63, %v912_v60  ;;  %v906_v30 = vadd.f32 %v846_v15, %v764_v40  ;;  %v715_v16 = vmul.f32 %v3680_v42, %v4085_v33  ;;  %v740_v36 = vmul.f32 %v3692_v48, %v4087_v38 }
 0x173   : > { %v1008_v13 = vadd.f32 %v938_v21, %v866_v39  ;;  %v1127_v26 = vadd.f32 %v1107_v25, %v1087_v53  ;;  %v1028_v35 = vadd.f32 %v963_v22, %v886_v23  ;;  %v765_v17 = vmul.f32 %v3694_v49, %v4089_v45 }
 0x174   : > { %v797_v44 = vmul.f32 %v3696_v50, %v767_v19  ;;  %v1048_v37 = vadd.f32 %v988_v59, %v906_v30  ;;  %v822_v28 = vmul.f32 %v3706_v55, %v769_v12  ;;  %v847_v32 = vmul.f32 %v3708_v56, %v771_v47 }
 0x175   : > { %v939_v27 = vmul.f32 %v3710_v57, %v909_v29  ;;  %2562 = vmatmul.mubr.msk.f32.gmra.mxu0 %vm567_vm0, %v1127_v26  ;;  %v1068_v42 = vsel %vm627_vm1, %v1028_v35, 0.0  ;;  %v964_v33 = vmul.f32 %v3718_v62, %v911_v20  ;;  %v989_v38 = vmul.f32 %v3720_v63, %v913_v14  ;;  %v4185_v62 = vld [vmem:[%s4892_s30] ss:$0 sm:$0xff] }
 0x176   : > { %v867_v48 = vadd.f32 %v797_v44, %v715_v16  ;;  %v1088_v49 = vadd.f32 %v1068_v42, %v1008_v13  ;;  %v887_v45 = vadd.f32 %v822_v28, %v740_v36  ;;  %v907_v50 = vadd.f32 %v847_v32, %v765_v17 }
 0x178   : > { %v1009_v19 = vadd.f32 %v939_v27, %v867_v48  ;;  %v1128_v34 = vadd.f32 %v1088_v49, %v1048_v37  ;;  %v1029_v55 = vadd.f32 %v964_v33, %v887_v45  ;;  %v1049_v12 = vadd.f32 %v989_v38, %v907_v50 }
 0x17a   : > { %2564 = vmatprep.mubr.msk.f32.mxu0 %vm567_vm0, %v1128_v34  ;;  %v1089_v56 = vadd.f32 %v1029_v55, %v1009_v19  ;;  %v1109_v57 = vsel %vm630_vm2, %v1049_v12, 0.0 }
 0x17c   : > { %v1129_v47 = vadd.f32 %v1109_v57, %v1089_v56 }
 0x17e   : > { %2565 = vmatmul.mubr.msk.f32.gmra.mxu0 %vm567_vm0, %v1129_v47 }
 0x1ef   : > { %v2539_v63 = vpop.f32.mrf.mxu0 }
 0x1f0   : > { %v1277_v41 = vadd.f32 %v2539_v63, %v4185_v62 }
 0x1f1   : > { %v1271_v51 = vpop.f32.mrf.mxu0 }
 0x1f2   : > { %v1371_v52 = vmax.f32 %v1277_v41, 0.0  ;;  %v1272_v46 = vadd.f32 %v4185_v62, %v1271_v51 }
 0x1f4   : > { %v1391_v40 = vmin.f32 %v1371_v52, 6.0  ;;  %v1370_v58 = vmax.f32 %v1272_v46, 0.0 }
 0x1f6   : > { %1411 = vst.msk [vmem:[#allocation3 + $0x10] sm:$0xff] %vm567_vm0, %v1391_v40  ;;  %v1390_v60 = vmin.f32 %v1370_v58, 6.0 }
 0x1f7   : > { %v2542_v61 = vpop.f32.mrf.mxu0 }
 0x1f8   : > { %v1287_v54 = vadd.f32 %v2542_v61, %v4185_v62  ;;  %1410 = vst.msk [vmem:[#allocation3 + $0x8] sm:$0xff] %vm567_vm0, %v1390_v60 }
 0x1f9   : > { %v1281_v24 = vpop.f32.mrf.mxu0 }
 0x1fa   : > { %v1373_v18 = vmax.f32 %v1287_v54, 0.0  ;;  %v1282_v15 = vadd.f32 %v4185_v62, %v1281_v24 }
 0x1fc   : > { %v1393_v39 = vmin.f32 %v1373_v18, 6.0  ;;  %v1372_v21 = vmax.f32 %v1282_v15, 0.0 }
 0x1fe   : > { %1413 = vst.msk [vmem:[#allocation3 + $0x20] sm:$0xff] %vm567_vm0, %v1393_v39  ;;  %v1392_v22 = vmin.f32 %v1372_v21, 6.0 }
 0x1ff   : > { %v2545_v53 = vpop.f32.mrf.mxu0 }
 0x200   : > { %1412 = vst.msk [vmem:[#allocation3 + $0x18] sm:$0xff] %vm567_vm0, %v1392_v22  ;;  %v1297_v25 = vadd.f32 %v2545_v53, %v4185_v62 }
 0x201   : > { %v1291_v23 = vpop.f32.mrf.mxu0 }
 0x202   : > { %v1375_v59 = vmax.f32 %v1297_v25, 0.0  ;;  %v1292_v29 = vadd.f32 %v4185_v62, %v1291_v23 }
 0x204   : > { %v1395_v30 = vmin.f32 %v1375_v59, 6.0  ;;  %v1374_v13 = vmax.f32 %v1292_v29, 0.0 }
 0x206   : > { %1415 = vst.msk [vmem:[#allocation3 + $0x30] sm:$0xff] %vm567_vm0, %v1395_v30  ;;  %v1394_v16 = vmin.f32 %v1374_v13, 6.0 }
 0x208   : > { %1414 = vst.msk [vmem:[#allocation3 + $0x28] sm:$0xff] %vm567_vm0, %v1394_v16  ;;  %v2548_v36 = vpop.f32.mrf.mxu0 }
 0x209   : > { %v1307_v20 = vadd.f32 %v2548_v36, %v4185_v62 }
 0x20a   : > { %v1301_v14 = vpop.f32.mrf.mxu0 }
 0x20b   : > { %v1377_v26 = vmax.f32 %v1307_v20, 0.0  ;;  %v1302_v35 = vadd.f32 %v4185_v62, %v1301_v14 }
 0x20d   : > { %v1397_v17 = vmin.f32 %v1377_v26, 6.0  ;;  %v1376_v44 = vmax.f32 %v1302_v35, 0.0 }
 0x20f   : > { %1417 = vst.msk [vmem:[#allocation3 + $0x40] sm:$0xff] %vm567_vm0, %v1397_v17  ;;  %v1396_v37 = vmin.f32 %v1376_v44, 6.0 }
 0x211   : > { %1416 = vst.msk [vmem:[#allocation3 + $0x38] sm:$0xff] %vm567_vm0, %v1396_v37  ;;  %v2551_v28 = vpop.f32.mrf.mxu0 }
 0x212   : > { %v1317_v32 = vadd.f32 %v2551_v28, %v4185_v62 }
 0x213   : > { %v1311_v27 = vpop.f32.mrf.mxu0 }
 0x214   : > { %v1379_v42 = vmax.f32 %v1317_v32, 0.0  ;;  %v1312_v48 = vadd.f32 %v4185_v62, %v1311_v27 }
 0x216   : > { %v1399_v33 = vmin.f32 %v1379_v42, 6.0  ;;  %v1378_v38 = vmax.f32 %v1312_v48, 0.0 }
 0x218   : > { %1419 = vst.msk [vmem:[#allocation3 + $0x50] sm:$0xff] %vm567_vm0, %v1399_v33  ;;  %v1398_v49 = vmin.f32 %v1378_v38, 6.0 }
 0x21a   : > { %1418 = vst.msk [vmem:[#allocation3 + $0x48] sm:$0xff] %vm567_vm0, %v1398_v49  ;;  %v2554_v45 = vpop.f32.mrf.mxu0 }
 0x21b   : > { %v1327_v50 = vadd.f32 %v2554_v45, %v4185_v62 }
 0x21c   : > { %v1321_v19 = vpop.f32.mrf.mxu0 }
 0x21d   : > { %v1381_v34 = vmax.f32 %v1327_v50, 0.0  ;;  %v1322_v55 = vadd.f32 %v4185_v62, %v1321_v19 }
 0x21f   : > { %v1401_v12 = vmin.f32 %v1381_v34, 6.0  ;;  %v1380_v56 = vmax.f32 %v1322_v55, 0.0 }
 0x221   : > { %1421 = vst.msk [vmem:[#allocation3 + $0x60] sm:$0xff] %vm567_vm0, %v1401_v12  ;;  %v1400_v57 = vmin.f32 %v1380_v56, 6.0 }
 0x223   : > { %1420 = vst.msk [vmem:[#allocation3 + $0x58] sm:$0xff] %vm567_vm0, %v1400_v57  ;;  %v2557_v47 = vpop.f32.mrf.mxu0 }
 0x224   : > { %v1337_v63 = vadd.f32 %v2557_v47, %v4185_v62 }
 0x225   : > { %v1331_v41 = vpop.f32.mrf.mxu0 }
 0x226   : > { %v1383_v51 = vmax.f32 %v1337_v63, 0.0  ;;  %v1332_v52 = vadd.f32 %v4185_v62, %v1331_v41 }
 0x228   : > { %v1403_v46 = vmin.f32 %v1383_v51, 6.0  ;;  %v1382_v40 = vmax.f32 %v1332_v52, 0.0 }
 0x22a   : > { %1423 = vst.msk [vmem:[#allocation3 + $0x70] sm:$0xff] %vm567_vm0, %v1403_v46  ;;  %v1402_v58 = vmin.f32 %v1382_v40, 6.0 }
 0x22c   : > { %1422 = vst.msk [vmem:[#allocation3 + $0x68] sm:$0xff] %vm567_vm0, %v1402_v58  ;;  %v2560_v60 = vpop.f32.mrf.mxu0 }
 0x22d   : > { %v1347_v61 = vadd.f32 %v2560_v60, %v4185_v62 }
 0x22e   : > { %v1341_v54 = vpop.f32.mrf.mxu0 }
 0x22f   : > { %v1385_v24 = vmax.f32 %v1347_v61, 0.0  ;;  %v1342_v18 = vadd.f32 %v4185_v62, %v1341_v54 }
 0x231   : > { %v1405_v15 = vmin.f32 %v1385_v24, 6.0  ;;  %v1384_v39 = vmax.f32 %v1342_v18, 0.0 }
 0x233   : > { %1425 = vst.msk [vmem:[#allocation3 + $0x80] sm:$0xff] %vm567_vm0, %v1405_v15  ;;  %v1404_v21 = vmin.f32 %v1384_v39, 6.0 }
 0x235   : > { %1424 = vst.msk [vmem:[#allocation3 + $0x78] sm:$0xff] %vm567_vm0, %v1404_v21  ;;  %v2563_v22 = vpop.f32.mrf.mxu0 }
 0x236   : > { %v1357_v53 = vadd.f32 %v2563_v22, %v4185_v62 }
 0x237   : > { %v1351_v25 = vpop.f32.mrf.mxu0 }
 0x238   : > { %v1387_v23 = vmax.f32 %v1357_v53, 0.0  ;;  %v1352_v59 = vadd.f32 %v4185_v62, %v1351_v25 }
 0x23a   : > { %v1407_v29 = vmin.f32 %v1387_v23, 6.0  ;;  %v1386_v30 = vmax.f32 %v1352_v59, 0.0 }
 0x23c   : > { %1427 = vst.msk [vmem:[#allocation3 + $0x90] sm:$0xff] %vm567_vm0, %v1407_v29  ;;  %v1406_v13 = vmin.f32 %v1386_v30, 6.0 }
 0x23e   : > { %1426 = vst.msk [vmem:[#allocation3 + $0x88] sm:$0xff] %vm567_vm0, %v1406_v13  ;;  %v2566_v16 = vpop.f32.mrf.mxu0 }
 0x23f   : > { %v1367_v36 = vadd.f32 %v2566_v16, %v4185_v62 }
 0x240   : > { %v1361_v20 = vpop.f32.mrf.mxu0 }
 0x241   : > { %v1389_v14 = vmax.f32 %v1367_v36, 0.0  ;;  %v1362_v26 = vadd.f32 %v4185_v62, %v1361_v20 }
 0x243   : > { %v1409_v35 = vmin.f32 %v1389_v14, 6.0  ;;  %v1388_v17 = vmax.f32 %v1362_v26, 0.0  ;;  %1432 = sbr.rel (%p2390_p9) target bundleno = 586 (0x24a), region = 104 }
 0x245   : > { %1429 = vst.msk [vmem:[#allocation3 + $0xa0] sm:$0xff] %vm567_vm0, %v1409_v35  ;;  %v1408_v44 = vmin.f32 %v1388_v17, 6.0 }
 0x247   : > { %1428 = vst.msk [vmem:[#allocation3 + $0x98] sm:$0xff] %vm567_vm0, %v1408_v44 }
 0x248   : > { %v3157_v37 = vmov 0.0  }
 0x249   : > { %1433 = vst.msk [vmem:[#allocation3 + $0x8] sm:$0xff] %vm567_vm0, %v3157_v37  ;;  %1434 = vst.msk [vmem:[#allocation3 + $0x10] sm:$0xff] %vm567_vm0, %v3157_v37 }
 0x24a PF: > { %1437 = sbr.rel (%p2392_p0) target bundleno = 593 (0x251), region = 108 }
 0x24f   : > { %v3158_v62 = vmov 0.0  }
 0x250   : > { %1438 = vst.msk [vmem:[#allocation3 + $0x98] sm:$0xff] %vm567_vm0, %v3158_v62  ;;  %1439 = vst.msk [vmem:[#allocation3 + $0xa0] sm:$0xff] %vm567_vm0, %v3158_v62 }
 0x251 PF: > { %v1858_v28 = vld [vmem:[#allocation15 + $0x38] sm:$0xff]  ;;  %v1857_v32 = vld [vmem:[#allocation15 + $0x30] sm:$0xff]  ;;  %v1856_v27 = vld [vmem:[#allocation15 + $0x28] sm:$0xff]  ;;  %s4895_s13 = sld [smem:[#allocation50_spill]]  ;;  %s2172_s26 = sshll.u32 %s3643_s23, 4  ;;  %s4695_s26 = int_to_ptr.vmem [resolvable:$true] %s2172_s26 }
 0x252   : > { %2567 = vmatprep.subr.mxu1 %v1858_v28  ;;  %v1855_v42 = vld [vmem:[#allocation15 + $0x20] sm:$0xff]  ;;  %v1442_v33 = vld [vmem:[#allocation3 + $0x18] sm:$0xff]  ;;  %v1854_v45 = vld [vmem:[#allocation15 + $0x18] sm:$0xff]  ;;  %s4896_s10 = sld [smem:[#allocation27_spill]]  ;;  %s2156_s12 = scalar_lea.sflag [#allocation6], %s3526_s8 }
 0x253   : > { %2568 = vmatpush3.msra.mxu1 %v1858_v28  ;;  %v1440_v48 = vld [vmem:[#allocation3 + $0x8] sm:$0xff]  ;;  %v1458_v50 = vld [vmem:[#allocation3 + $0x17] sm:$0xff]  ;;  %v4248_v46 = vld [vmem:[#allocation13 + $0x5] ss:$0 sm:$0xff]  ;;  %s4897_s25 = sld [smem:[#allocation28_spill]]  ;;  %s2982_s1 = scalar_lea.vmem %s4695_s26, 2048 }
 0x254   : > { %2569 = vmatprep.subr.mxu1 %v1857_v32  ;;  %v1444_v38 = vld [vmem:[#allocation3 + $0x28] sm:$0xff]  ;;  %v1474_v55 = vld [vmem:[#allocation3 + $0x19] sm:$0xff]  ;;  %v4258_v24 = vld [vmem:[#allocation13 + $0x6] ss:$0 sm:$0xff]  ;;  %v1563_v21 = vmul.f32 %v4248_v46, %v1442_v33  ;;  %s4902_s9 = sld [smem:[#allocation51_spill]]  ;;  %p2983_p7 = scmp.ne.s32.totalorder %s4695_s26, %s2982_s1 }
 0x255   : > { %v1456_v49 = vld [vmem:[#allocation3 + $0x7] sm:$0xff]  ;;  %2570 = vmatpush3.msra.mxu1 %v1857_v32  ;;  %v4235_v56 = vld [vmem:[#allocation13 + $0x1] ss:$0 sm:$0xff]  ;;  %v4244_v51 = vld [vmem:[#allocation13] ss:$0 sm:$0xff]  ;;  %v1565_v22 = vmul.f32 %v4248_v46, %v1444_v38  ;;  %v1605_v13 = vmul.f32 %v4258_v24, %v1474_v55  ;;  %p4903_p12 = scmp.ne.s32.totalorder %s4854_s3, 0 }
 0x256   : > { %v1460_v19 = vld [vmem:[#allocation3 + $0x27] sm:$0xff]  ;;  %2571 = vmatprep.subr.mxu1 %v1856_v27  ;;  %v1853_v57 = vld [vmem:[#allocation15 + $0x10] sm:$0xff]  ;;  %v1493_v47 = vmul.f32 %v4235_v56, %v1440_v48  ;;  %v4239_v63 = vmul.f32 %v4235_v56, %v1442_v33  ;;  %v4242_v41 = vmul.f32 %v4235_v56, %v1444_v38  ;;  %v1514_v40 = vmul.f32 %v4244_v51, %v1456_v49  ;;  %v4256_v54 = vld [vmem:[#allocation13 + $0x4] ss:$0 sm:$0xff]  ;;  %s3159_s7 = smov [#allocation16]  }
 0x257   : > { %v1472_v34 = vld [vmem:[#allocation3 + $0x9] sm:$0xff]  ;;  %2572 = vmatpush3.msra.mxu1 %v1856_v27  ;;  %v4246_v52 = vld [vmem:[#allocation13 + $0x2] ss:$0 sm:$0xff]  ;;  %v1516_v58 = vmul.f32 %v4244_v51, %v1458_v50  ;;  %v4253_v60 = vmul.f32 %v4244_v51, %v1460_v19  ;;  %v4260_v18 = vld [vmem:[#allocation13 + $0x9] ss:$0 sm:$0xff]  ;;  %v1584_v29 = vmul.f32 %v4256_v54, %v1458_v50  ;;  %v1586_v30 = vmul.f32 %v4256_v54, %v1460_v19  ;;  %p2984_p6 = pnand %p2983_p7, %p4903_p12  ;;  %s2986_s30 = sshll.u32 %s3159_s7, 4  ;;  %s2987_s30 = int_to_ptr.vmem [resolvable:$false] %s2986_s30 }
 0x258   : > { %v1476_v12 = vld [vmem:[#allocation3 + $0x29] sm:$0xff]  ;;  %2573 = vmatprep.subr.mxu1 %v1855_v42  ;;  %v1535_v61 = vmul.f32 %v4246_v52, %v1472_v34  ;;  %v1537_v15 = vmul.f32 %v4246_v52, %v1474_v55  ;;  %v4268_v53 = vld [vmem:[#allocation13 + $0x8] ss:$0 sm:$0xff]  ;;  %v4270_v25 = vld [vmem:[#allocation13 + $0xa] ss:$0 sm:$0xff]  ;;  %v1621_v14 = vadd.f32 %v1563_v21, %v1493_v47  ;;  %v1681_v26 = vmul.f32 %v4260_v18, %v1444_v38  ;;  %s2468_s19 = sshll.u32 %s4896_s10, 4  ;;  %p2989_p4 = scmp.lt.s32.totalorder %s4695_s26, %s2987_s30 }
 0x259   : > { %2574 = vmatpush3.msra.mxu1 %v1855_v42  ;;  %v4264_v39 = vmul.f32 %v4246_v52, %v1476_v12  ;;  %v1441_v23 = vld [vmem:[#allocation3 + $0x10] sm:$0xff]  ;;  %v1607_v16 = vmul.f32 %v4258_v24, %v1476_v12  ;;  %v1443_v36 = vld [vmem:[#allocation3 + $0x20] sm:$0xff]  ;;  %v1702_v35 = vmul.f32 %v4268_v53, %v1460_v19  ;;  %v1723_v17 = vmul.f32 %v4270_v25, %v1476_v12  ;;  %v1851_v49 = vld [vmem:[#allocation15] sm:$0xff]  ;;  %s2455_s27 = sshll.u32 %s4897_s25, 5  ;;  %p2985_p13 = pneg %p2984_p6 }
 0x25a   : > { %2575 = vmatprep.subr.mxu1 %v1854_v45  ;;  %v1852_v59 = vld [vmem:[#allocation15 + $0x8] sm:$0xff]  ;;  %v1459_v37 = vld [vmem:[#allocation3 + $0x1f] sm:$0xff]  ;;  %v1637_v28 = vadd.f32 %v1584_v29, %v1514_v40  ;;  %v1653_v32 = vadd.f32 %v1605_v13, %v1535_v61  ;;  %v1494_v33 = vmul.f32 %v4235_v56, %v1441_v23  ;;  %v1564_v19 = vmul.f32 %v4248_v46, %v1443_v36  ;;  %s2169_s29 = sadd.s32 %s2468_s19, %s2455_s27  ;;  %s2988_s28 = scalar_lea.vmem %s2987_s30, 4096 }
 0x25b   : > { %v1457_v20 = vld [vmem:[#allocation3 + $0xf] sm:$0xff]  ;;  %2576 = vmatpush3.msra.mxu1 %v1854_v45  ;;  %v1475_v42 = vld [vmem:[#allocation3 + $0x21] sm:$0xff]  ;;  %v1739_v45 = vadd.f32 %v1681_v26, %v1621_v14  ;;  %v1585_v34 = vmul.f32 %v4256_v54, %v1459_v37  ;;  %v4297_v29 = vld [vmem:[#allocation3 + $0x38] sm:$0xff]  ;;  %s2456_s21 = sshll.u32 %s2169_s29, 7  ;;  %p2990_p3 = scmp.lt.s32.totalorder %s2988_s28, %s2982_s1 }
 0x25c   : > { %v4279_v44 = vld [vmem:[#allocation3 + $0x30] sm:$0xff]  ;;  %2577 = vmatprep.subr.mxu1 %v1853_v57  ;;  %v1515_v38 = vmul.f32 %v4244_v51, %v1457_v20  ;;  %v1755_v55 = vadd.f32 %v1702_v35, %v1637_v28  ;;  %v1771_v12 = vadd.f32 %v1723_v17, %v1653_v32  ;;  %v1606_v47 = vmul.f32 %v4258_v24, %v1475_v42  ;;  %v4301_v20 = vld [vmem:[#allocation3 + $0x39] sm:$0xff]  ;;  %s4693_s0 = scalar_lea.hbm %s4902_s9, %s2456_s21 }
 0x25d   : > { %v1473_v62 = vld [vmem:[#allocation3 + $0x11] sm:$0xff]  ;;  %2578 = vmatpush3.msra.mxu1 %v1853_v57  ;;  %v1682_v40 = vmul.f32 %v4260_v18, %v4279_v44  ;;  %v1622_v61 = vadd.f32 %v1564_v19, %v1494_v33  ;;  %v1639_v35 = vadd.f32 %v1586_v30, %v1516_v58  ;;  %v1655_v32 = vadd.f32 %v1607_v16, %v1537_v15  ;;  %p2991_p1 = por %p2990_p3, %p2989_p4 }
 0x25e   : > { %v4281_v27 = vld [vmem:[#allocation3 + $0x2f] sm:$0xff]  ;;  %v1536_v50 = vmul.f32 %v4246_v52, %v1473_v62  ;;  %2579 = vmatprep.subr.mxu1 %v1852_v59  ;;  %v1638_v21 = vadd.f32 %v1585_v34, %v1515_v38  ;;  %v4299_v13 = vld [vmem:[#allocation3 + $0x37] sm:$0xff]  ;;  %v1787_v14 = vsel %vm627_vm1, %v1755_v55, 0.0  ;;  %v1683_v38 = vmul.f32 %v4260_v18, %v4297_v29 }
 0x25f   : > { %v4283_v48 = vld [vmem:[#allocation3 + $0x31] sm:$0xff]  ;;  %2580 = vmatpush3.msra.mxu1 %v1852_v59  ;;  %v1703_v57 = vmul.f32 %v4268_v53, %v4281_v27  ;;  %v1623_v59 = vadd.f32 %v1565_v22, %v4239_v63  ;;  %v1803_v17 = vadd.f32 %v1787_v14, %v1739_v45  ;;  %v1740_v62 = vadd.f32 %v1682_v40, %v1622_v61  ;;  %v4314_v63 = vld [vmem:[#allocation3 + $0x3f] sm:$0xff]  ;;  %v4336_v14 = vld [vmem:[#allocation3 + $0x48] sm:$0xff]  ;;  %p2992_p10 = pnand %p2991_p1, %p2985_p13 }
 0x260   : > { %v1724_v23 = vmul.f32 %v4270_v25, %v4283_v48  ;;  %2581 = vmatprep.subr.mxu1 %v1851_v49  ;;  %v1654_v26 = vadd.f32 %v1606_v47, %v1536_v50  ;;  %v1704_v19 = vmul.f32 %v4268_v53, %v4299_v13  ;;  %v1725_v34 = vmul.f32 %v4270_v25, %v4301_v20  ;;  %v4312_v47 = vld [vmem:[#allocation3 + $0x40] sm:$0xff] }
 0x261   : > { %2582 = vmatpush3.msra.mxu1 %v1851_v49  ;;  %v1756_v28 = vadd.f32 %v1703_v57, %v1638_v21  ;;  %v1835_v55 = vadd.f32 %v1803_v17, %v1771_v12  ;;  %v1496_v58 = vmul.f32 %v4235_v56, %v1443_v36  ;;  %v1517_v15 = vmul.f32 %v4244_v51, %v1459_v37  ;;  %v4320_v45 = vld [vmem:[#allocation3 + $0x41] sm:$0xff] }
 0x262   : > { %v1772_v33 = vadd.f32 %v1724_v23, %v1654_v26  ;;  %v1741_v30 = vadd.f32 %v1683_v38, %v1623_v59  ;;  %v1757_v16 = vadd.f32 %v1704_v19, %v1639_v35  ;;  %v1773_v49 = vadd.f32 %v1725_v34, %v1655_v32 }
 0x263   : > { %v1804_v50 = vadd.f32 %v1756_v28, %v1740_v62  ;;  %2583 = vmatprep.mubr.msk.f32.mxu1 %vm567_vm0, %v1835_v55  ;;  %v1538_v40 = vmul.f32 %v4246_v52, %v1475_v42  ;;  %v1566_v61 = vmul.f32 %v4248_v46, %v4279_v44  ;;  %v1587_v36 = vmul.f32 %v4256_v54, %v4281_v27  ;;  %v4341_v62 = vld [vmem:[#allocation3 + $0x47] sm:$0xff] }
 0x264   : > { %v1820_v22 = vsel %vm630_vm2, %v1772_v33, 0.0  ;;  %v1789_v37 = vsel %vm627_vm1, %v1757_v16, 0.0  ;;  %v1608_v21 = vmul.f32 %v4258_v24, %v4283_v48  ;;  %v1684_v57 = vmul.f32 %v4260_v18, %v4312_v47  ;;  %v4343_v28 = vld [vmem:[#allocation3 + $0x49] sm:$0xff] }
 0x265   : > { %v1836_v12 = vadd.f32 %v1820_v22, %v1804_v50  ;;  %v1705_v23 = vmul.f32 %v4268_v53, %v4314_v63  ;;  %v1805_v42 = vadd.f32 %v1789_v37, %v1741_v30  ;;  %v1624_v26 = vadd.f32 %v1566_v61, %v1496_v58  ;;  %v4363_v61 = vld [vmem:[#allocation3 + $0x4f] sm:$0xff] }
 0x266   : > { %v1640_v59 = vadd.f32 %v1587_v36, %v1517_v15  ;;  %v1726_v35 = vmul.f32 %v4270_v25, %v4320_v45  ;;  %v1656_v17 = vadd.f32 %v1608_v21, %v1538_v40  ;;  %v1567_v32 = vmul.f32 %v4248_v46, %v4297_v29  ;;  %v4361_v40 = vld [vmem:[#allocation3 + $0x50] sm:$0xff] }
 0x267   : > { %2584 = vmatmul.mubr.msk.f32.vlgmr.msra.gmra.mxu1 %vm567_vm0, %v1836_v12  ;;  %v1588_v33 = vmul.f32 %v4256_v54, %v4299_v13  ;;  %v1609_v38 = vmul.f32 %v4258_v24, %v4301_v20  ;;  %v1837_v19 = vadd.f32 %v1805_v42, %v1773_v49  ;;  %v1742_v34 = vadd.f32 %v1684_v57, %v1624_v26  ;;  %v4369_v36 = vld [vmem:[#allocation3 + $0x51] sm:$0xff] }
 0x268   : > { %v1758_v55 = vadd.f32 %v1705_v23, %v1640_v59  ;;  %v1685_v50 = vmul.f32 %v4260_v18, %v4336_v14  ;;  %v1774_v58 = vadd.f32 %v1726_v35, %v1656_v17  ;;  %v1625_v15 = vadd.f32 %v1567_v32, %v4242_v41 }
 0x269   : > { %v1641_v22 = vadd.f32 %v1588_v33, %v4253_v60  ;;  %v1657_v30 = vadd.f32 %v1609_v38, %v4264_v39  ;;  %2586 = vmatprep.mubr.msk.f32.mxu1 %vm567_vm0, %v1837_v19  ;;  %v1706_v12 = vmul.f32 %v4268_v53, %v4341_v62  ;;  %v1727_v49 = vmul.f32 %v4270_v25, %v4343_v28 }
 0x26a   : > { %v1806_v16 = vadd.f32 %v1758_v55, %v1742_v34  ;;  %v1498_v41 = vmul.f32 %v4235_v56, %v4279_v44  ;;  %v1822_v60 = vsel %vm630_vm2, %v1774_v58, 0.0  ;;  %v1743_v39 = vadd.f32 %v1685_v50, %v1625_v15  ;;  %v4392_v55 = vld [vmem:[#allocation3 + $0x58] sm:$0xff] }
 0x26b   : > { %v1519_v37 = vmul.f32 %v4244_v51, %v4281_v27  ;;  %v1540_v21 = vmul.f32 %v4246_v52, %v4283_v48  ;;  %v1759_v23 = vadd.f32 %v1706_v12, %v1641_v22  ;;  %v1775_v42 = vadd.f32 %v1727_v49, %v1657_v30  ;;  %v4394_v50 = vld [vmem:[#allocation3 + $0x57] sm:$0xff] }
 0x26c   : > { %v1838_v57 = vadd.f32 %v1822_v60, %v1806_v16  ;;  %v1568_v26 = vmul.f32 %v4248_v46, %v4312_v47  ;;  %v1589_v44 = vmul.f32 %v4256_v54, %v4314_v63  ;;  %v1610_v59 = vmul.f32 %v4258_v24, %v4320_v45  ;;  %v4398_v22 = vld [vmem:[#allocation3 + $0x59] sm:$0xff] }
 0x26d   : > { %v1686_v35 = vmul.f32 %v4260_v18, %v4361_v40  ;;  %v1707_v27 = vmul.f32 %v4268_v53, %v4363_v61  ;;  %v1791_v48 = vsel %vm627_vm1, %v1759_v23, 0.0  ;;  %v1728_v32 = vmul.f32 %v4270_v25, %v4369_v36 }
 0x26e   : > { %2587 = vmatmul.mubr.msk.f32.gmra.mxu1 %vm567_vm0, %v1838_v57  ;;  %v1626_v17 = vadd.f32 %v1568_v26, %v1498_v41  ;;  %v1499_v33 = vmul.f32 %v4235_v56, %v4297_v29  ;;  %v1807_v38 = vadd.f32 %v1791_v48, %v1743_v39  ;;  %v1642_v19 = vadd.f32 %v1589_v44, %v1519_v37  ;;  %v4417_v26 = vld [vmem:[#allocation3 + $0x60] sm:$0xff] }
 0x26f   : > { %v1658_v34 = vadd.f32 %v1610_v59, %v1540_v21  ;;  %v1520_v58 = vmul.f32 %v4244_v51, %v4299_v13  ;;  %v1541_v30 = vmul.f32 %v4246_v52, %v4301_v20  ;;  %v1569_v16 = vmul.f32 %v4248_v46, %v4336_v14 }
 0x270   : > { %v1744_v15 = vadd.f32 %v1686_v35, %v1626_v17  ;;  %v1590_v29 = vmul.f32 %v4256_v54, %v4341_v62  ;;  %v1839_v12 = vadd.f32 %v1807_v38, %v1775_v42  ;;  %v1760_v49 = vadd.f32 %v1707_v27, %v1642_v19  ;;  %v4419_v35 = vld [vmem:[#allocation3 + $0x5f] sm:$0xff] }
 0x271   : > { %v1776_v41 = vadd.f32 %v1728_v32, %v1658_v34  ;;  %v1611_v60 = vmul.f32 %v4258_v24, %v4343_v28  ;;  %v1627_v39 = vadd.f32 %v1569_v16, %v1499_v33  ;;  %v1687_v37 = vmul.f32 %v4260_v18, %v4392_v55  ;;  %v4421_v27 = vld [vmem:[#allocation3 + $0x61] sm:$0xff] }
 0x272   : > { %v1643_v13 = vadd.f32 %v1590_v29, %v1520_v58  ;;  %v1708_v20 = vmul.f32 %v4268_v53, %v4394_v50  ;;  %2589 = vmatprep.mubr.msk.f32.mxu1 %vm567_vm0, %v1839_v12  ;;  %v1808_v21 = vadd.f32 %v1760_v49, %v1744_v15  ;;  %v1729_v42 = vmul.f32 %v4270_v25, %v4398_v22  ;;  %v4444_v49 = vld [vmem:[#allocation3 + $0x68] sm:$0xff] }
 0x273   : > { %v1824_v57 = vsel %vm630_vm2, %v1776_v41, 0.0  ;;  %v1659_v23 = vadd.f32 %v1611_v60, %v1541_v30  ;;  %v1745_v44 = vadd.f32 %v1687_v37, %v1627_v39  ;;  %v1500_v48 = vmul.f32 %v4235_v56, %v4312_v47  ;;  %v4446_v41 = vld [vmem:[#allocation3 + $0x67] sm:$0xff] }
 0x274   : > { %v1761_v59 = vadd.f32 %v1708_v20, %v1643_v13  ;;  %v1521_v17 = vmul.f32 %v4244_v51, %v4314_v63  ;;  %v1840_v32 = vadd.f32 %v1824_v57, %v1808_v21  ;;  %v1542_v38 = vmul.f32 %v4246_v52, %v4320_v45  ;;  %v4448_v60 = vld [vmem:[#allocation3 + $0x69] sm:$0xff] }
 0x275   : > { %v1777_v33 = vadd.f32 %v1729_v42, %v1659_v23  ;;  %v1570_v19 = vmul.f32 %v4248_v46, %v4361_v40  ;;  %v1591_v58 = vmul.f32 %v4256_v54, %v4363_v61  ;;  %v1612_v47 = vmul.f32 %v4258_v24, %v4369_v36 }
 0x276   : > { %v1793_v34 = vsel %vm627_vm1, %v1761_v59, 0.0  ;;  %v1688_v63 = vmul.f32 %v4260_v18, %v4417_v26  ;;  %2590 = vmatmul.mubr.msk.f32.gmra.mxu1 %vm567_vm0, %v1840_v32  ;;  %v1709_v45 = vmul.f32 %v4268_v53, %v4419_v35  ;;  %v1730_v16 = vmul.f32 %v4270_v25, %v4421_v27 }
 0x277   : > { %v1809_v15 = vadd.f32 %v1793_v34, %v1745_v44  ;;  %v1628_v30 = vadd.f32 %v1570_v19, %v1500_v48  ;;  %v1644_v29 = vadd.f32 %v1591_v58, %v1521_v17  ;;  %v1660_v12 = vadd.f32 %v1612_v47, %v1542_v38  ;;  %v4471_v19 = vld [vmem:[#allocation3 + $0x70] sm:$0xff] }
 0x278   : > { %v1501_v39 = vmul.f32 %v4235_v56, %v4336_v14  ;;  %v1522_v13 = vmul.f32 %v4244_v51, %v4341_v62  ;;  %v1543_v21 = vmul.f32 %v4246_v52, %v4343_v28  ;;  %v1571_v57 = vmul.f32 %v4248_v46, %v4392_v55  ;;  %v4473_v34 = vld [vmem:[#allocation3 + $0x6f] sm:$0xff] }
 0x279   : > { %v1841_v37 = vadd.f32 %v1809_v15, %v1777_v33  ;;  %v1746_v20 = vadd.f32 %v1688_v63, %v1628_v30  ;;  %v1762_v23 = vadd.f32 %v1709_v45, %v1644_v29  ;;  %v1778_v42 = vadd.f32 %v1730_v16, %v1660_v12  ;;  %v4475_v47 = vld [vmem:[#allocation3 + $0x71] sm:$0xff] }
 0x27a   : > { %v1592_v44 = vmul.f32 %v4256_v54, %v4394_v50  ;;  %v1613_v59 = vmul.f32 %v4258_v24, %v4398_v22  ;;  %v1629_v14 = vadd.f32 %v1571_v57, %v1501_v39  ;;  %v1689_v62 = vmul.f32 %v4260_v18, %v4444_v49 }
 0x27b   : > { %2592 = vmatprep.mubr.msk.f32.mxu1 %vm567_vm0, %v1841_v37  ;;  %v1710_v28 = vmul.f32 %v4268_v53, %v4446_v41  ;;  %v1731_v48 = vmul.f32 %v4270_v25, %v4448_v60  ;;  %v1810_v17 = vadd.f32 %v1762_v23, %v1746_v20  ;;  %v1826_v32 = vsel %vm630_vm2, %v1778_v42, 0.0 }
 0x27c   : > { %v1645_v33 = vadd.f32 %v1592_v44, %v1522_v13  ;;  %v1661_v38 = vadd.f32 %v1613_v59, %v1543_v21  ;;  %v1747_v58 = vadd.f32 %v1689_v62, %v1629_v14  ;;  %v1502_v63 = vmul.f32 %v4235_v56, %v4361_v40  ;;  %v4500_v44 = vld [vmem:[#allocation3 + $0x78] sm:$0xff] }
 0x27d   : > { %v1523_v15 = vmul.f32 %v4244_v51, %v4363_v61  ;;  %v1544_v30 = vmul.f32 %v4246_v52, %v4369_v36  ;;  %v1842_v45 = vadd.f32 %v1826_v32, %v1810_v17  ;;  %v1572_v12 = vmul.f32 %v4248_v46, %v4417_v26  ;;  %v4502_v59 = vld [vmem:[#allocation3 + $0x77] sm:$0xff] }
 0x27e   : > { %v1763_v16 = vadd.f32 %v1710_v28, %v1645_v33  ;;  %v1779_v29 = vadd.f32 %v1731_v48, %v1661_v38  ;;  %v1593_v39 = vmul.f32 %v4256_v54, %v4419_v35  ;;  %v1614_v13 = vmul.f32 %v4258_v24, %v4421_v27  ;;  %v4506_v28 = vld [vmem:[#allocation3 + $0x79] sm:$0xff] }
 0x27f   : > { %v1690_v40 = vmul.f32 %v4260_v18, %v4471_v19  ;;  %v1711_v61 = vmul.f32 %v4268_v53, %v4473_v34  ;;  %2593 = vmatmul.mubr.msk.f32.gmra.mxu1 %vm567_vm0, %v1842_v45  ;;  %v1630_v37 = vadd.f32 %v1572_v12, %v1502_v63  ;;  %v1732_v20 = vmul.f32 %v4270_v25, %v4475_v47  ;;  %v4525_v12 = vld [vmem:[#allocation3 + $0x80] sm:$0xff] }
 0x280   : > { %v1795_v36 = vsel %vm627_vm1, %v1763_v16, 0.0  ;;  %v1503_v21 = vmul.f32 %v4235_v56, %v4392_v55  ;;  %v1646_v23 = vadd.f32 %v1593_v39, %v1523_v15  ;;  %v1662_v42 = vadd.f32 %v1614_v13, %v1544_v30 }
 0x281   : > { %v1811_v57 = vadd.f32 %v1795_v36, %v1747_v58  ;;  %v1524_v14 = vmul.f32 %v4244_v51, %v4394_v50  ;;  %v1748_v62 = vadd.f32 %v1690_v40, %v1630_v37  ;;  %v1545_v48 = vmul.f32 %v4246_v52, %v4398_v22  ;;  %v4527_v40 = vld [vmem:[#allocation3 + $0x7f] sm:$0xff] }
 0x282   : > { %v1573_v17 = vmul.f32 %v4248_v46, %v4444_v49  ;;  %v1594_v55 = vmul.f32 %v4256_v54, %v4446_v41  ;;  %v1764_v33 = vadd.f32 %v1711_v61, %v1646_v23  ;;  %v1780_v38 = vadd.f32 %v1732_v20, %v1662_v42  ;;  %v4529_v61 = vld [vmem:[#allocation3 + $0x81] sm:$0xff] }
 0x283   : > { %v1843_v32 = vadd.f32 %v1811_v57, %v1779_v29  ;;  %v1615_v58 = vmul.f32 %v4258_v24, %v4448_v60  ;;  %v1691_v15 = vmul.f32 %v4260_v18, %v4500_v44  ;;  %v1712_v22 = vmul.f32 %v4268_v53, %v4502_v59 }
 0x284   : > { %v1631_v63 = vadd.f32 %v1573_v17, %v1503_v21  ;;  %v1647_v50 = vadd.f32 %v1594_v55, %v1524_v14  ;;  %v1812_v30 = vadd.f32 %v1764_v33, %v1748_v62  ;;  %v1828_v45 = vsel %vm630_vm2, %v1780_v38, 0.0 }
 0x285   : > { %2595 = vmatprep.mubr.msk.f32.mxu1 %vm567_vm0, %v1843_v32  ;;  %v1663_v16 = vadd.f32 %v1615_v58, %v1545_v48  ;;  %v1733_v29 = vmul.f32 %v4270_v25, %v4506_v28  ;;  %v1504_v36 = vmul.f32 %v4235_v56, %v4417_v26  ;;  %v1525_v37 = vmul.f32 %v4244_v51, %v4419_v35  ;;  %v1551_v58 = vld [vmem:[#allocation3 + $0x88] sm:$0xff] }
 0x286   : > { %v1749_v39 = vadd.f32 %v1691_v15, %v1631_v63  ;;  %v1765_v13 = vadd.f32 %v1712_v22, %v1647_v50  ;;  %v1844_v20 = vadd.f32 %v1828_v45, %v1812_v30  ;;  %v1546_v57 = vmul.f32 %v4246_v52, %v4421_v27  ;;  %v1553_v63 = vld [vmem:[#allocation3 + $0x87] sm:$0xff] }
 0x287   : > { %v1781_v21 = vadd.f32 %v1733_v29, %v1663_v16  ;;  %v1574_v23 = vmul.f32 %v4248_v46, %v4471_v19  ;;  %v1595_v14 = vmul.f32 %v4256_v54, %v4473_v34  ;;  %v1616_v26 = vmul.f32 %v4258_v24, %v4475_v47  ;;  %v1555_v50 = vld [vmem:[#allocation3 + $0x89] sm:$0xff] }
 0x288   : > { %v1797_v42 = vsel %vm627_vm1, %v1765_v13, 0.0  ;;  %v1692_v35 = vmul.f32 %v4260_v18, %v4525_v12  ;;  %2596 = vmatmul.mubr.msk.f32.gmra.mxu1 %vm567_vm0, %v1844_v20  ;;  %v1713_v27 = vmul.f32 %v4268_v53, %v4527_v40  ;;  %v1734_v17 = vmul.f32 %v4270_v25, %v4529_v61 }
 0x289   : > { %v1813_v62 = vadd.f32 %v1797_v42, %v1749_v39  ;;  %v1632_v48 = vadd.f32 %v1574_v23, %v1504_v36  ;;  %v1648_v55 = vadd.f32 %v1595_v14, %v1525_v37  ;;  %v1664_v32 = vadd.f32 %v1616_v26, %v1546_v57  ;;  %v1552_v23 = vld [vmem:[#allocation3 + $0x90] sm:$0xff] }
 0x28a   : > { %v1505_v33 = vmul.f32 %v4235_v56, %v4444_v49  ;;  %v1526_v38 = vmul.f32 %v4244_v51, %v4446_v41  ;;  %v1547_v30 = vmul.f32 %v4246_v52, %v4448_v60  ;;  %v1575_v45 = vmul.f32 %v4248_v46, %v4500_v44  ;;  %v1554_v42 = vld [vmem:[#allocation3 + $0x8f] sm:$0xff] }
 0x28b   : > { %v1845_v15 = vadd.f32 %v1813_v62, %v1781_v21  ;;  %v1750_v22 = vadd.f32 %v1692_v35, %v1632_v48  ;;  %v1766_v16 = vadd.f32 %v1713_v27, %v1648_v55  ;;  %v1782_v29 = vadd.f32 %v1734_v17, %v1664_v32  ;;  %v1556_v48 = vld [vmem:[#allocation3 + $0x91] sm:$0xff] }
 0x28c   : > { %v1596_v39 = vmul.f32 %v4256_v54, %v4502_v59  ;;  %v1617_v49 = vmul.f32 %v4258_v24, %v4506_v28  ;;  %v1633_v41 = vadd.f32 %v1575_v45, %v1505_v33  ;;  %v1693_v13 = vmul.f32 %v4260_v18, %v1551_v58 }
 0x28d   : > { %2598 = vmatprep.mubr.msk.f32.mxu1 %vm567_vm0, %v1845_v15  ;;  %v1714_v36 = vmul.f32 %v4268_v53, %v1553_v63  ;;  %v1735_v60 = vmul.f32 %v4270_v25, %v1555_v50  ;;  %v1814_v37 = vadd.f32 %v1766_v16, %v1750_v22  ;;  %v1830_v20 = vsel %vm630_vm2, %v1782_v29, 0.0 }
 0x28e   : > { %v1649_v21 = vadd.f32 %v1596_v39, %v1526_v38  ;;  %v1665_v57 = vadd.f32 %v1617_v49, %v1547_v30  ;;  %v1751_v14 = vadd.f32 %v1693_v13, %v1633_v41  ;;  %v1506_v26 = vmul.f32 %v4235_v56, %v4471_v19  ;;  %v1669_v49 = vld [vmem:[#allocation3 + $0x98] sm:$0xff] }
 0x28f   : > { %v1527_v35 = vmul.f32 %v4244_v51, %v4473_v34  ;;  %v1548_v62 = vmul.f32 %v4246_v52, %v4475_v47  ;;  %v1846_v27 = vadd.f32 %v1830_v20, %v1814_v37  ;;  %v1576_v32 = vmul.f32 %v4248_v46, %v4525_v12  ;;  %v1671_v41 = vld [vmem:[#allocation3 + $0x97] sm:$0xff] }
 0x290   : > { %v1767_v17 = vadd.f32 %v1714_v36, %v1649_v21  ;;  %v1783_v55 = vadd.f32 %v1735_v60, %v1665_v57  ;;  %v1597_v33 = vmul.f32 %v4256_v54, %v4527_v40  ;;  %v1618_v38 = vmul.f32 %v4258_v24, %v4529_v61  ;;  %v1673_v20 = vld [vmem:[#allocation3 + $0x99] sm:$0xff] }
 0x291   : > { %v1694_v19 = vmul.f32 %v4260_v18, %v1552_v23  ;;  %v1715_v34 = vmul.f32 %v4268_v53, %v1554_v42  ;;  %2599 = vmatmul.mubr.msk.f32.gmra.mxu1 %vm567_vm0, %v1846_v27  ;;  %v1634_v15 = vadd.f32 %v1576_v32, %v1506_v26  ;;  %v1736_v22 = vmul.f32 %v4270_v25, %v1556_v48 }
 0x292   : > { %v1799_v47 = vsel %vm627_vm1, %v1767_v17, 0.0  ;;  %v1507_v30 = vmul.f32 %v4235_v56, %v4500_v44  ;;  %v1650_v16 = vadd.f32 %v1597_v33, %v1527_v35  ;;  %v1666_v29 = vadd.f32 %v1618_v38, %v1548_v62  ;;  %v1670_v17 = vld [vmem:[#allocation3 + $0xa0] sm:$0xff] }
 0x293   : > { %v1815_v45 = vadd.f32 %v1799_v47, %v1751_v14  ;;  %v1528_v39 = vmul.f32 %v4244_v51, %v4502_v59  ;;  %v1752_v13 = vadd.f32 %v1694_v19, %v1634_v15  ;;  %v1549_v36 = vmul.f32 %v4246_v52, %v4506_v28  ;;  %v1672_v38 = vld [vmem:[#allocation3 + $0x9f] sm:$0xff] }
 0x294   : > { %v1577_v60 = vmul.f32 %v4248_v46, %v1551_v58  ;;  %v1598_v37 = vmul.f32 %v4256_v54, %v1553_v63  ;;  %v1768_v57 = vadd.f32 %v1715_v34, %v1650_v16  ;;  %v1784_v44 = vadd.f32 %v1736_v22, %v1666_v29  ;;  %v1674_v19 = vld [vmem:[#allocation3 + $0xa1] sm:$0xff] }
 0x295   : > { %v1847_v21 = vadd.f32 %v1815_v45, %v1783_v55  ;;  %v1619_v14 = vmul.f32 %v4258_v24, %v1555_v50  ;;  %v1695_v59 = vmul.f32 %v4260_v18, %v1669_v49  ;;  %v1716_v62 = vmul.f32 %v4268_v53, %v1671_v41 }
 0x296   : > { %v1635_v26 = vadd.f32 %v1577_v60, %v1507_v30  ;;  %v1651_v35 = vadd.f32 %v1598_v37, %v1528_v39  ;;  %v1816_v27 = vadd.f32 %v1768_v57, %v1752_v13  ;;  %v1832_v28 = vsel %vm630_vm2, %v1784_v44, 0.0 }
 0x297   : > { %2601 = vmatprep.mubr.msk.f32.mxu1 %vm567_vm0, %v1847_v21  ;;  %v1667_v58 = vadd.f32 %v1619_v14, %v1549_v36  ;;  %v1737_v63 = vmul.f32 %v4270_v25, %v1673_v20  ;;  %v1508_v50 = vmul.f32 %v4235_v56, %v4525_v12  ;;  %v1529_v33 = vmul.f32 %v4244_v51, %v4527_v40 }
 0x298   : > { %v1753_v55 = vadd.f32 %v1695_v59, %v1635_v26  ;;  %v1769_v32 = vadd.f32 %v1716_v62, %v1651_v35  ;;  %v1848_v34 = vadd.f32 %v1832_v28, %v1816_v27  ;;  %v1550_v15 = vmul.f32 %v4246_v52, %v4529_v61 }
 0x299   : > { %v1785_v47 = vadd.f32 %v1737_v63, %v1667_v58  ;;  %v1578_v22 = vmul.f32 %v4248_v46, %v1552_v23  ;;  %v1599_v45 = vmul.f32 %v4256_v54, %v1554_v42  ;;  %v1620_v16 = vmul.f32 %v4258_v24, %v1556_v48 }
 0x29a   : > { %v1801_v30 = vsel %vm627_vm1, %v1769_v32, 0.0  ;;  %v1696_v56 = vmul.f32 %v4260_v18, %v1670_v17  ;;  %2602 = vmatmul.mubr.msk.f32.gmra.mxu1 %vm567_vm0, %v1848_v34  ;;  %v1717_v40 = vmul.f32 %v4268_v53, %v1672_v38  ;;  %v1738_v29 = vmul.f32 %v4270_v25, %v1674_v19  ;;  %v4625_v53 = vld [vmem:[%s4895_s13] ss:$0 sm:$0xff] }
 0x29b   : > { %v1817_v51 = vadd.f32 %v1801_v30, %v1753_v55  ;;  %v1636_v12 = vadd.f32 %v1578_v22, %v1508_v50  ;;  %v1652_v52 = vadd.f32 %v1599_v45, %v1529_v33  ;;  %v1668_v61 = vadd.f32 %v1620_v16, %v1550_v15 }
 0x29d   : > { %v1849_v46 = vadd.f32 %v1817_v51, %v1785_v47  ;;  %v1754_v23 = vadd.f32 %v1696_v56, %v1636_v12  ;;  %v1770_v31 = vadd.f32 %v1717_v40, %v1652_v52  ;;  %v1786_v39 = vadd.f32 %v1738_v29, %v1668_v61 }
 0x29f   : > { %2604 = vmatprep.mubr.msk.f32.mxu1 %vm567_vm0, %v1849_v46  ;;  %v1818_v54 = vadd.f32 %v1770_v31, %v1754_v23  ;;  %v1834_v24 = vsel %vm630_vm2, %v1786_v39, 0.0 }
 0x2a1   : > { %v1850_v18 = vadd.f32 %v1834_v24, %v1818_v54 }
 0x2a3   : > { %2605 = vmatmul.mubr.msk.f32.gmra.mxu1 %vm567_vm0, %v1850_v18 }
 0x327   : > { %v2585_v25 = vpop.f32.mrf.mxu1 }
 0x328   : > { %v1986_v42 = vadd.f32 %v2585_v25, %v4625_v53 }
 0x329   : > { %v1980_v48 = vpop.f32.mrf.mxu1 }
 0x32a   : > { %v2060_v49 = vmax.f32 %v1986_v42, 0.0  ;;  %v1981_v41 = vadd.f32 %v4625_v53, %v1980_v48 }
 0x32c   : > { %v2076_v13 = vmin.f32 %v2060_v49, 6.0  ;;  %v2059_v36 = vmax.f32 %v1981_v41, 0.0 }
 0x32e   : > { %v2092_v43 = vadd.f32 %v2076_v13, %v3565_v1  ;;  %v2075_v60 = vmin.f32 %v2059_v36, 6.0  ;;  %v2588_v37 = vpop.f32.mrf.mxu1 }
 0x32f   : > { %v1996_v57 = vadd.f32 %v2588_v37, %v4625_v53 }
 0x330   : > { %v2108_v20 = vmax.f32 %v2092_v43, 0.0  ;;  %v2091_v21 = vadd.f32 %v2075_v60, %v3562_v0  ;;  %v1990_v44 = vpop.f32.mrf.mxu1 }
 0x331   : > { %v2062_v35 = vmax.f32 %v1996_v57, 0.0  ;;  %v1991_v59 = vadd.f32 %v4625_v53, %v1990_v44 }
 0x332   : > { %v2124_v14 = vmin.f32 %v2108_v20, 6.0  ;;  %v2107_v26 = vmax.f32 %v2091_v21, 0.0 }
 0x333   : > { %v2078_v27 = vmin.f32 %v2062_v35, 6.0  ;;  %v2061_v28 = vmax.f32 %v1991_v59, 0.0 }
 0x334   : > { %2140 = vst.msk [vmem:[%s3643_s23 + $0x8] sm:$0xff] %vm567_vm0, %v2124_v14  ;;  %v2123_v62 = vmin.f32 %v2107_v26, 6.0 }
 0x335   : > { %v2094_v1 = vadd.f32 %v2078_v27, %v3577_v3  ;;  %v2077_v0 = vmin.f32 %v2061_v28, 6.0 }
 0x336   : > { %2139 = vst.msk [vmem:[%s3643_s23] sm:$0xff] %vm567_vm0, %v2123_v62  ;;  %v2591_v17 = vpop.f32.mrf.mxu1 }
 0x337   : > { %v2110_v58 = vmax.f32 %v2094_v1, 0.0  ;;  %v2093_v63 = vadd.f32 %v2077_v0, %v3568_v2  ;;  %v2006_v55 = vadd.f32 %v2591_v17, %v4625_v53 }
 0x338   : > { %v2000_v33 = vpop.f32.mrf.mxu1 }
 0x339   : > { %v2126_v32 = vmin.f32 %v2110_v58, 6.0  ;;  %v2109_v50 = vmax.f32 %v2093_v63, 0.0  ;;  %v2064_v38 = vmax.f32 %v2006_v55, 0.0  ;;  %v2001_v19 = vadd.f32 %v4625_v53, %v2000_v33 }
 0x33b   : > { %2142 = vst.msk [vmem:[%s3643_s23 + $0x18] sm:$0xff] %vm567_vm0, %v2126_v32  ;;  %v2125_v34 = vmin.f32 %v2109_v50, 6.0  ;;  %v2080_v47 = vmin.f32 %v2064_v38, 6.0  ;;  %v2063_v15 = vmax.f32 %v2001_v19, 0.0 }
 0x33d   : > { %2141 = vst.msk [vmem:[%s3643_s23 + $0x10] sm:$0xff] %vm567_vm0, %v2125_v34  ;;  %v2096_v2 = vadd.f32 %v2080_v47, %v3583_v5  ;;  %v2079_v3 = vmin.f32 %v2063_v15, 6.0  ;;  %v4899_v34 = vld [vmem:[#allocation38_spill] sm:$0xff] }
 0x33f   : > { %v2112_v22 = vmax.f32 %v2096_v2, 0.0  ;;  %v2095_v30 = vadd.f32 %v2079_v3, %v3580_v4  ;;  %v2594_v45 = vpop.f32.mrf.mxu1 }
 0x340   : > { %v2016_v16 = vadd.f32 %v2594_v45, %v4625_v53 }
 0x341   : > { %v2128_v56 = vmin.f32 %v2112_v22, 6.0  ;;  %v2111_v51 = vmax.f32 %v2095_v30, 0.0  ;;  %v2010_v12 = vpop.f32.mrf.mxu1 }
 0x342   : > { %v2066_v40 = vmax.f32 %v2016_v16, 0.0  ;;  %v2011_v29 = vadd.f32 %v4625_v53, %v2010_v12 }
 0x343   : > { %2144 = vst.msk [vmem:[%s3643_s23 + $0x28] sm:$0xff] %vm567_vm0, %v2128_v56  ;;  %v2127_v52 = vmin.f32 %v2111_v51, 6.0 }
 0x344   : > { %v2082_v61 = vmin.f32 %v2066_v40, 6.0  ;;  %v2065_v46 = vmax.f32 %v2011_v29, 0.0  ;;  %v4900_v40 = vld [vmem:[#allocation41_spill] sm:$0xff] }
 0x345   : > { %2143 = vst.msk [vmem:[%s3643_s23 + $0x20] sm:$0xff] %vm567_vm0, %v2127_v52 }
 0x346   : > { %v2098_v4 = vadd.f32 %v2082_v61, %v3595_v7  ;;  %v2081_v5 = vmin.f32 %v2065_v46, 6.0  ;;  %v4901_v46 = vld [vmem:[#allocation40_spill] sm:$0xff] }
 0x348   : > { %v2114_v23 = vmax.f32 %v2098_v4, 0.0  ;;  %v2097_v31 = vadd.f32 %v2081_v5, %v3592_v6  ;;  %v2597_v39 = vpop.f32.mrf.mxu1 }
 0x349   : > { %v2026_v54 = vadd.f32 %v2597_v39, %v4625_v53 }
 0x34a   : > { %v2130_v24 = vmin.f32 %v2114_v23, 6.0  ;;  %v2113_v18 = vmax.f32 %v2097_v31, 0.0  ;;  %v2020_v25 = vpop.f32.mrf.mxu1 }
 0x34b   : > { %v2068_v42 = vmax.f32 %v2026_v54, 0.0  ;;  %v2021_v48 = vadd.f32 %v4625_v53, %v2020_v25 }
 0x34c   : > { %2146 = vst.msk [vmem:[%s3643_s23 + $0x38] sm:$0xff] %vm567_vm0, %v2130_v24  ;;  %v2129_v49 = vmin.f32 %v2113_v18, 6.0 }
 0x34d   : > { %v2084_v41 = vmin.f32 %v2068_v42, 6.0  ;;  %v2067_v13 = vmax.f32 %v2021_v48, 0.0 }
 0x34e   : > { %2145 = vst.msk [vmem:[%s3643_s23 + $0x30] sm:$0xff] %vm567_vm0, %v2129_v49 }
 0x34f   : > { %v2100_v6 = vadd.f32 %v2084_v41, %v3607_v9  ;;  %v2083_v7 = vmin.f32 %v2067_v13, 6.0 }
 0x351   : > { %v2116_v36 = vmax.f32 %v2100_v6, 0.0  ;;  %v2099_v43 = vadd.f32 %v2083_v7, %v3598_v8  ;;  %v2600_v60 = vpop.f32.mrf.mxu1 }
 0x352   : > { %v2036_v37 = vadd.f32 %v2600_v60, %v4625_v53 }
 0x353   : > { %v2132_v20 = vmin.f32 %v2116_v36, 6.0  ;;  %v2115_v21 = vmax.f32 %v2099_v43, 0.0  ;;  %v2030_v57 = vpop.f32.mrf.mxu1 }
 0x354   : > { %v2070_v44 = vmax.f32 %v2036_v37, 0.0  ;;  %v2031_v14 = vadd.f32 %v4625_v53, %v2030_v57 }
 0x355   : > { %2148 = vst.msk [vmem:[%s3643_s23 + $0x48] sm:$0xff] %vm567_vm0, %v2132_v20  ;;  %v2131_v26 = vmin.f32 %v2115_v21, 6.0 }
 0x356   : > { %v2086_v35 = vmin.f32 %v2070_v44, 6.0  ;;  %v2069_v59 = vmax.f32 %v2031_v14, 0.0 }
 0x357   : > { %2147 = vst.msk [vmem:[%s3643_s23 + $0x40] sm:$0xff] %vm567_vm0, %v2131_v26 }
 0x358   : > { %v2102_v8 = vadd.f32 %v2086_v35, %v3613_v11  ;;  %v2085_v9 = vmin.f32 %v2069_v59, 6.0 }
 0x35a   : > { %v2118_v62 = vmax.f32 %v2102_v8, 0.0  ;;  %v2101_v27 = vadd.f32 %v2085_v9, %v3610_v10  ;;  %v2603_v28 = vpop.f32.mrf.mxu1  ;;  %v4898_v10 = vld [vmem:[#allocation39_spill] sm:$0xff] }
 0x35b   : > { %v2046_v1 = vadd.f32 %v2603_v28, %v4625_v53 }
 0x35c   : > { %v2134_v0 = vmin.f32 %v2118_v62, 6.0  ;;  %v2117_v58 = vmax.f32 %v2101_v27, 0.0  ;;  %v2040_v63 = vpop.f32.mrf.mxu1 }
 0x35d   : > { %v2072_v17 = vmax.f32 %v2046_v1, 0.0  ;;  %v2041_v55 = vadd.f32 %v4625_v53, %v2040_v63 }
 0x35e   : > { %2150 = vst.msk [vmem:[%s3643_s23 + $0x58] sm:$0xff] %vm567_vm0, %v2134_v0  ;;  %v2133_v32 = vmin.f32 %v2117_v58, 6.0 }
 0x35f   : > { %v2088_v50 = vmin.f32 %v2072_v17, 6.0  ;;  %v2071_v11 = vmax.f32 %v2041_v55, 0.0 }
 0x360   : > { %2149 = vst.msk [vmem:[%s3643_s23 + $0x50] sm:$0xff] %vm567_vm0, %v2133_v32 }
 0x361   : > { %v2104_v33 = vadd.f32 %v2088_v50, %v4898_v10  ;;  %v2087_v38 = vmin.f32 %v2071_v11, 6.0 }
 0x363   : > { %v2120_v19 = vmax.f32 %v2104_v33, 0.0  ;;  %v2103_v47 = vadd.f32 %v2087_v38, %v4899_v34  ;;  %v2606_v15 = vpop.f32.mrf.mxu1 }
 0x364   : > { %v2056_v2 = vadd.f32 %v2606_v15, %v4625_v53 }
 0x365   : > { %v2136_v3 = vmin.f32 %v2120_v19, 6.0  ;;  %v2119_v22 = vmax.f32 %v2103_v47, 0.0  ;;  %v2050_v30 = vpop.f32.mrf.mxu1 }
 0x366   : > { %v2074_v45 = vmax.f32 %v2056_v2, 0.0  ;;  %v2051_v16 = vadd.f32 %v4625_v53, %v2050_v30 }
 0x367   : > { %2152 = vst.msk [vmem:[%s3643_s23 + $0x68] sm:$0xff] %vm567_vm0, %v2136_v3  ;;  %v2135_v56 = vmin.f32 %v2119_v22, 6.0 }
 0x368   : > { %v2090_v51 = vmin.f32 %v2074_v45, 6.0  ;;  %v2073_v12 = vmax.f32 %v2051_v16, 0.0 }
 0x369   : > { %2151 = vst.msk [vmem:[%s3643_s23 + $0x60] sm:$0xff] %vm567_vm0, %v2135_v56 }
 0x36a   : > { %v2106_v29 = vadd.f32 %v2090_v51, %v4900_v40  ;;  %v2089_v52 = vmin.f32 %v2073_v12, 6.0 }
 0x36c   : > { %v2122_v61 = vmax.f32 %v2106_v29, 0.0  ;;  %v2105_v53 = vadd.f32 %v2089_v52, %v4901_v46 }
 0x36e   : > { %v2138_v4 = vmin.f32 %v2122_v61, 6.0  ;;  %v2121_v5 = vmax.f32 %v2105_v53, 0.0 }
 0x370   : > { %2154 = vst.msk [vmem:[%s3643_s23 + $0x78] sm:$0xff] %vm567_vm0, %v2138_v4  ;;  %v2137_v23 = vmin.f32 %v2121_v5, 6.0 }
 0x372   : > { %2153 = vst.msk [vmem:[%s3643_s23 + $0x70] sm:$0xff] %vm567_vm0, %v2137_v23 }
 0x373   : > { %2995 = shalt.err (!%p2992_p10)
}
 0x374   : > { %s2996_s23 = scalar_lea.hbm %s4693_s0, 2048  ;;  %s3000_s20 = scalar_lea.hbm %s4902_s9, 8192 }
 0x375   : > { %p2997_p8 = scmp.ne.s32.totalorder %s4693_s0, %s2996_s23  ;;  %p3001_p2 = scmp.lt.s32.totalorder %s4693_s0, %s4902_s9 }
 0x376   : > { %p3002_p0 = scmp.lt.s32.totalorder %s3000_s20, %s2996_s23 }
 0x377   : > { %p2998_p11 = pnand %p2997_p8, %p4903_p12 }
 0x378   : > { %p3003_p5 = por %p3002_p0, %p3001_p2 }
 0x379   : > { %p2999_p9 = pneg %p2998_p11 }
 0x37b   : > { %p3004_p7 = pnand %p3003_p5, %p2999_p9 }
 0x37d   : > { %3007 = shalt.err (!%p3004_p7)
}
 0x37e   : > { %s3160_s25 = smov 128   ;;  %s3161_s19 = smov 8  }
 0x37f   : > { %2629 = dma.vmem_to_hbm [thread:$0]  (%p4903_p12), %s4695_s26, 2048, %s4693_s0, %s2156_s12, %s3160_s25, %s3160_s25, %s3161_s19  }
 0x380 PF: > { %p2667_p6 = scmp.ge.s32.totalorder %s3142_s22, 2  ;;  %s2187_s27 = sand.u32 1, %s3114_s15  }
 0x381   : > { %p4904_p13 = scmp.ne.s32.totalorder %s4855_s11, 0  ;;  %s2188_s29 = scalar_lea.sflag [#allocation6], %s2187_s27 }
 0x383   : > { %p2655_p4 = pnand %p2667_p6, %p4904_p13 }
 0x385   : > { %p2656_p3 = pneg %p2655_p4 }
 0x387   : > { %3085 = dma.done.wait (%p2656_p3), %s2188_s29, 2048  }
 0x388   : > { %3087 = vsyncadd (%p2656_p3), %s2188_s29, 4294965248  ;;  %s30_s22 = sadd.s32 1, %s3142_s22   ;;  %s4906_s30 = sld [smem:[#allocation24_spill]] }
 0x389   : > { %p4729_p1 = scmp.ge.s32.totalorder %s30_s22, 6   ;;  %s4907_s10 = sld [smem:[#allocation25_spill]] }
 0x38a   : > { %s4908_s12 = sld [smem:[#allocation26_spill]]  ;;  %s4915_s11 = smov %s4938_s18 }
 0x38b   : > { %s4909_s3 = sld [smem:[#allocation37_spill]]  ;;  %s4916_s13 = smov %s3110_s14 }
 0x38c   : > { %s4910_s8 = sld [smem:[#allocation29_spill]]  ;;  %s4918_s15 = smov %s3118_s16 }
 0x38d   : > { %s4911_s19 = sld [smem:[#allocation30_spill]]  ;;  %s4919_s16 = smov %s3122_s17 }
 0x38e   : > { %s4912_s20 = sld [smem:[#allocation32_spill]]  ;;  %s4920_s17 = smov %s3427_s24 }
 0x38f   : > { %s4913_s26 = sld [smem:[#allocation33_spill]] }
 0x391   : > { %s4917_s14 = smov %s4909_s3  ;;  %29 = sbr.rel (!%p4729_p1) target bundleno = 25 (0x19), region = 169 }
 0x392   : > { %s4921_s18 = smov %s4910_s8 }
 0x395   : > { %s4922_s21 = smov %s4913_s26 }
 0x396   :  { %2193 = vsyncpa [#allocation5], 1 }
 0x397   :  { %2195 = vsyncpa [#allocation5 + $0x1], 1 }
 0x398   :  { %2196 = vsyncpa [#allocation8], 1 }
 0x399   :  { %2198 = vsyncpa [#allocation8 + $0x1], 1 }
 0x39a   :  { %2199 = vsyncpa [#allocation11], 1 }
 0x39b   :  { %2200 = vsyncpa [#allocation14], 1 }
 0x39c   :  { %2201 = vsyncpa [#allocation6], 1 }
 0x39d   :  { %2203 = vsyncpa [#allocation6 + $0x1], 1 }

</bundles_post_ra>
